<compile_context>
chip_gen: v7x
topology: tpu7x:2x2x1
jax: 0.10.0
libtpu: 0.0.40
codegen_flags: <defaults>
</compile_context>

<pallas_src>
import jax
import jax.numpy as jnp
from jax.experimental import pallas as pl
from jax.experimental.pallas import tpu as pltpu

# ---------------- model configuration (small, synthetic) ----------------
HIDDEN = 32
NUM_HEADS = 4
HEAD_DIM = HIDDEN // NUM_HEADS
FFN = 4 * HIDDEN
VOCAB = 64
MAX_POS = 16
NUM_LAYERS = 2
LABEL_NUM = 4
NEG_INF = -1e9
LN_EPS = 1e-5   # PyTorch nn.LayerNorm default

# packed output slab layout (one lane-dense (8,128) store; split in the wrapper)
OUT_ROWS = 8
OUT_COLS = 128
COL_CLS = 0                       # [:, 0:HIDDEN]                      cls_embedding
COL_PROB = HIDDEN                 # [:, HIDDEN:HIDDEN+LABEL_NUM]       softmax probs
COL_LOGP = HIDDEN + LABEL_NUM     # [:, ...:HIDDEN+2*LABEL_NUM]        log-softmax
COL_LOSS = HIDDEN + 2 * LABEL_NUM # [0, COL_LOSS]                      masked LM loss


def _vmem_spec():
    return pl.BlockSpec(memory_space=pltpu.MemorySpace.VMEM)


# ---------------- fused forward kernel ----------------
def fused_forward_kernel(x_ref, key_mask_ref,
                         wqkv_ref, bqkv_ref, wo_ref, bo_ref, ln_ref,
                         w1_ref, b1_ref, w2_ref, b2_ref,
                         tok_emb_ref, tgt_ref, lm_mask_ref,
                         clsw_ref, clsb_ref,
                         out_ref):
    """Whole TransformerDownstream forward on a flat (N = B*SP, H) activation block."""
    N, H = x_ref.shape
    B, SP = key_mask_ref.shape
    scale = 1.0 / (HEAD_DIM ** 0.5)

    def layer_norm(v, g, b):
        # one-pass statistics: E[x], E[x^2] -> var
        mu = jnp.mean(v, axis=-1, keepdims=True)
        m2 = jnp.mean(v * v, axis=-1, keepdims=True)
        var = m2 - mu * mu
        return (v - mu) * jax.lax.rsqrt(var + LN_EPS) * g + b

    x = x_ref[...]                                                    # (N, H) f32, VMEM resident

    # additive key-padding mask built in-kernel from the tiny (B, SP) validity vector
    bias = jnp.where(key_mask_ref[...] > 0.5, 0.0, NEG_INF).reshape(B, 1, SP)   # (B, 1, SP)

    # static unroll (NUM_LAYERS == 2).
    # TODO(synk): switch to lax.fori_loop with dynamic weight-ref indexing if NUM_LAYERS grows.
    for li in range(NUM_LAYERS):
        xb = x.astype(jnp.bfloat16)

        # --- fused q/k/v projection: one (N, 3H) MXU pass ---
        qkv = jnp.dot(xb, wqkv_ref[li], preferred_element_type=jnp.float32) + bqkv_ref[li]
        q = qkv[:, 0:H].reshape(B, SP, H).astype(jnp.bfloat16)
        k = qkv[:, H:2 * H].reshape(B, SP, H).astype(jnp.bfloat16)
        v = qkv[:, 2 * H:3 * H].reshape(B, SP, H).astype(jnp.bfloat16)

        # --- per-head, per-batch attention; (B, SP, SP) scores only (no cross-batch waste) ---
        head_ctx = []
        for h in range(NUM_HEADS):
            lo = h * HEAD_DIM
            qh = q[:, :, lo:lo + HEAD_DIM]
            kh = k[:, :, lo:lo + HEAD_DIM]
            vh = v[:, :, lo:lo + HEAD_DIM]
            s = jnp.einsum('bqd,bkd->bqk', qh, kh,
                           preferred_element_type=jnp.float32) * scale + bias   # (B, SP, SP)
            m = jnp.max(s, axis=-1, keepdims=True)
            e = jnp.exp(s - m)
            p = e / jnp.sum(e, axis=-1, keepdims=True)                           # exact softmax (f32)
            head_ctx.append(jnp.einsum('bqk,bkd->bqd', p.astype(jnp.bfloat16), vh,
                                       preferred_element_type=jnp.float32))
        # collect heads in-register, single lane-dense concat (no masked 8-lane stores)
        ctx = jnp.concatenate(head_ctx, axis=-1).reshape(N, H)                   # (N, H) f32

        attn = jnp.dot(ctx.astype(jnp.bfloat16), wo_ref[li],
                       preferred_element_type=jnp.float32) + bo_ref[li]
        h1 = layer_norm(x + attn, ln_ref[li, 0], ln_ref[li, 1])

        ff = jnp.dot(h1.astype(jnp.bfloat16), w1_ref[li],
                     preferred_element_type=jnp.float32) + b1_ref[li]
        # TODO(synk): PyTorch nn.GELU default is exact (erf); tanh approximation assumed for the
        # (unspecified) PureTransformer and for clean EUP lowering.
        ff = jax.nn.gelu(ff, approximate=True)
        ff = jnp.dot(ff.astype(jnp.bfloat16), w2_ref[li],
                     preferred_element_type=jnp.float32) + b2_ref[li]
        x = layer_norm(h1 + ff, ln_ref[li, 2], ln_ref[li, 3])

    # ---- masked LM loss: tied-embedding head, logits = x @ tok_emb^T (in-kernel trans_b) ----
    # TODO(synk): no output LayerNorm/bias before the tied LM head (PureTransformer internals assumed).
    # TODO(synk): at realistic vocab sizes, tile this over V (streaming max/logsumexp per V-tile).
    xb = x.astype(jnp.bfloat16)
    logits = jax.lax.dot_general(xb, tok_emb_ref[...], (((1,), (1,)), ((), ())),
                                 preferred_element_type=jnp.float32)             # (N, V)
    lm = jnp.max(logits, axis=-1, keepdims=True)
    lse = lm + jnp.log(jnp.sum(jnp.exp(logits - lm), axis=-1, keepdims=True))
    vocab_ids = jax.lax.broadcasted_iota(jnp.int32, logits.shape, 1)
    tgt_logit = jnp.sum(jnp.where(vocab_ids == tgt_ref[...], logits, 0.0),
                        axis=-1, keepdims=True)                                  # (N, 1)
    nll = lse - tgt_logit
    w = lm_mask_ref[...]                                                         # (N, 1); 0 at CLS/pad rows
    total = jnp.sum(nll * w, axis=0, keepdims=True)                              # (1, 1)
    count = jnp.sum(w, axis=0, keepdims=True)
    lm_loss = total / jnp.maximum(count, 1.0)                                    # (1, 1)

    # ---- CLS embedding (single strided slice of the aligned (B, SP, H) view) + classifier ----
    cls_rows = x.reshape(B, SP, H)[:, 0:1, :].reshape(B, H)                      # (B, H)
    cls_logits = jnp.dot(cls_rows.astype(jnp.bfloat16), clsw_ref[...],
                         preferred_element_type=jnp.float32) + clsb_ref[...]     # (B, L)
    cm = jnp.max(cls_logits, axis=-1, keepdims=True)
    ce = jnp.exp(cls_logits - cm)
    cs = jnp.sum(ce, axis=-1, keepdims=True)
    probs = ce / cs
    logp = (cls_logits - cm) - jnp.log(cs)

    # ---- pack everything into one lane-dense (8, 128) slab: single unmasked store ----
    used = HIDDEN + 2 * LABEL_NUM + 1
    lm_col = lm_loss * jnp.ones((B, 1), jnp.float32)
    block = jnp.concatenate(
        [cls_rows, probs, logp, lm_col,
         jnp.zeros((B, OUT_COLS - used), jnp.float32)], axis=-1)                 # (B, 128)
    out_ref[...] = jnp.concatenate(
        [block, jnp.zeros((OUT_ROWS - B, OUT_COLS), jnp.float32)], axis=0)       # (8, 128)


# ---------------- pallas_call wrapper ----------------
def fused_forward_call(x_flat, key_mask, tgt_flat, lm_mask, params, batch):
    assert batch <= OUT_ROWS, "packed output slab supports batch <= 8 at these toy sizes"
    args = (x_flat, key_mask,
            params['w_qkv'], params['b_qkv'], params['w_o'], params['b_o'], params['ln'],
            params['w1'], params['b1'], params['w2'], params['b2'],
            params['tok_emb_lm'], tgt_flat, lm_mask,
            params['cls_w'], params['cls_b'])
    # Gridless single call: at these toy sizes the whole model (<200 KB) is VMEM resident.
    # At realistic sizes: add a grid over batch / row tiles marked "parallel" (v7x has 2 TCs and
    # only 64 MiB VMEM), tile the LM head over V, and re-derive residency vs. vmem_limit_bytes.
    out = pl.pallas_call(
        fused_forward_kernel,
        out_shape=jax.ShapeDtypeStruct((OUT_ROWS, OUT_COLS), jnp.float32),
        in_specs=[_vmem_spec() for _ in args],
        out_specs=_vmem_spec(),
        compiler_params=pltpu.CompilerParams(vmem_limit_bytes=32 * 1024 * 1024),
    )(*args)
    lm_loss = out[0, COL_LOSS]
    cls_emb = out[:batch, COL_CLS:COL_CLS + HIDDEN]
    probs = out[:batch, COL_PROB:COL_PROB + LABEL_NUM]
    logp = out[:batch, COL_LOGP:COL_LOGP + LABEL_NUM]
    return lm_loss, cls_emb, probs, logp


# ---------------- parameters (deterministic synthetic init, packed / bf16 matmul weights) ----------------
def init_params(seed=0):
    key = jax.random.PRNGKey(seed)
    keys = iter(jax.random.split(key, 8 + NUM_LAYERS * 8))

    def normal(shape, std=0.02, dtype=jnp.float32):
        return (std * jax.random.normal(next(keys), shape)).astype(dtype)

    tok_emb = normal((VOCAB, HIDDEN))                                  # f32 master (wrapper gather)
    params = {
        'tok_emb': tok_emb,
        'tok_emb_lm': tok_emb.astype(jnp.bfloat16),                    # tied copy for in-kernel LM head
        'pos_emb': normal((MAX_POS, HIDDEN)),
        'cls_emb': normal((HIDDEN,)),
        'cls_w': normal((HIDDEN, LABEL_NUM), dtype=jnp.bfloat16),
        'cls_b': jnp.zeros((1, LABEL_NUM), jnp.float32),
    }

    w_qkv, w_o, w1, w2 = [], [], [], []
    for _ in range(NUM_LAYERS):
        w_qkv.append(normal((HIDDEN, 3 * HIDDEN), dtype=jnp.bfloat16))
        w_o.append(normal((HIDDEN, HIDDEN), dtype=jnp.bfloat16))
        w1.append(normal((HIDDEN, FFN), dtype=jnp.bfloat16))
        w2.append(normal((FFN, HIDDEN), dtype=jnp.bfloat16))
    params['w_qkv'] = jnp.stack(w_qkv, axis=0)                          # (L, H, 3H)  fused q,k,v
    params['b_qkv'] = jnp.zeros((NUM_LAYERS, 1, 3 * HIDDEN), jnp.float32)
    params['w_o'] = jnp.stack(w_o, axis=0)                              # (L, H, H)
    params['b_o'] = jnp.zeros((NUM_LAYERS, 1, HIDDEN), jnp.float32)
    ones = jnp.ones((NUM_LAYERS, 1, 1, HIDDEN), jnp.float32)
    zeros = jnp.zeros((NUM_LAYERS, 1, 1, HIDDEN), jnp.float32)
    params['ln'] = jnp.concatenate([ones, zeros, ones, zeros], axis=1)  # (L, 4, 1, H)  g1,b1,g2,b2
    params['w1'] = jnp.stack(w1, axis=0)                                # (L, H, FFN)
    params['b1'] = jnp.zeros((NUM_LAYERS, 1, FFN), jnp.float32)
    params['w2'] = jnp.stack(w2, axis=0)                                # (L, FFN, H)
    params['b2'] = jnp.zeros((NUM_LAYERS, 1, HIDDEN), jnp.float32)
    return params


# ---------------- forward pass (embedding gather / glue in JAX, everything else fused Pallas) ----------------
def transformer_downstream_forward(params, input_ids, attention_mask,
                                   labels=None, tgt_ids=None, training=False):
    B, S = input_ids.shape
    S1 = S + 1
    SP = ((S1 + 7) // 8) * 8            # pad (CLS + tokens) to a sublane-aligned length
    assert SP <= MAX_POS
    PAD = SP - S1
    N = B * SP

    # --- token embed + CLS prepend + pad + positional embed (data-dependent gather -> wrapper) ---
    tok = jnp.take(params['tok_emb'], input_ids, axis=0)                        # (B, S, H)
    cls = jnp.broadcast_to(params['cls_emb'][None, None, :], (B, 1, HIDDEN))
    pad = jnp.zeros((B, PAD, HIDDEN), jnp.float32)
    x = jnp.concatenate([cls, tok, pad], axis=1) + params['pos_emb'][:SP][None, :, :]
    x_flat = x.reshape(N, HIDDEN)                                               # flat, 8-aligned rows

    # --- key validity per batch (CLS valid, tokens per attention_mask, pad invalid) ---
    key_mask = jnp.concatenate(
        [jnp.ones((B, 1), jnp.float32),
         attention_mask.astype(jnp.float32),
         jnp.zeros((B, PAD), jnp.float32)], axis=1)                             # (B, SP)

    # --- LM targets / mask (zeros at CLS and pad rows); no (B,S,V) one-hot tensor ---
    if tgt_ids is None:
        tgt_flat = jnp.zeros((N, 1), jnp.int32)
        lm_mask = jnp.zeros((N, 1), jnp.float32)
    else:
        tgt_flat = jnp.concatenate(
            [jnp.zeros((B, 1), jnp.int32), tgt_ids.astype(jnp.int32),
             jnp.zeros((B, PAD), jnp.int32)], axis=1).reshape(N, 1)
        lm_mask = jnp.concatenate(
            [jnp.zeros((B, 1), jnp.float32), attention_mask.astype(jnp.float32),
             jnp.zeros((B, PAD), jnp.float32)], axis=1).reshape(N, 1)

    lm_loss, cls_embedding, probs, logp = fused_forward_call(
        x_flat, key_mask, tgt_flat, lm_mask, params, B)

    # torch: if torch.any(torch.isnan(lm_loss)): lm_loss.fill_(0.0)
    lm_loss = jnp.where(jnp.isnan(lm_loss), jnp.zeros_like(lm_loss), lm_loss)

    if training:
        onehot_l = jax.nn.one_hot(labels, LABEL_NUM, dtype=jnp.float32)
        cls_loss = -jnp.mean(jnp.sum(onehot_l * logp, axis=-1))
        return {'loss': [cls_loss, lm_loss]}

    return {'loss': lm_loss, 'cls_embedding': cls_embedding, 'predict': probs}


# ---------------- demo ----------------
if __name__ == "__main__":
    params = init_params(seed=0)

    B, S = 2, 8
    key = jax.random.PRNGKey(0)
    k1, k2, k3 = jax.random.split(key, 3)
    input_ids = jax.random.randint(k1, (B, S), 0, VOCAB, dtype=jnp.int32)
    tgt_ids = jax.random.randint(k2, (B, S), 0, VOCAB, dtype=jnp.int32)
    labels = jax.random.randint(k3, (B,), 0, LABEL_NUM, dtype=jnp.int32)
    attention_mask = jnp.ones((B, S), jnp.int32).at[1, 6:].set(0)   # second sample padded

    # eval path (self.training == False): returns results + 'predict'
    out = transformer_downstream_forward(params, input_ids, attention_mask,
                                         labels=labels, tgt_ids=tgt_ids, training=False)
    out = jax.block_until_ready(out)

    assert out['predict'].shape == (B, LABEL_NUM)
    assert out['cls_embedding'].shape == (B, HIDDEN)
    assert bool(jnp.all(jnp.isfinite(out['predict'])))
    assert bool(jnp.allclose(jnp.sum(out['predict'], axis=-1), 1.0, atol=1e-4))
    assert bool(jnp.isfinite(out['loss']))

    # also exercise the training branch once
    tr = jax.block_until_ready(
        transformer_downstream_forward(params, input_ids, attention_mask,
                                       labels=labels, tgt_ids=tgt_ids, training=True))
    assert len(tr['loss']) == 2
    assert bool(jnp.isfinite(tr['loss'][0])) and bool(jnp.isfinite(tr['loss'][1]))

    print("KERNEL_OK")
</pallas_src>

<mosaic_0001>
module attributes {stable_mosaic.version = 11 : i64} {
  func.func @fused_forward_kernel(%arg0: memref<32x32xf32, #tpu.memory_space<vmem>>, %arg1: memref<2x16xf32, #tpu.memory_space<vmem>>, %arg2: memref<2x32x96xbf16, #tpu.memory_space<vmem>>, %arg3: memref<2x1x96xf32, #tpu.memory_space<vmem>>, %arg4: memref<2x32x32xbf16, #tpu.memory_space<vmem>>, %arg5: memref<2x1x32xf32, #tpu.memory_space<vmem>>, %arg6: memref<2x4x1x32xf32, #tpu.memory_space<vmem>>, %arg7: memref<2x32x128xbf16, #tpu.memory_space<vmem>>, %arg8: memref<2x1x128xf32, #tpu.memory_space<vmem>>, %arg9: memref<2x128x32xbf16, #tpu.memory_space<vmem>>, %arg10: memref<2x1x32xf32, #tpu.memory_space<vmem>>, %arg11: memref<64x32xbf16, #tpu.memory_space<vmem>>, %arg12: memref<32x1xi32, #tpu.memory_space<vmem>>, %arg13: memref<32x1xf32, #tpu.memory_space<vmem>>, %arg14: memref<32x4xbf16, #tpu.memory_space<vmem>>, %arg15: memref<1x4xf32, #tpu.memory_space<vmem>>, %arg16: memref<8x128xf32, #tpu.memory_space<vmem>>) attributes {dimension_semantics = [], scalar_prefetch = 0 : i64, scratch_operands = 0 : i64, tpu.core_type = #tpu.core_type<tc>} {
    %c0 = arith.constant 0 : index
    %c0_0 = arith.constant 0 : index
    %0 = vector.load %arg0[%c0, %c0_0] : memref<32x32xf32, #tpu.memory_space<vmem>>, vector<32x32xf32>
    %c0_1 = arith.constant 0 : index
    %c0_2 = arith.constant 0 : index
    %1 = vector.load %arg1[%c0_1, %c0_2] : memref<2x16xf32, #tpu.memory_space<vmem>>, vector<2x16xf32>
    %cst = arith.constant 5.000000e-01 : f32
    %2 = vector.broadcast %cst : f32 to vector<2x16xf32>
    %3 = arith.cmpf ogt, %1, %2 : vector<2x16xf32>
    %cst_3 = arith.constant 0.000000e+00 : f32
    %cst_4 = arith.constant -1.000000e+09 : f32
    %4 = vector.broadcast %cst_3 : f32 to vector<2x16xf32>
    %5 = vector.broadcast %cst_4 : f32 to vector<2x16xf32>
    %6 = arith.select %3, %4, %5 : vector<2x16xi1>, vector<2x16xf32>
    %7 = vector.shape_cast %6 : vector<2x16xf32> to vector<2x1x16xf32>
    %8 = arith.truncf %0 : vector<32x32xf32> to vector<32x32xbf16>
    %c0_5 = arith.constant 0 : index
    %c0_6 = arith.constant 0 : index
    %c0_7 = arith.constant 0 : index
    %9 = vector.load %arg2[%c0_5, %c0_6, %c0_7] : memref<2x32x96xbf16, #tpu.memory_space<vmem>>, vector<1x32x96xbf16>
    %10 = vector.shape_cast %9 : vector<1x32x96xbf16> to vector<32x96xbf16>
    %cst_8 = arith.constant dense<0.000000e+00> : vector<32x96xf32>
    %11 = tpu.matmul %8, %10, %cst_8 {dimension_numbers = #tpu.dot_dimension_numbers<[1], [0], [0], [1], [0, 0, 1, 1], [], []>} : vector<32x32xbf16>, vector<32x96xbf16>, vector<32x96xf32> -> vector<32x96xf32>
    %c0_9 = arith.constant 0 : index
    %c0_10 = arith.constant 0 : index
    %c0_11 = arith.constant 0 : index
    %12 = vector.load %arg3[%c0_9, %c0_10, %c0_11] : memref<2x1x96xf32, #tpu.memory_space<vmem>>, vector<1x1x96xf32>
    %13 = vector.shape_cast %12 : vector<1x1x96xf32> to vector<1x96xf32>
    %14 = vector.broadcast %13 : vector<1x96xf32> to vector<32x96xf32>
    %15 = arith.addf %11, %14 : vector<32x96xf32>
    %16 = vector.extract_strided_slice %15 {offsets = [0, 0], sizes = [32, 32], strides = [1, 1]} : vector<32x96xf32> to vector<32x32xf32>
    %17 = vector.shape_cast %16 : vector<32x32xf32> to vector<2x16x32xf32>
    %18 = arith.truncf %17 : vector<2x16x32xf32> to vector<2x16x32xbf16>
    %19 = vector.extract_strided_slice %15 {offsets = [0, 32], sizes = [32, 32], strides = [1, 1]} : vector<32x96xf32> to vector<32x32xf32>
    %20 = vector.shape_cast %19 : vector<32x32xf32> to vector<2x16x32xf32>
    %21 = arith.truncf %20 : vector<2x16x32xf32> to vector<2x16x32xbf16>
    %22 = vector.extract_strided_slice %15 {offsets = [0, 64], sizes = [32, 32], strides = [1, 1]} : vector<32x96xf32> to vector<32x32xf32>
    %23 = vector.shape_cast %22 : vector<32x32xf32> to vector<2x16x32xf32>
    %24 = arith.truncf %23 : vector<2x16x32xf32> to vector<2x16x32xbf16>
    %25 = vector.extract_strided_slice %18 {offsets = [0, 0, 0], sizes = [2, 16, 8], strides = [1, 1, 1]} : vector<2x16x32xbf16> to vector<2x16x8xbf16>
    %26 = vector.extract_strided_slice %21 {offsets = [0, 0, 0], sizes = [2, 16, 8], strides = [1, 1, 1]} : vector<2x16x32xbf16> to vector<2x16x8xbf16>
    %27 = vector.extract_strided_slice %24 {offsets = [0, 0, 0], sizes = [2, 16, 8], strides = [1, 1, 1]} : vector<2x16x32xbf16> to vector<2x16x8xbf16>
    "tpu.trace_start"() <{level = 10 : i32, message = "bqd,bkd->bqk"}> : () -> ()
    %cst_12 = arith.constant dense<0.000000e+00> : vector<2x16x16xf32>
    %28 = tpu.matmul %25, %26, %cst_12 {dimension_numbers = #tpu.dot_dimension_numbers<[2], [2], [1], [1], [0, 0, 0, 1, 1, 1], [0], [0]>} : vector<2x16x8xbf16>, vector<2x16x8xbf16>, vector<2x16x16xf32> -> vector<2x16x16xf32>
    "tpu.trace_stop"() : () -> ()
    %cst_13 = arith.constant 0.353553385 : f32
    %29 = vector.broadcast %cst_13 : f32 to vector<2x16x16xf32>
    %30 = arith.mulf %28, %29 : vector<2x16x16xf32>
    %31 = vector.broadcast %7 : vector<2x1x16xf32> to vector<2x16x16xf32>
    %32 = arith.addf %30, %31 : vector<2x16x16xf32>
    %cst_14 = arith.constant dense<0xFF800000> : vector<2x16xf32>
    %33 = vector.multi_reduction <maximumf>, %32, %cst_14 [2] : vector<2x16x16xf32> to vector<2x16xf32>
    %34 = vector.shape_cast %33 : vector<2x16xf32> to vector<2x16x1xf32>
    %35 = vector.broadcast %34 : vector<2x16x1xf32> to vector<2x16x16xf32>
    %36 = arith.subf %32, %35 : vector<2x16x16xf32>
    %37 = math.exp %36 : vector<2x16x16xf32>
    %cst_15 = arith.constant dense<0.000000e+00> : vector<2x16xf32>
    %38 = vector.multi_reduction <add>, %37, %cst_15 [2] : vector<2x16x16xf32> to vector<2x16xf32>
    %39 = vector.shape_cast %38 : vector<2x16xf32> to vector<2x16x1xf32>
    %40 = vector.broadcast %39 : vector<2x16x1xf32> to vector<2x16x16xf32>
    %41 = arith.divf %37, %40 : vector<2x16x16xf32>
    %42 = arith.truncf %41 : vector<2x16x16xf32> to vector<2x16x16xbf16>
    "tpu.trace_start"() <{level = 10 : i32, message = "bqk,bkd->bqd"}> : () -> ()
    %cst_16 = arith.constant dense<0.000000e+00> : vector<2x16x8xf32>
    %43 = tpu.matmul %42, %27, %cst_16 {dimension_numbers = #tpu.dot_dimension_numbers<[2], [1], [1], [2], [0, 0, 0, 1, 1, 2], [0], [0]>} : vector<2x16x16xbf16>, vector<2x16x8xbf16>, vector<2x16x8xf32> -> vector<2x16x8xf32>
    "tpu.trace_stop"() : () -> ()
    %44 = vector.extract_strided_slice %18 {offsets = [0, 0, 8], sizes = [2, 16, 8], strides = [1, 1, 1]} : vector<2x16x32xbf16> to vector<2x16x8xbf16>
    %45 = vector.extract_strided_slice %21 {offsets = [0, 0, 8], sizes = [2, 16, 8], strides = [1, 1, 1]} : vector<2x16x32xbf16> to vector<2x16x8xbf16>
    %46 = vector.extract_strided_slice %24 {offsets = [0, 0, 8], sizes = [2, 16, 8], strides = [1, 1, 1]} : vector<2x16x32xbf16> to vector<2x16x8xbf16>
    "tpu.trace_start"() <{level = 10 : i32, message = "bqd,bkd->bqk"}> : () -> ()
    %cst_17 = arith.constant dense<0.000000e+00> : vector<2x16x16xf32>
    %47 = tpu.matmul %44, %45, %cst_17 {dimension_numbers = #tpu.dot_dimension_numbers<[2], [2], [1], [1], [0, 0, 0, 1, 1, 1], [0], [0]>} : vector<2x16x8xbf16>, vector<2x16x8xbf16>, vector<2x16x16xf32> -> vector<2x16x16xf32>
    "tpu.trace_stop"() : () -> ()
    %cst_18 = arith.constant 0.353553385 : f32
    %48 = vector.broadcast %cst_18 : f32 to vector<2x16x16xf32>
    %49 = arith.mulf %47, %48 : vector<2x16x16xf32>
    %50 = vector.broadcast %7 : vector<2x1x16xf32> to vector<2x16x16xf32>
    %51 = arith.addf %49, %50 : vector<2x16x16xf32>
    %cst_19 = arith.constant dense<0xFF800000> : vector<2x16xf32>
    %52 = vector.multi_reduction <maximumf>, %51, %cst_19 [2] : vector<2x16x16xf32> to vector<2x16xf32>
    %53 = vector.shape_cast %52 : vector<2x16xf32> to vector<2x16x1xf32>
    %54 = vector.broadcast %53 : vector<2x16x1xf32> to vector<2x16x16xf32>
    %55 = arith.subf %51, %54 : vector<2x16x16xf32>
    %56 = math.exp %55 : vector<2x16x16xf32>
    %cst_20 = arith.constant dense<0.000000e+00> : vector<2x16xf32>
    %57 = vector.multi_reduction <add>, %56, %cst_20 [2] : vector<2x16x16xf32> to vector<2x16xf32>
    %58 = vector.shape_cast %57 : vector<2x16xf32> to vector<2x16x1xf32>
    %59 = vector.broadcast %58 : vector<2x16x1xf32> to vector<2x16x16xf32>
    %60 = arith.divf %56, %59 : vector<2x16x16xf32>
    %61 = arith.truncf %60 : vector<2x16x16xf32> to vector<2x16x16xbf16>
    "tpu.trace_start"() <{level = 10 : i32, message = "bqk,bkd->bqd"}> : () -> ()
    %cst_21 = arith.constant dense<0.000000e+00> : vector<2x16x8xf32>
    %62 = tpu.matmul %61, %46, %cst_21 {dimension_numbers = #tpu.dot_dimension_numbers<[2], [1], [1], [2], [0, 0, 0, 1, 1, 2], [0], [0]>} : vector<2x16x16xbf16>, vector<2x16x8xbf16>, vector<2x16x8xf32> -> vector<2x16x8xf32>
    "tpu.trace_stop"() : () -> ()
    %63 = vector.extract_strided_slice %18 {offsets = [0, 0, 16], sizes = [2, 16, 8], strides = [1, 1, 1]} : vector<2x16x32xbf16> to vector<2x16x8xbf16>
    %64 = vector.extract_strided_slice %21 {offsets = [0, 0, 16], sizes = [2, 16, 8], strides = [1, 1, 1]} : vector<2x16x32xbf16> to vector<2x16x8xbf16>
    %65 = vector.extract_strided_slice %24 {offsets = [0, 0, 16], sizes = [2, 16, 8], strides = [1, 1, 1]} : vector<2x16x32xbf16> to vector<2x16x8xbf16>
    "tpu.trace_start"() <{level = 10 : i32, message = "bqd,bkd->bqk"}> : () -> ()
    %cst_22 = arith.constant dense<0.000000e+00> : vector<2x16x16xf32>
    %66 = tpu.matmul %63, %64, %cst_22 {dimension_numbers = #tpu.dot_dimension_numbers<[2], [2], [1], [1], [0, 0, 0, 1, 1, 1], [0], [0]>} : vector<2x16x8xbf16>, vector<2x16x8xbf16>, vector<2x16x16xf32> -> vector<2x16x16xf32>
    "tpu.trace_stop"() : () -> ()
    %cst_23 = arith.constant 0.353553385 : f32
    %67 = vector.broadcast %cst_23 : f32 to vector<2x16x16xf32>
    %68 = arith.mulf %66, %67 : vector<2x16x16xf32>
    %69 = vector.broadcast %7 : vector<2x1x16xf32> to vector<2x16x16xf32>
    %70 = arith.addf %68, %69 : vector<2x16x16xf32>
    %cst_24 = arith.constant dense<0xFF800000> : vector<2x16xf32>
    %71 = vector.multi_reduction <maximumf>, %70, %cst_24 [2] : vector<2x16x16xf32> to vector<2x16xf32>
    %72 = vector.shape_cast %71 : vector<2x16xf32> to vector<2x16x1xf32>
    %73 = vector.broadcast %72 : vector<2x16x1xf32> to vector<2x16x16xf32>
    %74 = arith.subf %70, %73 : vector<2x16x16xf32>
    %75 = math.exp %74 : vector<2x16x16xf32>
    %cst_25 = arith.constant dense<0.000000e+00> : vector<2x16xf32>
    %76 = vector.multi_reduction <add>, %75, %cst_25 [2] : vector<2x16x16xf32> to vector<2x16xf32>
    %77 = vector.shape_cast %76 : vector<2x16xf32> to vector<2x16x1xf32>
    %78 = vector.broadcast %77 : vector<2x16x1xf32> to vector<2x16x16xf32>
    %79 = arith.divf %75, %78 : vector<2x16x16xf32>
    %80 = arith.truncf %79 : vector<2x16x16xf32> to vector<2x16x16xbf16>
    "tpu.trace_start"() <{level = 10 : i32, message = "bqk,bkd->bqd"}> : () -> ()
    %cst_26 = arith.constant dense<0.000000e+00> : vector<2x16x8xf32>
    %81 = tpu.matmul %80, %65, %cst_26 {dimension_numbers = #tpu.dot_dimension_numbers<[2], [1], [1], [2], [0, 0, 0, 1, 1, 2], [0], [0]>} : vector<2x16x16xbf16>, vector<2x16x8xbf16>, vector<2x16x8xf32> -> vector<2x16x8xf32>
    "tpu.trace_stop"() : () -> ()
    %82 = vector.extract_strided_slice %18 {offsets = [0, 0, 24], sizes = [2, 16, 8], strides = [1, 1, 1]} : vector<2x16x32xbf16> to vector<2x16x8xbf16>
    %83 = vector.extract_strided_slice %21 {offsets = [0, 0, 24], sizes = [2, 16, 8], strides = [1, 1, 1]} : vector<2x16x32xbf16> to vector<2x16x8xbf16>
    %84 = vector.extract_strided_slice %24 {offsets = [0, 0, 24], sizes = [2, 16, 8], strides = [1, 1, 1]} : vector<2x16x32xbf16> to vector<2x16x8xbf16>
    "tpu.trace_start"() <{level = 10 : i32, message = "bqd,bkd->bqk"}> : () -> ()
    %cst_27 = arith.constant dense<0.000000e+00> : vector<2x16x16xf32>
    %85 = tpu.matmul %82, %83, %cst_27 {dimension_numbers = #tpu.dot_dimension_numbers<[2], [2], [1], [1], [0, 0, 0, 1, 1, 1], [0], [0]>} : vector<2x16x8xbf16>, vector<2x16x8xbf16>, vector<2x16x16xf32> -> vector<2x16x16xf32>
    "tpu.trace_stop"() : () -> ()
    %cst_28 = arith.constant 0.353553385 : f32
    %86 = vector.broadcast %cst_28 : f32 to vector<2x16x16xf32>
    %87 = arith.mulf %85, %86 : vector<2x16x16xf32>
    %88 = vector.broadcast %7 : vector<2x1x16xf32> to vector<2x16x16xf32>
    %89 = arith.addf %87, %88 : vector<2x16x16xf32>
    %cst_29 = arith.constant dense<0xFF800000> : vector<2x16xf32>
    %90 = vector.multi_reduction <maximumf>, %89, %cst_29 [2] : vector<2x16x16xf32> to vector<2x16xf32>
    %91 = vector.shape_cast %90 : vector<2x16xf32> to vector<2x16x1xf32>
    %92 = vector.broadcast %91 : vector<2x16x1xf32> to vector<2x16x16xf32>
    %93 = arith.subf %89, %92 : vector<2x16x16xf32>
    %94 = math.exp %93 : vector<2x16x16xf32>
    %cst_30 = arith.constant dense<0.000000e+00> : vector<2x16xf32>
    %95 = vector.multi_reduction <add>, %94, %cst_30 [2] : vector<2x16x16xf32> to vector<2x16xf32>
    %96 = vector.shape_cast %95 : vector<2x16xf32> to vector<2x16x1xf32>
    %97 = vector.broadcast %96 : vector<2x16x1xf32> to vector<2x16x16xf32>
    %98 = arith.divf %94, %97 : vector<2x16x16xf32>
    %99 = arith.truncf %98 : vector<2x16x16xf32> to vector<2x16x16xbf16>
    "tpu.trace_start"() <{level = 10 : i32, message = "bqk,bkd->bqd"}> : () -> ()
    %cst_31 = arith.constant dense<0.000000e+00> : vector<2x16x8xf32>
    %100 = tpu.matmul %99, %84, %cst_31 {dimension_numbers = #tpu.dot_dimension_numbers<[2], [1], [1], [2], [0, 0, 0, 1, 1, 2], [0], [0]>} : vector<2x16x16xbf16>, vector<2x16x8xbf16>, vector<2x16x8xf32> -> vector<2x16x8xf32>
    "tpu.trace_stop"() : () -> ()
    %101 = tpu.concatenate %43, %62, %81, %100 in 2 : vector<2x16x8xf32>, vector<2x16x8xf32>, vector<2x16x8xf32>, vector<2x16x8xf32> -> vector<2x16x32xf32>
    %102 = vector.shape_cast %101 : vector<2x16x32xf32> to vector<32x32xf32>
    %103 = arith.truncf %102 : vector<32x32xf32> to vector<32x32xbf16>
    %c0_32 = arith.constant 0 : index
    %c0_33 = arith.constant 0 : index
    %c0_34 = arith.constant 0 : index
    %104 = vector.load %arg4[%c0_32, %c0_33, %c0_34] : memref<2x32x32xbf16, #tpu.memory_space<vmem>>, vector<1x32x32xbf16>
    %105 = vector.shape_cast %104 : vector<1x32x32xbf16> to vector<32x32xbf16>
    %cst_35 = arith.constant dense<0.000000e+00> : vector<32x32xf32>
    %106 = tpu.matmul %103, %105, %cst_35 {dimension_numbers = #tpu.dot_dimension_numbers<[1], [0], [0], [1], [0, 0, 1, 1], [], []>} : vector<32x32xbf16>, vector<32x32xbf16>, vector<32x32xf32> -> vector<32x32xf32>
    %c0_36 = arith.constant 0 : index
    %c0_37 = arith.constant 0 : index
    %c0_38 = arith.constant 0 : index
    %107 = vector.load %arg5[%c0_36, %c0_37, %c0_38] : memref<2x1x32xf32, #tpu.memory_space<vmem>>, vector<1x1x32xf32>
    %108 = vector.shape_cast %107 : vector<1x1x32xf32> to vector<1x32xf32>
    %109 = vector.broadcast %108 : vector<1x32xf32> to vector<32x32xf32>
    %110 = arith.addf %106, %109 : vector<32x32xf32>
    %111 = arith.addf %0, %110 : vector<32x32xf32>
    %c0_39 = arith.constant 0 : index
    %c0_40 = arith.constant 0 : index
    %c0_41 = arith.constant 0 : index
    %c0_42 = arith.constant 0 : index
    %112 = vector.load %arg6[%c0_39, %c0_40, %c0_41, %c0_42] : memref<2x4x1x32xf32, #tpu.memory_space<vmem>>, vector<1x1x1x32xf32>
    %113 = vector.shape_cast %112 : vector<1x1x1x32xf32> to vector<1x32xf32>
    %c0_43 = arith.constant 0 : index
    %c1 = arith.constant 1 : index
    %c0_44 = arith.constant 0 : index
    %c0_45 = arith.constant 0 : index
    %114 = vector.load %arg6[%c0_43, %c1, %c0_44, %c0_45] : memref<2x4x1x32xf32, #tpu.memory_space<vmem>>, vector<1x1x1x32xf32>
    %115 = vector.shape_cast %114 : vector<1x1x1x32xf32> to vector<1x32xf32>
    %cst_46 = arith.constant dense<0.000000e+00> : vector<32xf32>
    %116 = vector.multi_reduction <add>, %111, %cst_46 [1] : vector<32x32xf32> to vector<32xf32>
    %117 = vector.shape_cast %116 : vector<32xf32> to vector<32x1xf32>
    %cst_47 = arith.constant 3.200000e+01 : f32
    %118 = vector.broadcast %cst_47 : f32 to vector<32x1xf32>
    %119 = arith.divf %117, %118 : vector<32x1xf32>
    %120 = arith.mulf %111, %111 : vector<32x32xf32>
    %cst_48 = arith.constant dense<0.000000e+00> : vector<32xf32>
    %121 = vector.multi_reduction <add>, %120, %cst_48 [1] : vector<32x32xf32> to vector<32xf32>
    %122 = vector.shape_cast %121 : vector<32xf32> to vector<32x1xf32>
    %cst_49 = arith.constant 3.200000e+01 : f32
    %123 = vector.broadcast %cst_49 : f32 to vector<32x1xf32>
    %124 = arith.divf %122, %123 : vector<32x1xf32>
    %125 = arith.mulf %119, %119 : vector<32x1xf32>
    %126 = arith.subf %124, %125 : vector<32x1xf32>
    %127 = vector.broadcast %119 : vector<32x1xf32> to vector<32x32xf32>
    %128 = arith.subf %111, %127 : vector<32x32xf32>
    %cst_50 = arith.constant 9.99999974E-6 : f32
    %129 = vector.broadcast %cst_50 : f32 to vector<32x1xf32>
    %130 = arith.addf %126, %129 : vector<32x1xf32>
    %131 = math.rsqrt %130 : vector<32x1xf32>
    %132 = vector.broadcast %131 : vector<32x1xf32> to vector<32x32xf32>
    %133 = arith.mulf %128, %132 : vector<32x32xf32>
    %134 = vector.broadcast %113 : vector<1x32xf32> to vector<32x32xf32>
    %135 = arith.mulf %133, %134 : vector<32x32xf32>
    %136 = vector.broadcast %115 : vector<1x32xf32> to vector<32x32xf32>
    %137 = arith.addf %135, %136 : vector<32x32xf32>
    %138 = arith.truncf %137 : vector<32x32xf32> to vector<32x32xbf16>
    %c0_51 = arith.constant 0 : index
    %c0_52 = arith.constant 0 : index
    %c0_53 = arith.constant 0 : index
    %139 = vector.load %arg7[%c0_51, %c0_52, %c0_53] : memref<2x32x128xbf16, #tpu.memory_space<vmem>>, vector<1x32x128xbf16>
    %140 = vector.shape_cast %139 : vector<1x32x128xbf16> to vector<32x128xbf16>
    %cst_54 = arith.constant dense<0.000000e+00> : vector<32x128xf32>
    %141 = tpu.matmul %138, %140, %cst_54 {dimension_numbers = #tpu.dot_dimension_numbers<[1], [0], [0], [1], [0, 0, 1, 1], [], []>} : vector<32x32xbf16>, vector<32x128xbf16>, vector<32x128xf32> -> vector<32x128xf32>
    %c0_55 = arith.constant 0 : index
    %c0_56 = arith.constant 0 : index
    %c0_57 = arith.constant 0 : index
    %142 = vector.load %arg8[%c0_55, %c0_56, %c0_57] : memref<2x1x128xf32, #tpu.memory_space<vmem>>, vector<1x1x128xf32>
    %143 = vector.shape_cast %142 : vector<1x1x128xf32> to vector<1x128xf32>
    %144 = vector.broadcast %143 : vector<1x128xf32> to vector<32x128xf32>
    %145 = arith.addf %141, %144 : vector<32x128xf32>
    %146 = arith.mulf %145, %145 : vector<32x128xf32>
    %147 = arith.mulf %145, %146 : vector<32x128xf32>
    %cst_58 = arith.constant 4.471500e-02 : f32
    %148 = vector.broadcast %cst_58 : f32 to vector<32x128xf32>
    %149 = arith.mulf %148, %147 : vector<32x128xf32>
    %150 = arith.addf %145, %149 : vector<32x128xf32>
    %cst_59 = arith.constant 0.797884583 : f32
    %151 = vector.broadcast %cst_59 : f32 to vector<32x128xf32>
    %152 = arith.mulf %151, %150 : vector<32x128xf32>
    %153 = math.tanh %152 : vector<32x128xf32>
    %cst_60 = arith.constant 1.000000e+00 : f32
    %154 = vector.broadcast %cst_60 : f32 to vector<32x128xf32>
    %155 = arith.addf %154, %153 : vector<32x128xf32>
    %cst_61 = arith.constant 5.000000e-01 : f32
    %156 = vector.broadcast %cst_61 : f32 to vector<32x128xf32>
    %157 = arith.mulf %156, %155 : vector<32x128xf32>
    %158 = arith.mulf %145, %157 : vector<32x128xf32>
    %159 = arith.truncf %158 : vector<32x128xf32> to vector<32x128xbf16>
    %c0_62 = arith.constant 0 : index
    %c0_63 = arith.constant 0 : index
    %c0_64 = arith.constant 0 : index
    %160 = vector.load %arg9[%c0_62, %c0_63, %c0_64] : memref<2x128x32xbf16, #tpu.memory_space<vmem>>, vector<1x128x32xbf16>
    %161 = vector.shape_cast %160 : vector<1x128x32xbf16> to vector<128x32xbf16>
    %cst_65 = arith.constant dense<0.000000e+00> : vector<32x32xf32>
    %162 = tpu.matmul %159, %161, %cst_65 {dimension_numbers = #tpu.dot_dimension_numbers<[1], [0], [0], [1], [0, 0, 1, 1], [], []>} : vector<32x128xbf16>, vector<128x32xbf16>, vector<32x32xf32> -> vector<32x32xf32>
    %c0_66 = arith.constant 0 : index
    %c0_67 = arith.constant 0 : index
    %c0_68 = arith.constant 0 : index
    %163 = vector.load %arg10[%c0_66, %c0_67, %c0_68] : memref<2x1x32xf32, #tpu.memory_space<vmem>>, vector<1x1x32xf32>
    %164 = vector.shape_cast %163 : vector<1x1x32xf32> to vector<1x32xf32>
    %165 = vector.broadcast %164 : vector<1x32xf32> to vector<32x32xf32>
    %166 = arith.addf %162, %165 : vector<32x32xf32>
    %167 = arith.addf %137, %166 : vector<32x32xf32>
    %c0_69 = arith.constant 0 : index
    %c2 = arith.constant 2 : index
    %c0_70 = arith.constant 0 : index
    %c0_71 = arith.constant 0 : index
    %168 = vector.load %arg6[%c0_69, %c2, %c0_70, %c0_71] : memref<2x4x1x32xf32, #tpu.memory_space<vmem>>, vector<1x1x1x32xf32>
    %169 = vector.shape_cast %168 : vector<1x1x1x32xf32> to vector<1x32xf32>
    %c0_72 = arith.constant 0 : index
    %c3 = arith.constant 3 : index
    %c0_73 = arith.constant 0 : index
    %c0_74 = arith.constant 0 : index
    %170 = vector.load %arg6[%c0_72, %c3, %c0_73, %c0_74] : memref<2x4x1x32xf32, #tpu.memory_space<vmem>>, vector<1x1x1x32xf32>
    %171 = vector.shape_cast %170 : vector<1x1x1x32xf32> to vector<1x32xf32>
    %cst_75 = arith.constant dense<0.000000e+00> : vector<32xf32>
    %172 = vector.multi_reduction <add>, %167, %cst_75 [1] : vector<32x32xf32> to vector<32xf32>
    %173 = vector.shape_cast %172 : vector<32xf32> to vector<32x1xf32>
    %cst_76 = arith.constant 3.200000e+01 : f32
    %174 = vector.broadcast %cst_76 : f32 to vector<32x1xf32>
    %175 = arith.divf %173, %174 : vector<32x1xf32>
    %176 = arith.mulf %167, %167 : vector<32x32xf32>
    %cst_77 = arith.constant dense<0.000000e+00> : vector<32xf32>
    %177 = vector.multi_reduction <add>, %176, %cst_77 [1] : vector<32x32xf32> to vector<32xf32>
    %178 = vector.shape_cast %177 : vector<32xf32> to vector<32x1xf32>
    %cst_78 = arith.constant 3.200000e+01 : f32
    %179 = vector.broadcast %cst_78 : f32 to vector<32x1xf32>
    %180 = arith.divf %178, %179 : vector<32x1xf32>
    %181 = arith.mulf %175, %175 : vector<32x1xf32>
    %182 = arith.subf %180, %181 : vector<32x1xf32>
    %183 = vector.broadcast %175 : vector<32x1xf32> to vector<32x32xf32>
    %184 = arith.subf %167, %183 : vector<32x32xf32>
    %cst_79 = arith.constant 9.99999974E-6 : f32
    %185 = vector.broadcast %cst_79 : f32 to vector<32x1xf32>
    %186 = arith.addf %182, %185 : vector<32x1xf32>
    %187 = math.rsqrt %186 : vector<32x1xf32>
    %188 = vector.broadcast %187 : vector<32x1xf32> to vector<32x32xf32>
    %189 = arith.mulf %184, %188 : vector<32x32xf32>
    %190 = vector.broadcast %169 : vector<1x32xf32> to vector<32x32xf32>
    %191 = arith.mulf %189, %190 : vector<32x32xf32>
    %192 = vector.broadcast %171 : vector<1x32xf32> to vector<32x32xf32>
    %193 = arith.addf %191, %192 : vector<32x32xf32>
    %194 = arith.truncf %193 : vector<32x32xf32> to vector<32x32xbf16>
    %c1_80 = arith.constant 1 : index
    %c0_81 = arith.constant 0 : index
    %c0_82 = arith.constant 0 : index
    %195 = vector.load %arg2[%c1_80, %c0_81, %c0_82] : memref<2x32x96xbf16, #tpu.memory_space<vmem>>, vector<1x32x96xbf16>
    %196 = vector.shape_cast %195 : vector<1x32x96xbf16> to vector<32x96xbf16>
    %cst_83 = arith.constant dense<0.000000e+00> : vector<32x96xf32>
    %197 = tpu.matmul %194, %196, %cst_83 {dimension_numbers = #tpu.dot_dimension_numbers<[1], [0], [0], [1], [0, 0, 1, 1], [], []>} : vector<32x32xbf16>, vector<32x96xbf16>, vector<32x96xf32> -> vector<32x96xf32>
    %c1_84 = arith.constant 1 : index
    %c0_85 = arith.constant 0 : index
    %c0_86 = arith.constant 0 : index
    %198 = vector.load %arg3[%c1_84, %c0_85, %c0_86] : memref<2x1x96xf32, #tpu.memory_space<vmem>>, vector<1x1x96xf32>
    %199 = vector.shape_cast %198 : vector<1x1x96xf32> to vector<1x96xf32>
    %200 = vector.broadcast %199 : vector<1x96xf32> to vector<32x96xf32>
    %201 = arith.addf %197, %200 : vector<32x96xf32>
    %202 = vector.extract_strided_slice %201 {offsets = [0, 0], sizes = [32, 32], strides = [1, 1]} : vector<32x96xf32> to vector<32x32xf32>
    %203 = vector.shape_cast %202 : vector<32x32xf32> to vector<2x16x32xf32>
    %204 = arith.truncf %203 : vector<2x16x32xf32> to vector<2x16x32xbf16>
    %205 = vector.extract_strided_slice %201 {offsets = [0, 32], sizes = [32, 32], strides = [1, 1]} : vector<32x96xf32> to vector<32x32xf32>
    %206 = vector.shape_cast %205 : vector<32x32xf32> to vector<2x16x32xf32>
    %207 = arith.truncf %206 : vector<2x16x32xf32> to vector<2x16x32xbf16>
    %208 = vector.extract_strided_slice %201 {offsets = [0, 64], sizes = [32, 32], strides = [1, 1]} : vector<32x96xf32> to vector<32x32xf32>
    %209 = vector.shape_cast %208 : vector<32x32xf32> to vector<2x16x32xf32>
    %210 = arith.truncf %209 : vector<2x16x32xf32> to vector<2x16x32xbf16>
    %211 = vector.extract_strided_slice %204 {offsets = [0, 0, 0], sizes = [2, 16, 8], strides = [1, 1, 1]} : vector<2x16x32xbf16> to vector<2x16x8xbf16>
    %212 = vector.extract_strided_slice %207 {offsets = [0, 0, 0], sizes = [2, 16, 8], strides = [1, 1, 1]} : vector<2x16x32xbf16> to vector<2x16x8xbf16>
    %213 = vector.extract_strided_slice %210 {offsets = [0, 0, 0], sizes = [2, 16, 8], strides = [1, 1, 1]} : vector<2x16x32xbf16> to vector<2x16x8xbf16>
    "tpu.trace_start"() <{level = 10 : i32, message = "bqd,bkd->bqk"}> : () -> ()
    %cst_87 = arith.constant dense<0.000000e+00> : vector<2x16x16xf32>
    %214 = tpu.matmul %211, %212, %cst_87 {dimension_numbers = #tpu.dot_dimension_numbers<[2], [2], [1], [1], [0, 0, 0, 1, 1, 1], [0], [0]>} : vector<2x16x8xbf16>, vector<2x16x8xbf16>, vector<2x16x16xf32> -> vector<2x16x16xf32>
    "tpu.trace_stop"() : () -> ()
    %cst_88 = arith.constant 0.353553385 : f32
    %215 = vector.broadcast %cst_88 : f32 to vector<2x16x16xf32>
    %216 = arith.mulf %214, %215 : vector<2x16x16xf32>
    %217 = vector.broadcast %7 : vector<2x1x16xf32> to vector<2x16x16xf32>
    %218 = arith.addf %216, %217 : vector<2x16x16xf32>
    %cst_89 = arith.constant dense<0xFF800000> : vector<2x16xf32>
    %219 = vector.multi_reduction <maximumf>, %218, %cst_89 [2] : vector<2x16x16xf32> to vector<2x16xf32>
    %220 = vector.shape_cast %219 : vector<2x16xf32> to vector<2x16x1xf32>
    %221 = vector.broadcast %220 : vector<2x16x1xf32> to vector<2x16x16xf32>
    %222 = arith.subf %218, %221 : vector<2x16x16xf32>
    %223 = math.exp %222 : vector<2x16x16xf32>
    %cst_90 = arith.constant dense<0.000000e+00> : vector<2x16xf32>
    %224 = vector.multi_reduction <add>, %223, %cst_90 [2] : vector<2x16x16xf32> to vector<2x16xf32>
    %225 = vector.shape_cast %224 : vector<2x16xf32> to vector<2x16x1xf32>
    %226 = vector.broadcast %225 : vector<2x16x1xf32> to vector<2x16x16xf32>
    %227 = arith.divf %223, %226 : vector<2x16x16xf32>
    %228 = arith.truncf %227 : vector<2x16x16xf32> to vector<2x16x16xbf16>
    "tpu.trace_start"() <{level = 10 : i32, message = "bqk,bkd->bqd"}> : () -> ()
    %cst_91 = arith.constant dense<0.000000e+00> : vector<2x16x8xf32>
    %229 = tpu.matmul %228, %213, %cst_91 {dimension_numbers = #tpu.dot_dimension_numbers<[2], [1], [1], [2], [0, 0, 0, 1, 1, 2], [0], [0]>} : vector<2x16x16xbf16>, vector<2x16x8xbf16>, vector<2x16x8xf32> -> vector<2x16x8xf32>
    "tpu.trace_stop"() : () -> ()
    %230 = vector.extract_strided_slice %204 {offsets = [0, 0, 8], sizes = [2, 16, 8], strides = [1, 1, 1]} : vector<2x16x32xbf16> to vector<2x16x8xbf16>
    %231 = vector.extract_strided_slice %207 {offsets = [0, 0, 8], sizes = [2, 16, 8], strides = [1, 1, 1]} : vector<2x16x32xbf16> to vector<2x16x8xbf16>
    %232 = vector.extract_strided_slice %210 {offsets = [0, 0, 8], sizes = [2, 16, 8], strides = [1, 1, 1]} : vector<2x16x32xbf16> to vector<2x16x8xbf16>
    "tpu.trace_start"() <{level = 10 : i32, message = "bqd,bkd->bqk"}> : () -> ()
    %cst_92 = arith.constant dense<0.000000e+00> : vector<2x16x16xf32>
    %233 = tpu.matmul %230, %231, %cst_92 {dimension_numbers = #tpu.dot_dimension_numbers<[2], [2], [1], [1], [0, 0, 0, 1, 1, 1], [0], [0]>} : vector<2x16x8xbf16>, vector<2x16x8xbf16>, vector<2x16x16xf32> -> vector<2x16x16xf32>
    "tpu.trace_stop"() : () -> ()
    %cst_93 = arith.constant 0.353553385 : f32
    %234 = vector.broadcast %cst_93 : f32 to vector<2x16x16xf32>
    %235 = arith.mulf %233, %234 : vector<2x16x16xf32>
    %236 = vector.broadcast %7 : vector<2x1x16xf32> to vector<2x16x16xf32>
    %237 = arith.addf %235, %236 : vector<2x16x16xf32>
    %cst_94 = arith.constant dense<0xFF800000> : vector<2x16xf32>
    %238 = vector.multi_reduction <maximumf>, %237, %cst_94 [2] : vector<2x16x16xf32> to vector<2x16xf32>
    %239 = vector.shape_cast %238 : vector<2x16xf32> to vector<2x16x1xf32>
    %240 = vector.broadcast %239 : vector<2x16x1xf32> to vector<2x16x16xf32>
    %241 = arith.subf %237, %240 : vector<2x16x16xf32>
    %242 = math.exp %241 : vector<2x16x16xf32>
    %cst_95 = arith.constant dense<0.000000e+00> : vector<2x16xf32>
    %243 = vector.multi_reduction <add>, %242, %cst_95 [2] : vector<2x16x16xf32> to vector<2x16xf32>
    %244 = vector.shape_cast %243 : vector<2x16xf32> to vector<2x16x1xf32>
    %245 = vector.broadcast %244 : vector<2x16x1xf32> to vector<2x16x16xf32>
    %246 = arith.divf %242, %245 : vector<2x16x16xf32>
    %247 = arith.truncf %246 : vector<2x16x16xf32> to vector<2x16x16xbf16>
    "tpu.trace_start"() <{level = 10 : i32, message = "bqk,bkd->bqd"}> : () -> ()
    %cst_96 = arith.constant dense<0.000000e+00> : vector<2x16x8xf32>
    %248 = tpu.matmul %247, %232, %cst_96 {dimension_numbers = #tpu.dot_dimension_numbers<[2], [1], [1], [2], [0, 0, 0, 1, 1, 2], [0], [0]>} : vector<2x16x16xbf16>, vector<2x16x8xbf16>, vector<2x16x8xf32> -> vector<2x16x8xf32>
    "tpu.trace_stop"() : () -> ()
    %249 = vector.extract_strided_slice %204 {offsets = [0, 0, 16], sizes = [2, 16, 8], strides = [1, 1, 1]} : vector<2x16x32xbf16> to vector<2x16x8xbf16>
    %250 = vector.extract_strided_slice %207 {offsets = [0, 0, 16], sizes = [2, 16, 8], strides = [1, 1, 1]} : vector<2x16x32xbf16> to vector<2x16x8xbf16>
    %251 = vector.extract_strided_slice %210 {offsets = [0, 0, 16], sizes = [2, 16, 8], strides = [1, 1, 1]} : vector<2x16x32xbf16> to vector<2x16x8xbf16>
    "tpu.trace_start"() <{level = 10 : i32, message = "bqd,bkd->bqk"}> : () -> ()
    %cst_97 = arith.constant dense<0.000000e+00> : vector<2x16x16xf32>
    %252 = tpu.matmul %249, %250, %cst_97 {dimension_numbers = #tpu.dot_dimension_numbers<[2], [2], [1], [1], [0, 0, 0, 1, 1, 1], [0], [0]>} : vector<2x16x8xbf16>, vector<2x16x8xbf16>, vector<2x16x16xf32> -> vector<2x16x16xf32>
    "tpu.trace_stop"() : () -> ()
    %cst_98 = arith.constant 0.353553385 : f32
    %253 = vector.broadcast %cst_98 : f32 to vector<2x16x16xf32>
    %254 = arith.mulf %252, %253 : vector<2x16x16xf32>
    %255 = vector.broadcast %7 : vector<2x1x16xf32> to vector<2x16x16xf32>
    %256 = arith.addf %254, %255 : vector<2x16x16xf32>
    %cst_99 = arith.constant dense<0xFF800000> : vector<2x16xf32>
    %257 = vector.multi_reduction <maximumf>, %256, %cst_99 [2] : vector<2x16x16xf32> to vector<2x16xf32>
    %258 = vector.shape_cast %257 : vector<2x16xf32> to vector<2x16x1xf32>
    %259 = vector.broadcast %258 : vector<2x16x1xf32> to vector<2x16x16xf32>
    %260 = arith.subf %256, %259 : vector<2x16x16xf32>
    %261 = math.exp %260 : vector<2x16x16xf32>
    %cst_100 = arith.constant dense<0.000000e+00> : vector<2x16xf32>
    %262 = vector.multi_reduction <add>, %261, %cst_100 [2] : vector<2x16x16xf32> to vector<2x16xf32>
    %263 = vector.shape_cast %262 : vector<2x16xf32> to vector<2x16x1xf32>
    %264 = vector.broadcast %263 : vector<2x16x1xf32> to vector<2x16x16xf32>
    %265 = arith.divf %261, %264 : vector<2x16x16xf32>
    %266 = arith.truncf %265 : vector<2x16x16xf32> to vector<2x16x16xbf16>
    "tpu.trace_start"() <{level = 10 : i32, message = "bqk,bkd->bqd"}> : () -> ()
    %cst_101 = arith.constant dense<0.000000e+00> : vector<2x16x8xf32>
    %267 = tpu.matmul %266, %251, %cst_101 {dimension_numbers = #tpu.dot_dimension_numbers<[2], [1], [1], [2], [0, 0, 0, 1, 1, 2], [0], [0]>} : vector<2x16x16xbf16>, vector<2x16x8xbf16>, vector<2x16x8xf32> -> vector<2x16x8xf32>
    "tpu.trace_stop"() : () -> ()
    %268 = vector.extract_strided_slice %204 {offsets = [0, 0, 24], sizes = [2, 16, 8], strides = [1, 1, 1]} : vector<2x16x32xbf16> to vector<2x16x8xbf16>
    %269 = vector.extract_strided_slice %207 {offsets = [0, 0, 24], sizes = [2, 16, 8], strides = [1, 1, 1]} : vector<2x16x32xbf16> to vector<2x16x8xbf16>
    %270 = vector.extract_strided_slice %210 {offsets = [0, 0, 24], sizes = [2, 16, 8], strides = [1, 1, 1]} : vector<2x16x32xbf16> to vector<2x16x8xbf16>
    "tpu.trace_start"() <{level = 10 : i32, message = "bqd,bkd->bqk"}> : () -> ()
    %cst_102 = arith.constant dense<0.000000e+00> : vector<2x16x16xf32>
    %271 = tpu.matmul %268, %269, %cst_102 {dimension_numbers = #tpu.dot_dimension_numbers<[2], [2], [1], [1], [0, 0, 0, 1, 1, 1], [0], [0]>} : vector<2x16x8xbf16>, vector<2x16x8xbf16>, vector<2x16x16xf32> -> vector<2x16x16xf32>
    "tpu.trace_stop"() : () -> ()
    %cst_103 = arith.constant 0.353553385 : f32
    %272 = vector.broadcast %cst_103 : f32 to vector<2x16x16xf32>
    %273 = arith.mulf %271, %272 : vector<2x16x16xf32>
    %274 = vector.broadcast %7 : vector<2x1x16xf32> to vector<2x16x16xf32>
    %275 = arith.addf %273, %274 : vector<2x16x16xf32>
    %cst_104 = arith.constant dense<0xFF800000> : vector<2x16xf32>
    %276 = vector.multi_reduction <maximumf>, %275, %cst_104 [2] : vector<2x16x16xf32> to vector<2x16xf32>
    %277 = vector.shape_cast %276 : vector<2x16xf32> to vector<2x16x1xf32>
    %278 = vector.broadcast %277 : vector<2x16x1xf32> to vector<2x16x16xf32>
    %279 = arith.subf %275, %278 : vector<2x16x16xf32>
    %280 = math.exp %279 : vector<2x16x16xf32>
    %cst_105 = arith.constant dense<0.000000e+00> : vector<2x16xf32>
    %281 = vector.multi_reduction <add>, %280, %cst_105 [2] : vector<2x16x16xf32> to vector<2x16xf32>
    %282 = vector.shape_cast %281 : vector<2x16xf32> to vector<2x16x1xf32>
    %283 = vector.broadcast %282 : vector<2x16x1xf32> to vector<2x16x16xf32>
    %284 = arith.divf %280, %283 : vector<2x16x16xf32>
    %285 = arith.truncf %284 : vector<2x16x16xf32> to vector<2x16x16xbf16>
    "tpu.trace_start"() <{level = 10 : i32, message = "bqk,bkd->bqd"}> : () -> ()
    %cst_106 = arith.constant dense<0.000000e+00> : vector<2x16x8xf32>
    %286 = tpu.matmul %285, %270, %cst_106 {dimension_numbers = #tpu.dot_dimension_numbers<[2], [1], [1], [2], [0, 0, 0, 1, 1, 2], [0], [0]>} : vector<2x16x16xbf16>, vector<2x16x8xbf16>, vector<2x16x8xf32> -> vector<2x16x8xf32>
    "tpu.trace_stop"() : () -> ()
    %287 = tpu.concatenate %229, %248, %267, %286 in 2 : vector<2x16x8xf32>, vector<2x16x8xf32>, vector<2x16x8xf32>, vector<2x16x8xf32> -> vector<2x16x32xf32>
    %288 = vector.shape_cast %287 : vector<2x16x32xf32> to vector<32x32xf32>
    %289 = arith.truncf %288 : vector<32x32xf32> to vector<32x32xbf16>
    %c1_107 = arith.constant 1 : index
    %c0_108 = arith.constant 0 : index
    %c0_109 = arith.constant 0 : index
    %290 = vector.load %arg4[%c1_107, %c0_108, %c0_109] : memref<2x32x32xbf16, #tpu.memory_space<vmem>>, vector<1x32x32xbf16>
    %291 = vector.shape_cast %290 : vector<1x32x32xbf16> to vector<32x32xbf16>
    %cst_110 = arith.constant dense<0.000000e+00> : vector<32x32xf32>
    %292 = tpu.matmul %289, %291, %cst_110 {dimension_numbers = #tpu.dot_dimension_numbers<[1], [0], [0], [1], [0, 0, 1, 1], [], []>} : vector<32x32xbf16>, vector<32x32xbf16>, vector<32x32xf32> -> vector<32x32xf32>
    %c1_111 = arith.constant 1 : index
    %c0_112 = arith.constant 0 : index
    %c0_113 = arith.constant 0 : index
    %293 = vector.load %arg5[%c1_111, %c0_112, %c0_113] : memref<2x1x32xf32, #tpu.memory_space<vmem>>, vector<1x1x32xf32>
    %294 = vector.shape_cast %293 : vector<1x1x32xf32> to vector<1x32xf32>
    %295 = vector.broadcast %294 : vector<1x32xf32> to vector<32x32xf32>
    %296 = arith.addf %292, %295 : vector<32x32xf32>
    %297 = arith.addf %193, %296 : vector<32x32xf32>
    %c1_114 = arith.constant 1 : index
    %c0_115 = arith.constant 0 : index
    %c0_116 = arith.constant 0 : index
    %c0_117 = arith.constant 0 : index
    %298 = vector.load %arg6[%c1_114, %c0_115, %c0_116, %c0_117] : memref<2x4x1x32xf32, #tpu.memory_space<vmem>>, vector<1x1x1x32xf32>
    %299 = vector.shape_cast %298 : vector<1x1x1x32xf32> to vector<1x32xf32>
    %c1_118 = arith.constant 1 : index
    %c1_119 = arith.constant 1 : index
    %c0_120 = arith.constant 0 : index
    %c0_121 = arith.constant 0 : index
    %300 = vector.load %arg6[%c1_118, %c1_119, %c0_120, %c0_121] : memref<2x4x1x32xf32, #tpu.memory_space<vmem>>, vector<1x1x1x32xf32>
    %301 = vector.shape_cast %300 : vector<1x1x1x32xf32> to vector<1x32xf32>
    %cst_122 = arith.constant dense<0.000000e+00> : vector<32xf32>
    %302 = vector.multi_reduction <add>, %297, %cst_122 [1] : vector<32x32xf32> to vector<32xf32>
    %303 = vector.shape_cast %302 : vector<32xf32> to vector<32x1xf32>
    %cst_123 = arith.constant 3.200000e+01 : f32
    %304 = vector.broadcast %cst_123 : f32 to vector<32x1xf32>
    %305 = arith.divf %303, %304 : vector<32x1xf32>
    %306 = arith.mulf %297, %297 : vector<32x32xf32>
    %cst_124 = arith.constant dense<0.000000e+00> : vector<32xf32>
    %307 = vector.multi_reduction <add>, %306, %cst_124 [1] : vector<32x32xf32> to vector<32xf32>
    %308 = vector.shape_cast %307 : vector<32xf32> to vector<32x1xf32>
    %cst_125 = arith.constant 3.200000e+01 : f32
    %309 = vector.broadcast %cst_125 : f32 to vector<32x1xf32>
    %310 = arith.divf %308, %309 : vector<32x1xf32>
    %311 = arith.mulf %305, %305 : vector<32x1xf32>
    %312 = arith.subf %310, %311 : vector<32x1xf32>
    %313 = vector.broadcast %305 : vector<32x1xf32> to vector<32x32xf32>
    %314 = arith.subf %297, %313 : vector<32x32xf32>
    %cst_126 = arith.constant 9.99999974E-6 : f32
    %315 = vector.broadcast %cst_126 : f32 to vector<32x1xf32>
    %316 = arith.addf %312, %315 : vector<32x1xf32>
    %317 = math.rsqrt %316 : vector<32x1xf32>
    %318 = vector.broadcast %317 : vector<32x1xf32> to vector<32x32xf32>
    %319 = arith.mulf %314, %318 : vector<32x32xf32>
    %320 = vector.broadcast %299 : vector<1x32xf32> to vector<32x32xf32>
    %321 = arith.mulf %319, %320 : vector<32x32xf32>
    %322 = vector.broadcast %301 : vector<1x32xf32> to vector<32x32xf32>
    %323 = arith.addf %321, %322 : vector<32x32xf32>
    %324 = arith.truncf %323 : vector<32x32xf32> to vector<32x32xbf16>
    %c1_127 = arith.constant 1 : index
    %c0_128 = arith.constant 0 : index
    %c0_129 = arith.constant 0 : index
    %325 = vector.load %arg7[%c1_127, %c0_128, %c0_129] : memref<2x32x128xbf16, #tpu.memory_space<vmem>>, vector<1x32x128xbf16>
    %326 = vector.shape_cast %325 : vector<1x32x128xbf16> to vector<32x128xbf16>
    %cst_130 = arith.constant dense<0.000000e+00> : vector<32x128xf32>
    %327 = tpu.matmul %324, %326, %cst_130 {dimension_numbers = #tpu.dot_dimension_numbers<[1], [0], [0], [1], [0, 0, 1, 1], [], []>} : vector<32x32xbf16>, vector<32x128xbf16>, vector<32x128xf32> -> vector<32x128xf32>
    %c1_131 = arith.constant 1 : index
    %c0_132 = arith.constant 0 : index
    %c0_133 = arith.constant 0 : index
    %328 = vector.load %arg8[%c1_131, %c0_132, %c0_133] : memref<2x1x128xf32, #tpu.memory_space<vmem>>, vector<1x1x128xf32>
    %329 = vector.shape_cast %328 : vector<1x1x128xf32> to vector<1x128xf32>
    %330 = vector.broadcast %329 : vector<1x128xf32> to vector<32x128xf32>
    %331 = arith.addf %327, %330 : vector<32x128xf32>
    %332 = arith.mulf %331, %331 : vector<32x128xf32>
    %333 = arith.mulf %331, %332 : vector<32x128xf32>
    %cst_134 = arith.constant 4.471500e-02 : f32
    %334 = vector.broadcast %cst_134 : f32 to vector<32x128xf32>
    %335 = arith.mulf %334, %333 : vector<32x128xf32>
    %336 = arith.addf %331, %335 : vector<32x128xf32>
    %cst_135 = arith.constant 0.797884583 : f32
    %337 = vector.broadcast %cst_135 : f32 to vector<32x128xf32>
    %338 = arith.mulf %337, %336 : vector<32x128xf32>
    %339 = math.tanh %338 : vector<32x128xf32>
    %cst_136 = arith.constant 1.000000e+00 : f32
    %340 = vector.broadcast %cst_136 : f32 to vector<32x128xf32>
    %341 = arith.addf %340, %339 : vector<32x128xf32>
    %cst_137 = arith.constant 5.000000e-01 : f32
    %342 = vector.broadcast %cst_137 : f32 to vector<32x128xf32>
    %343 = arith.mulf %342, %341 : vector<32x128xf32>
    %344 = arith.mulf %331, %343 : vector<32x128xf32>
    %345 = arith.truncf %344 : vector<32x128xf32> to vector<32x128xbf16>
    %c1_138 = arith.constant 1 : index
    %c0_139 = arith.constant 0 : index
    %c0_140 = arith.constant 0 : index
    %346 = vector.load %arg9[%c1_138, %c0_139, %c0_140] : memref<2x128x32xbf16, #tpu.memory_space<vmem>>, vector<1x128x32xbf16>
    %347 = vector.shape_cast %346 : vector<1x128x32xbf16> to vector<128x32xbf16>
    %cst_141 = arith.constant dense<0.000000e+00> : vector<32x32xf32>
    %348 = tpu.matmul %345, %347, %cst_141 {dimension_numbers = #tpu.dot_dimension_numbers<[1], [0], [0], [1], [0, 0, 1, 1], [], []>} : vector<32x128xbf16>, vector<128x32xbf16>, vector<32x32xf32> -> vector<32x32xf32>
    %c1_142 = arith.constant 1 : index
    %c0_143 = arith.constant 0 : index
    %c0_144 = arith.constant 0 : index
    %349 = vector.load %arg10[%c1_142, %c0_143, %c0_144] : memref<2x1x32xf32, #tpu.memory_space<vmem>>, vector<1x1x32xf32>
    %350 = vector.shape_cast %349 : vector<1x1x32xf32> to vector<1x32xf32>
    %351 = vector.broadcast %350 : vector<1x32xf32> to vector<32x32xf32>
    %352 = arith.addf %348, %351 : vector<32x32xf32>
    %353 = arith.addf %323, %352 : vector<32x32xf32>
    %c1_145 = arith.constant 1 : index
    %c2_146 = arith.constant 2 : index
    %c0_147 = arith.constant 0 : index
    %c0_148 = arith.constant 0 : index
    %354 = vector.load %arg6[%c1_145, %c2_146, %c0_147, %c0_148] : memref<2x4x1x32xf32, #tpu.memory_space<vmem>>, vector<1x1x1x32xf32>
    %355 = vector.shape_cast %354 : vector<1x1x1x32xf32> to vector<1x32xf32>
    %c1_149 = arith.constant 1 : index
    %c3_150 = arith.constant 3 : index
    %c0_151 = arith.constant 0 : index
    %c0_152 = arith.constant 0 : index
    %356 = vector.load %arg6[%c1_149, %c3_150, %c0_151, %c0_152] : memref<2x4x1x32xf32, #tpu.memory_space<vmem>>, vector<1x1x1x32xf32>
    %357 = vector.shape_cast %356 : vector<1x1x1x32xf32> to vector<1x32xf32>
    %cst_153 = arith.constant dense<0.000000e+00> : vector<32xf32>
    %358 = vector.multi_reduction <add>, %353, %cst_153 [1] : vector<32x32xf32> to vector<32xf32>
    %359 = vector.shape_cast %358 : vector<32xf32> to vector<32x1xf32>
    %cst_154 = arith.constant 3.200000e+01 : f32
    %360 = vector.broadcast %cst_154 : f32 to vector<32x1xf32>
    %361 = arith.divf %359, %360 : vector<32x1xf32>
    %362 = arith.mulf %353, %353 : vector<32x32xf32>
    %cst_155 = arith.constant dense<0.000000e+00> : vector<32xf32>
    %363 = vector.multi_reduction <add>, %362, %cst_155 [1] : vector<32x32xf32> to vector<32xf32>
    %364 = vector.shape_cast %363 : vector<32xf32> to vector<32x1xf32>
    %cst_156 = arith.constant 3.200000e+01 : f32
    %365 = vector.broadcast %cst_156 : f32 to vector<32x1xf32>
    %366 = arith.divf %364, %365 : vector<32x1xf32>
    %367 = arith.mulf %361, %361 : vector<32x1xf32>
    %368 = arith.subf %366, %367 : vector<32x1xf32>
    %369 = vector.broadcast %361 : vector<32x1xf32> to vector<32x32xf32>
    %370 = arith.subf %353, %369 : vector<32x32xf32>
    %cst_157 = arith.constant 9.99999974E-6 : f32
    %371 = vector.broadcast %cst_157 : f32 to vector<32x1xf32>
    %372 = arith.addf %368, %371 : vector<32x1xf32>
    %373 = math.rsqrt %372 : vector<32x1xf32>
    %374 = vector.broadcast %373 : vector<32x1xf32> to vector<32x32xf32>
    %375 = arith.mulf %370, %374 : vector<32x32xf32>
    %376 = vector.broadcast %355 : vector<1x32xf32> to vector<32x32xf32>
    %377 = arith.mulf %375, %376 : vector<32x32xf32>
    %378 = vector.broadcast %357 : vector<1x32xf32> to vector<32x32xf32>
    %379 = arith.addf %377, %378 : vector<32x32xf32>
    %380 = arith.truncf %379 : vector<32x32xf32> to vector<32x32xbf16>
    %c0_158 = arith.constant 0 : index
    %c0_159 = arith.constant 0 : index
    %381 = vector.load %arg11[%c0_158, %c0_159] : memref<64x32xbf16, #tpu.memory_space<vmem>>, vector<64x32xbf16>
    %cst_160 = arith.constant dense<0.000000e+00> : vector<32x64xf32>
    %382 = tpu.matmul %380, %381, %cst_160 {dimension_numbers = #tpu.dot_dimension_numbers<[1], [1], [0], [0], [0, 0, 1, 0], [], []>} : vector<32x32xbf16>, vector<64x32xbf16>, vector<32x64xf32> -> vector<32x64xf32>
    %cst_161 = arith.constant dense<0xFF800000> : vector<32xf32>
    %383 = vector.multi_reduction <maximumf>, %382, %cst_161 [1] : vector<32x64xf32> to vector<32xf32>
    %384 = vector.shape_cast %383 : vector<32xf32> to vector<32x1xf32>
    %385 = vector.broadcast %384 : vector<32x1xf32> to vector<32x64xf32>
    %386 = arith.subf %382, %385 : vector<32x64xf32>
    %387 = math.exp %386 : vector<32x64xf32>
    %cst_162 = arith.constant dense<0.000000e+00> : vector<32xf32>
    %388 = vector.multi_reduction <add>, %387, %cst_162 [1] : vector<32x64xf32> to vector<32xf32>
    %389 = vector.shape_cast %388 : vector<32xf32> to vector<32x1xf32>
    %390 = math.log %389 : vector<32x1xf32>
    %391 = arith.addf %384, %390 : vector<32x1xf32>
    %392 = tpu.iota {dimensions = array<i32: 1>} : vector<32x64xi32>
    %c0_163 = arith.constant 0 : index
    %c0_164 = arith.constant 0 : index
    %393 = vector.load %arg12[%c0_163, %c0_164] : memref<32x1xi32, #tpu.memory_space<vmem>>, vector<32x1xi32>
    %394 = vector.broadcast %393 : vector<32x1xi32> to vector<32x64xi32>
    %395 = arith.cmpi eq, %392, %394 : vector<32x64xi32>
    %cst_165 = arith.constant 0.000000e+00 : f32
    %396 = vector.broadcast %cst_165 : f32 to vector<32x64xf32>
    %397 = arith.select %395, %382, %396 : vector<32x64xi1>, vector<32x64xf32>
    %cst_166 = arith.constant dense<0.000000e+00> : vector<32xf32>
    %398 = vector.multi_reduction <add>, %397, %cst_166 [1] : vector<32x64xf32> to vector<32xf32>
    %399 = vector.shape_cast %398 : vector<32xf32> to vector<32x1xf32>
    %400 = arith.subf %391, %399 : vector<32x1xf32>
    %c0_167 = arith.constant 0 : index
    %c0_168 = arith.constant 0 : index
    %401 = vector.load %arg13[%c0_167, %c0_168] : memref<32x1xf32, #tpu.memory_space<vmem>>, vector<32x1xf32>
    %402 = arith.mulf %400, %401 : vector<32x1xf32>
    %cst_169 = arith.constant dense<0.000000e+00> : vector<1xf32>
    %403 = vector.multi_reduction <add>, %402, %cst_169 [0] : vector<32x1xf32> to vector<1xf32>
    %404 = vector.shape_cast %403 : vector<1xf32> to vector<1x1xf32>
    %cst_170 = arith.constant dense<0.000000e+00> : vector<1xf32>
    %405 = vector.multi_reduction <add>, %401, %cst_170 [0] : vector<32x1xf32> to vector<1xf32>
    %406 = vector.shape_cast %405 : vector<1xf32> to vector<1x1xf32>
    %cst_171 = arith.constant 1.000000e+00 : f32
    %407 = vector.broadcast %cst_171 : f32 to vector<1x1xf32>
    %408 = arith.maximumf %406, %407 : vector<1x1xf32>
    %409 = arith.divf %404, %408 : vector<1x1xf32>
    %410 = vector.shape_cast %379 : vector<32x32xf32> to vector<2x16x32xf32>
    %411 = vector.extract_strided_slice %410 {offsets = [0, 0, 0], sizes = [2, 1, 32], strides = [1, 1, 1]} : vector<2x16x32xf32> to vector<2x1x32xf32>
    %412 = vector.shape_cast %411 : vector<2x1x32xf32> to vector<2x32xf32>
    %413 = arith.truncf %412 : vector<2x32xf32> to vector<2x32xbf16>
    %c0_172 = arith.constant 0 : index
    %c0_173 = arith.constant 0 : index
    %414 = vector.load %arg14[%c0_172, %c0_173] : memref<32x4xbf16, #tpu.memory_space<vmem>>, vector<32x4xbf16>
    %cst_174 = arith.constant dense<0.000000e+00> : vector<2x4xf32>
    %415 = tpu.matmul %413, %414, %cst_174 {dimension_numbers = #tpu.dot_dimension_numbers<[1], [0], [0], [1], [0, 0, 1, 1], [], []>} : vector<2x32xbf16>, vector<32x4xbf16>, vector<2x4xf32> -> vector<2x4xf32>
    %c0_175 = arith.constant 0 : index
    %c0_176 = arith.constant 0 : index
    %416 = vector.load %arg15[%c0_175, %c0_176] : memref<1x4xf32, #tpu.memory_space<vmem>>, vector<1x4xf32>
    %417 = vector.broadcast %416 : vector<1x4xf32> to vector<2x4xf32>
    %418 = arith.addf %415, %417 : vector<2x4xf32>
    %cst_177 = arith.constant dense<0xFF800000> : vector<2xf32>
    %419 = vector.multi_reduction <maximumf>, %418, %cst_177 [1] : vector<2x4xf32> to vector<2xf32>
    %420 = vector.shape_cast %419 : vector<2xf32> to vector<2x1xf32>
    %421 = vector.broadcast %420 : vector<2x1xf32> to vector<2x4xf32>
    %422 = arith.subf %418, %421 : vector<2x4xf32>
    %423 = math.exp %422 : vector<2x4xf32>
    %cst_178 = arith.constant dense<0.000000e+00> : vector<2xf32>
    %424 = vector.multi_reduction <add>, %423, %cst_178 [1] : vector<2x4xf32> to vector<2xf32>
    %425 = vector.shape_cast %424 : vector<2xf32> to vector<2x1xf32>
    %426 = vector.broadcast %425 : vector<2x1xf32> to vector<2x4xf32>
    %427 = arith.divf %423, %426 : vector<2x4xf32>
    %428 = vector.broadcast %420 : vector<2x1xf32> to vector<2x4xf32>
    %429 = arith.subf %418, %428 : vector<2x4xf32>
    %430 = math.log %425 : vector<2x1xf32>
    %431 = vector.broadcast %430 : vector<2x1xf32> to vector<2x4xf32>
    %432 = arith.subf %429, %431 : vector<2x4xf32>
    %cst_179 = arith.constant 1.000000e+00 : f32
    %433 = vector.broadcast %cst_179 : f32 to vector<2x1xf32>
    %434 = vector.broadcast %409 : vector<1x1xf32> to vector<2x1xf32>
    %435 = arith.mulf %434, %433 : vector<2x1xf32>
    %cst_180 = arith.constant 0.000000e+00 : f32
    %436 = vector.broadcast %cst_180 : f32 to vector<2x87xf32>
    %437 = tpu.concatenate %412, %427, %432, %435, %436 in 1 : vector<2x32xf32>, vector<2x4xf32>, vector<2x4xf32>, vector<2x1xf32>, vector<2x87xf32> -> vector<2x128xf32>
    %cst_181 = arith.constant 0.000000e+00 : f32
    %438 = vector.broadcast %cst_181 : f32 to vector<6x128xf32>
    %439 = tpu.concatenate %437, %438 in 0 : vector<2x128xf32>, vector<6x128xf32> -> vector<8x128xf32>
    %c0_182 = arith.constant 0 : index
    %c0_183 = arith.constant 0 : index
    %440 = vector.load %arg16[%c0_182, %c0_183] : memref<8x128xf32, #tpu.memory_space<vmem>>, vector<8x128xf32>
    tpu.vector_store %arg16[%c0_182, %c0_183], %439 {strides = array<i32>} : memref<8x128xf32, #tpu.memory_space<vmem>>, vector<8x128xf32>,
    return
  }
}

</mosaic_0001>

<bundles_post_ra>
// kernel: tpu_custom_call.1
= control target key start
LH: loop header
LB: loop body
LE: loop exit
PB: predicated region body
PF: predicated region fallthrough
CT: control target
= control target key end

     0   :  { %s5695_s0 = inlined_call_operand.vmem [shape: f32[32,32], index: 0, kind: input, shape index: {}]   ;;  %s5696_s1 = inlined_call_operand.vmem [shape: f32[2,16], index: 1, kind: input, shape index: {}]   ;;  %s5697_s2 = inlined_call_operand.vmem [shape: bf16[2,32,96], index: 2, kind: input, shape index: {}]   ;;  %s5698_s3 = inlined_call_operand.vmem [shape: f32[2,1,96], index: 3, kind: input, shape index: {}]   ;;  %s5699_s4 = inlined_call_operand.vmem [shape: bf16[2,32,32], index: 4, kind: input, shape index: {}]   ;;  %s5700_s5 = inlined_call_operand.vmem [shape: f32[2,1,32], index: 5, kind: input, shape index: {}]   ;;  %s5701_s6 = inlined_call_operand.vmem [shape: f32[2,4,1,32], index: 6, kind: input, shape index: {}]   ;;  %s5702_s7 = inlined_call_operand.vmem [shape: bf16[2,32,128], index: 7, kind: input, shape index: {}]   ;;  %s5703_s8 = inlined_call_operand.vmem [shape: f32[2,1,128], index: 8, kind: input, shape index: {}]   ;;  %s5704_s9 = inlined_call_operand.vmem [shape: bf16[2,128,32], index: 9, kind: input, shape index: {}]   ;;  %s5705_s10 = inlined_call_operand.vmem [shape: f32[2,1,32], index: 10, kind: input, shape index: {}]   ;;  %s5706_s11 = inlined_call_operand.vmem [shape: bf16[64,32], index: 11, kind: input, shape index: {}]   ;;  %s5707_s12 = inlined_call_operand.vmem [shape: s32[32,1], index: 12, kind: input, shape index: {}]   ;;  %s5708_s13 = inlined_call_operand.vmem [shape: f32[32,1], index: 13, kind: input, shape index: {}]   ;;  %s5709_s14 = inlined_call_operand.vmem [shape: bf16[32,4], index: 14, kind: input, shape index: {}]   ;;  %s5710_s15 = inlined_call_operand.vmem [shape: f32[1,4], index: 15, kind: input, shape index: {}]   ;;  %s5711_s16 = inlined_call_operand.hbm [shape: f32[8,128], index: 16, kind: output, shape index: {}]  }
   0x1   :  { %5725 = sst [smem:[#allocation5_spill]] %s5695_s0 }
   0x2   :  { %v4375_v0 = vld [vmem:[%s5697_s2] sm:$0xff]   ;;  %v4376_v1 = vld [vmem:[%s5697_s2 + $0x8] sm:$0xff]   ;;  %s5726_s27 = sld [smem:[#allocation5_spill]]  ;;  %vm110_vm0 = vcmask 261120  }
   0x3   :  { %3987 = vmatprep.subr.bf16.mxu0 %v4375_v0 }
   0x4   :  { %3988 = vmatpush3.bf16.msra.mxu0 %v4375_v0 }
   0x5   :  { %3989 = vmatprep.subr.bf16.mxu0 %v4376_v1 }
   0x8   :  { %v55_v2 = vld [vmem:[%s5726_s27] sm:$0xff]  ;;  %v56_v3 = vld [vmem:[%s5726_s27 + $0x8] sm:$0xff]  ;;  %v57_v4 = vld [vmem:[%s5726_s27 + $0x10] sm:$0xff]  ;;  %3990 = vmatpush3.bf16.msra.mxu0 %v4376_v1 }
   0x9   :  { %v85_v5 = vpack.c.bf16 %v56_v3, %v55_v2  ;;  %v58_v6 = vld [vmem:[%s5726_s27 + $0x18] sm:$0xff] }
   0xa   :  { %v86_v7 = vpack.c.bf16 %v58_v6, %v57_v4 }
   0xb   :  { %3991 = vmatprep.mubr.msk.bf16.mxu0 %vm110_vm0, %v85_v5 }
   0xc   :  { %3992 = vmatmul.mubr.msk.bf16.vlgmr.msra.gmra.mrb[0].mxu0 %vm110_vm0, %v86_v7 }
   0xd   :  { %21 = vsyncpa [#allocation3], 0  ;;  %v4637_v8 = vmov 0.0   ;;  %v3733_v10 = vld [vmem:[%s5698_s3] ss:$0 sm:$0xff]  ;;  %vm4638_vm1 = vmmov 0   ;;  %v66_v26 = vlaneseq }
   0xe   :  { %3995 = vmatprep.subr.bf16.mxu1 %v4637_v8  ;;  %4001 = vmatprep.subr.bf16.mxu0 %v4637_v8  ;;  %s4639_s21 = smov 96   ;;  %vm171_vm2 = vcmask 64512   ;;  %v4640_v24 = vmov 1966171168   ;;  %v59_v27 = vld [vmem:[%s5696_s1] sm:$0x3] }
   0xf   :  { %3997 = vmatprep.mubr.msk.bf16.mxu1 %vm4638_vm1, %v4637_v8  ;;  %4003 = vmatprep.mubr.msk.bf16.mxu0 %vm4638_vm1, %v4637_v8  ;;  %v64_v25 = vunpack.c.l.s4 %v4640_v24  ;;  %v67_v29 = vshrl.u32 %v66_v26, 7  ;;  %vm60_vm3 = vcmp.gt.f32.partialorder %v59_v27, 0.5  ;;  %v4641_v31 = vmov -1e+09   ;;  %s4642_s1 = smov 64   ;;  %s4643_s24 = smov 88  }
  0x10   :  { %v61_v32 = vsel %vm60_vm3, 0.0, %v4641_v31  ;;  %vm287_vm4 = vcmask 130048   ;;  %s4644_s25 = smov 120   ;;  %s4645_s26 = smov 56   ;;  %vm1234_vm5 = vcmask 195584   ;;  %vm3619_vm6 = vcmask 1041409  }
  0x11   :  { %v65_v28 = vunpack.c.0.s8 %v64_v25  ;;  %v275_v35 = vsub.s32 0, %v67_v29  ;;  %s4646_s28 = smov 80   ;;  %s4647_s29 = smov 112   ;;  %vm3472_vm7 = vcmask 523264   ;;  %vm3677_vm8 = vcmask 25600  }
  0x12   :  { %s4648_s30 = smov 48   ;;  %s5723_s0 = smov 72   ;;  %vm3571_vm13 = vcmask 7168   ;;  %vm3710_vm14 = vcmask 293888   ;;  %vm3712_vm15 = vcmask 326656  }
  0x13   :  { %v68_v30 = vsub.s32 %v65_v28, %v67_v29  ;;  %s5721_s17 = smov 104   ;;  %s5717_s18 = smov 40  }
  0x14   :  { %s5715_s19 = smov 8   ;;  %s5713_s20 = smov 16  }
  0x15   :  { %v69_v33 = vrot.slane %v61_v32, %v68_v30 }
  0x17   :  { %v77_v34 = vrot.slane %v69_v33, %v68_v30  ;;  %v70_v36 = vcombine.high %v69_v33, %v69_v33 }
  0x19   :  { %v4797_v37 = vrot.slane %v77_v34, %v275_v35  ;;  %v84_v38 = vrot.slane %v70_v36, %v68_v30 }
  0x1b   :  { %v4800_v46 = vrot.slane %v84_v38, %v275_v35 }
  0xdf   :  { %v3993_v9 = vpop.f32.mrb[0].mxu0 }
  0xe0   :  { %v151_v11 = vpop.f32.mrb[1].mxu0  ;;  %v160_v13 = vadd.f32 %v3993_v9, %v3733_v10 }
  0xe1   :  { %v3994_v12 = vpop.f32.mrb[2].mxu0  ;;  %v152_v16 = vadd.f32 %v3733_v10, %v151_v11 }
  0xe2   :  { %v163_v14 = vadd.f32 %v3994_v12, %v3733_v10  ;;  %v154_v15 = vpop.f32.mrb[3].mxu0 }
  0xe3   :  { %v155_v17 = vadd.f32 %v3733_v10, %v154_v15 }
  0xe4   :  { %v4773_v18 = vpack.c.bf16 %v163_v14, %v160_v13 }
  0xe5   :  { %v4775_v19 = vpack.c.bf16 %v155_v17, %v152_v16 }
  0xe7   :  { %169 = vrot.lane.b32.xlu0 %v4775_v19, %s4639_s21 }
  0xeb   :  { %220 = vrot.lane.b32.xlu0 %v4773_v18, %s4639_s21 }
 0x159   :  { %v170_v20 = vpop.permute.xlu0 %169 }
 0x15a   :  { %v176_v21 = vsel %vm171_vm2, %v170_v20, 0 }
 0x15b   :  { %3996 = vmatpush3.bf16.xpose.msra.mxu1 %v176_v21 }
 0x15c   :  { %4007 = vmatprep.subr.bf16.mxu1 %v4637_v8 }
 0x15d   :  { %v221_v22 = vpop.permute.xlu0 %220 }
 0x15e   :  { %v226_v23 = vsel %vm171_vm2, %v221_v22, 0 }
 0x15f   :  { %4002 = vmatpush3.bf16.xpose.msra.mxu0 %v226_v23 }
 0x160   :  { %4013 = vmatprep.subr.bf16.mxu0 %v4637_v8 }
 0x162   :  { %3998 = vmatmul.mubr.msk.bf16.vlgmr.msra.gmra.mrb[0].mxu1 %vm171_vm2, %v4775_v19 }
 0x163   :  { %4009 = vmatprep.mubr.msk.bf16.mxu1 %vm4638_vm1, %v4637_v8 }
 0x166   :  { %4004 = vmatmul.mubr.msk.bf16.vlgmr.msra.gmra.mrb[4].mxu0 %vm171_vm2, %v4773_v18 }
 0x167   :  { %4015 = vmatprep.mubr.msk.bf16.mxu0 %vm4638_vm1, %v4637_v8 }
 0x235   :  { %v212_v39 = vpop.f32.mrb[0].mxu1 }
 0x236   :  { %v269_v40 = vmul.f32 0.35355338, %v212_v39  ;;  %v3999_v41 = vpop.f32.mrb[1].mxu1 }
 0x237   :  { %v215_v42 = vpop.f32.mrb[2].mxu1 }
 0x238   :  { %v270_v43 = vmul.f32 0.35355338, %v215_v42  ;;  %v4000_v44 = vpop.f32.mrb[3].mxu1  ;;  %v283_v45 = vadd.f32 %v4797_v37, %v269_v40 }
 0x239   :  { %v262_v47 = vpop.f32.mrb[4].mxu0 }
 0x23a   :  { %v271_v48 = vmul.f32 0.35355338, %v262_v47  ;;  %v4005_v49 = vpop.f32.mrb[5].mxu0  ;;  %v288_v50 = vsel %vm287_vm4, %v283_v45, -inf  ;;  %v284_v51 = vadd.f32 %v4797_v37, %v270_v43 }
 0x23b   :  { %289 = vmax.xlane.f32.xlu1 %v288_v50  ;;  %v265_v52 = vpop.f32.mrb[6].mxu0 }
 0x23c   :  { %v272_v53 = vmul.f32 0.35355338, %v265_v52  ;;  %v4006_v54 = vpop.f32.mrb[7].mxu0  ;;  %v285_v55 = vadd.f32 %v4800_v46, %v271_v48  ;;  %v291_v56 = vsel %vm287_vm4, %v284_v51, -inf }
 0x23e   :  { %v294_v57 = vsel %vm287_vm4, %v285_v55, -inf  ;;  %v286_v58 = vadd.f32 %v4800_v46, %v272_v53 }
 0x23f   :  { %292 = vmax.xlane.f32.xlu1 %v291_v56  ;;  %295 = vmax.xlane.f32.xlu0 %v294_v57 }
 0x240   :  { %v297_v59 = vsel %vm287_vm4, %v286_v58, -inf }
 0x243   :  { %298 = vmax.xlane.f32.xlu1 %v297_v59 }
 0x254   :  { %334 = vrot.lane.b32.xlu1 %v4775_v19, %s4642_s1 }
 0x255   :  { %381 = vrot.lane.b32.xlu0 %v4773_v18, %s4642_s1 }
 0x258   :  { %430 = vrot.lane.b32.xlu1 %v4775_v19, %s4643_s24 }
 0x25c   :  { %481 = vrot.lane.b32.xlu1 %v4773_v18, %s4643_s24 }
 0x2c8   :  { %v290_v60 = vpop.xlane.xlu1 %289 }
 0x2c9   :  { %v300_v61 = vsub.f32 %v283_v45, %v290_v60 }
 0x2cb   :  { %v304_v2 = vmul.f32 1.442695, %v300_v61 }
 0x2cc   :  { %v293_v62 = vpop.xlane.xlu1 %292  ;;  %v296_v63 = vpop.xlane.xlu0 %295 }
 0x2cd   :  { %v302_v0 = vsub.f32 %v285_v55, %v296_v63  ;;  %v301_v6 = vsub.f32 %v284_v51, %v293_v62 }
 0x2cf   :  { %v308_v1 = vmul.f32 1.442695, %v302_v0  ;;  %v306_v10 = vmul.f32 1.442695, %v301_v6 }
 0x2d0   :  { %v382_v3 = vpop.permute.xlu0 %381  ;;  %v299_v4 = vpop.xlane.xlu1 %298 }
 0x2d1   :  { %v303_v5 = vsub.f32 %v286_v58, %v299_v4  ;;  %4014 = vmatpush3.bf16.msra.mxu0 %v382_v3  ;;  %4409 = vpow2.f32 %v308_v1 }
 0x2d2   :  { %4025 = vmatprep.subr.bf16.mxu0 %v4637_v8  ;;  %4411 = vpow2.f32 %v304_v2 }
 0x2d3   :  { %v310_v7 = vmul.f32 1.442695, %v303_v5 }
 0x2d4   :  { %v335_v9 = vpop.permute.xlu1 %334 }
 0x2d5   :  { %4008 = vmatpush3.bf16.msra.mxu1 %v335_v9  ;;  %4413 = vpow2.f32 %v310_v7 }
 0x2d6   :  { %4019 = vmatprep.subr.bf16.mxu1 %v4637_v8  ;;  %4415 = vpow2.f32 %v306_v10 }
 0x2d8   :  { %v431_v21 = vpop.permute.xlu1 %430 }
 0x2d9   :  { %v436_v41 = vsel %vm171_vm2, %v431_v21, 0 }
 0x2db   :  { %v4410_v11 = vpop.eup %4409 }
 0x2dc   :  { %v318_v12 = vsel %vm287_vm4, %v4410_v11, 0.0  ;;  %v4412_v13 = vpop.eup %4411  ;;  %v482_v22 = vpop.permute.xlu1 %481 }
 0x2dd   :  { %319 = vadd.xlane.f32.xlu1 %v318_v12  ;;  %v312_v14 = vsel %vm287_vm4, %v4412_v13, 0.0  ;;  %v487_v35 = vsel %vm171_vm2, %v482_v22, 0 }
 0x2df   :  { %v4414_v15 = vpop.eup %4413 }
 0x2e0   :  { %v321_v16 = vsel %vm287_vm4, %v4414_v15, 0.0  ;;  %v4416_v17 = vpop.eup %4415 }
 0x2e1   :  { %313 = vadd.xlane.f32.xlu1 %v312_v14  ;;  %v315_v20 = vsel %vm287_vm4, %v4416_v17, 0.0 }
 0x2e5   :  { %322 = vadd.xlane.f32.xlu1 %v321_v16 }
 0x2e9   :  { %316 = vadd.xlane.f32.xlu1 %v315_v20 }
 0x2fa   :  { %428 = vrot.lane.b32.xlu1 %v4775_v19, %s4644_s25 }
 0x2fe   :  { %479 = vrot.lane.b32.xlu1 %v4773_v18, %s4644_s25 }
 0x36a   :  { %v320_v23 = vpop.xlane.xlu1 %319 }
 0x36b   :  { %4417 = vrcp.f32 %v320_v23 }
 0x36e   :  { %v314_v24 = vpop.xlane.xlu1 %313 }
 0x372   :  { %v323_v25 = vpop.xlane.xlu1 %322 }
 0x373   :  { %4419 = vrcp.f32 %v323_v25 }
 0x374   :  { %4421 = vrcp.f32 %v314_v24 }
 0x375   :  { %v4418_v28 = vpop.eup %4417 }
 0x376   :  { %v317_v27 = vpop.xlane.xlu1 %316  ;;  %v329_v30 = vmul.f32 %v4418_v28, %v4410_v11 }
 0x377   :  { %4423 = vrcp.f32 %v317_v27 }
 0x37a   :  { %v429_v39 = vpop.permute.xlu1 %428 }
 0x37d   :  { %v4420_v29 = vpop.eup %4419 }
 0x37e   :  { %v331_v31 = vmul.f32 %v4420_v29, %v4414_v15  ;;  %v4422_v32 = vpop.eup %4421  ;;  %v480_v42 = vpop.permute.xlu1 %479 }
 0x37f   :  { %v325_v36 = vmul.f32 %v4422_v32, %v4412_v13 }
 0x380   :  { %v333_v33 = vpack.c.bf16 %v331_v31, %v329_v30 }
 0x381   :  { %v4424_v34 = vpop.eup %4423 }
 0x382   :  { %v327_v38 = vmul.f32 %v4424_v34, %v4416_v17  ;;  %4016 = vmatmul.mubr.msk.bf16.vlgmr.msra.gmra.mrb[8].mxu0 %vm287_vm4, %v333_v33 }
 0x383   :  { %4026 = vmatpush3.bf16.xpose.msra.mxu0 %v487_v35  ;;  %4027 = vmatprep.mubr.msk.bf16.mxu0 %vm4638_vm1, %v4637_v8 }
 0x384   :  { %v332_v40 = vpack.c.bf16 %v327_v38, %v325_v36  ;;  %4037 = vmatprep.subr.bf16.mxu0 %v4637_v8 }
 0x386   :  { %4010 = vmatmul.mubr.msk.bf16.vlgmr.msra.gmra.mrb[4].mxu1 %vm287_vm4, %v332_v40 }
 0x387   :  { %4020 = vmatpush3.bf16.xpose.msra.mxu1 %v436_v41  ;;  %4021 = vmatprep.mubr.msk.bf16.mxu1 %vm4638_vm1, %v4637_v8 }
 0x388   :  { %4031 = vmatprep.subr.bf16.mxu1 %v4637_v8 }
 0x38a   :  { %4028 = vmatmul.mubr.msk.bf16.vlgmr.msra.gmra.mrb[12].mxu0 %vm171_vm2, %v480_v42 }
 0x38b   :  { %4039 = vmatprep.mubr.msk.bf16.mxu0 %vm4638_vm1, %v4637_v8 }
 0x38e   :  { %4022 = vmatmul.mubr.msk.bf16.vlgmr.msra.gmra.mrb[8].mxu1 %vm171_vm2, %v429_v39 }
 0x38f   :  { %4033 = vmatprep.mubr.msk.bf16.mxu1 %vm4638_vm1, %v4637_v8 }
 0x455   :  { %v4843_v43 = vpop.f32.mrb[8].mxu0 }
 0x456   :  { %v4017_v44 = vpop.f32.mrb[9].mxu0 }
 0x457   :  { %v4845_v45 = vpop.f32.mrb[10].mxu0 }
 0x458   :  { %v4018_v47 = vpop.f32.mrb[11].mxu0 }
 0x459   :  { %v4847_v48 = vpop.f32.mrb[4].mxu1 }
 0x45a   :  { %v4011_v49 = vpop.f32.mrb[5].mxu1 }
 0x45b   :  { %v4849_v50 = vpop.f32.mrb[6].mxu1 }
 0x45c   :  { %v4012_v51 = vpop.f32.mrb[7].mxu1 }
 0x45d   :  { %v523_v52 = vpop.f32.mrb[12].mxu0 }
 0x45e   :  { %v4029_v53 = vpop.f32.mrb[13].mxu0  ;;  %v532_v57 = vmul.f32 0.35355338, %v523_v52 }
 0x45f   :  { %v526_v54 = vpop.f32.mrb[14].mxu0 }
 0x460   :  { %v4030_v55 = vpop.f32.mrb[15].mxu0  ;;  %v533_v0 = vmul.f32 0.35355338, %v526_v54  ;;  %v536_v3 = vadd.f32 %v532_v57, %v4800_v46 }
 0x461   :  { %v472_v56 = vpop.f32.mrb[8].mxu1 }
 0x462   :  { %v530_v58 = vmul.f32 0.35355338, %v472_v56  ;;  %v4023_v59 = vpop.f32.mrb[9].mxu1  ;;  %v544_v5 = vsel %vm287_vm4, %v536_v3, -inf  ;;  %v537_v6 = vadd.f32 %v533_v0, %v4800_v46 }
 0x463   :  { %v475_v60 = vpop.f32.mrb[10].mxu1 }
 0x464   :  { %v531_v61 = vmul.f32 0.35355338, %v475_v60  ;;  %v4024_v62 = vpop.f32.mrb[11].mxu1  ;;  %v534_v63 = vadd.f32 %v530_v58, %v4797_v37  ;;  %v547_v7 = vsel %vm287_vm4, %v537_v6, -inf }
 0x466   :  { %v538_v1 = vsel %vm287_vm4, %v534_v63, -inf  ;;  %v535_v2 = vadd.f32 %v531_v61, %v4797_v37 }
 0x467   :  { %539 = vmax.xlane.f32.xlu0 %v538_v1 }
 0x468   :  { %v541_v4 = vsel %vm287_vm4, %v535_v2, -inf }
 0x469   :  { %542 = vmax.xlane.f32.xlu1 %v541_v4 }
 0x46b   :  { %545 = vmax.xlane.f32.xlu0 %v544_v5 }
 0x46f   :  { %548 = vmax.xlane.f32.xlu0 %v547_v7 }
 0x47a   :  { %584 = vrot.lane.b32.xlu1 %v4775_v19, %s4645_s26 }
 0x4f4   :  { %v540_v9 = vpop.xlane.xlu0 %539 }
 0x4f5   :  { %v550_v11 = vsub.f32 %v534_v63, %v540_v9 }
 0x4f6   :  { %v543_v10 = vpop.xlane.xlu1 %542 }
 0x4f7   :  { %v554_v15 = vmul.f32 1.442695, %v550_v11  ;;  %v551_v16 = vsub.f32 %v535_v2, %v543_v10 }
 0x4f8   :  { %v546_v12 = vpop.xlane.xlu0 %545 }
 0x4f9   :  { %v552_v13 = vsub.f32 %v536_v3, %v546_v12  ;;  %v556_v22 = vmul.f32 1.442695, %v551_v16 }
 0x4fa   :  { %v585_v14 = vpop.permute.xlu1 %584 }
 0x4fb   :  { %v558_v17 = vmul.f32 1.442695, %v552_v13  ;;  %4032 = vmatpush3.bf16.msra.mxu1 %v585_v14 }
 0x4fc   :  { %v549_v20 = vpop.xlane.xlu0 %548  ;;  %4043 = vmatprep.subr.bf16.mxu1 %v4637_v8 }
 0x4fd   :  { %4425 = vpow2.f32 %v558_v17  ;;  %v553_v21 = vsub.f32 %v537_v6, %v549_v20 }
 0x4fe   :  { %4427 = vpow2.f32 %v554_v15 }
 0x4ff   :  { %v560_v23 = vmul.f32 1.442695, %v553_v21 }
 0x501   :  { %4429 = vpow2.f32 %v560_v23 }
 0x502   :  { %4431 = vpow2.f32 %v556_v22 }
 0x507   :  { %v4426_v24 = vpop.eup %4425 }
 0x508   :  { %v568_v25 = vsel %vm287_vm4, %v4426_v24, 0.0  ;;  %v4428_v27 = vpop.eup %4427 }
 0x509   :  { %569 = vadd.xlane.f32.xlu1 %v568_v25  ;;  %v562_v29 = vsel %vm287_vm4, %v4428_v27, 0.0 }
 0x50b   :  { %v4430_v28 = vpop.eup %4429 }
 0x50c   :  { %v571_v30 = vsel %vm287_vm4, %v4430_v28, 0.0  ;;  %v4432_v31 = vpop.eup %4431 }
 0x50d   :  { %563 = vadd.xlane.f32.xlu1 %v562_v29  ;;  %572 = vadd.xlane.f32.xlu0 %v571_v30  ;;  %v565_v32 = vsel %vm287_vm4, %v4432_v31, 0.0 }
 0x511   :  { %566 = vadd.xlane.f32.xlu0 %v565_v32 }
 0x51e   :  { %680 = vrot.lane.b32.xlu1 %v4775_v19, %s4646_s28 }
 0x522   :  { %731 = vrot.lane.b32.xlu1 %v4773_v18, %s4646_s28 }
 0x526   :  { %729 = vrot.lane.b32.xlu1 %v4773_v18, %s4647_s29 }
 0x527   :  { %631 = vrot.lane.b32.xlu0 %v4773_v18, %s4645_s26 }
 0x52b   :  { %678 = vrot.lane.b32.xlu0 %v4775_v19, %s4647_s29 }
 0x596   :  { %v570_v33 = vpop.xlane.xlu1 %569 }
 0x597   :  { %4433 = vrcp.f32 %v570_v33 }
 0x59a   :  { %v564_v34 = vpop.xlane.xlu1 %563  ;;  %v573_v35 = vpop.xlane.xlu0 %572 }
 0x59b   :  { %4435 = vrcp.f32 %v573_v35 }
 0x59c   :  { %4437 = vrcp.f32 %v564_v34 }
 0x59e   :  { %v567_v36 = vpop.xlane.xlu0 %566  ;;  %v681_v38 = vpop.permute.xlu1 %680 }
 0x59f   :  { %4439 = vrcp.f32 %v567_v36  ;;  %v686_v57 = vsel %vm171_vm2, %v681_v38, 0 }
 0x5a1   :  { %v4434_v40 = vpop.eup %4433 }
 0x5a2   :  { %v632_v39 = vpop.permute.xlu0 %631  ;;  %v579_v44 = vmul.f32 %v4434_v40, %v4426_v24  ;;  %v732_v49 = vpop.permute.xlu1 %731 }
 0x5a3   :  { %4038 = vmatpush3.bf16.msra.mxu0 %v632_v39  ;;  %v737_v55 = vsel %vm171_vm2, %v732_v49, 0 }
 0x5a4   :  { %4049 = vmatprep.subr.bf16.mxu0 %v4637_v8 }
 0x5a5   :  { %v4436_v41 = vpop.eup %4435 }
 0x5a6   :  { %v4438_v42 = vpop.eup %4437  ;;  %v581_v47 = vmul.f32 %v4436_v41, %v4430_v28  ;;  %v730_v58 = vpop.permute.xlu1 %729 }
 0x5a7   :  { %v575_v53 = vmul.f32 %v4438_v42, %v4428_v27  ;;  %v679_v59 = vpop.permute.xlu0 %678 }
 0x5a8   :  { %v583_v52 = vpack.c.bf16 %v581_v47, %v579_v44 }
 0x5a9   :  { %v4440_v51 = vpop.eup %4439 }
 0x5aa   :  { %v577_v54 = vmul.f32 %v4440_v51, %v4432_v31  ;;  %4040 = vmatmul.mubr.msk.bf16.vlgmr.msra.gmra.mrb[16].mxu0 %vm287_vm4, %v583_v52 }
 0x5ab   :  { %4051 = vmatprep.mubr.msk.bf16.mxu0 %vm4638_vm1, %v4637_v8 }
 0x5ac   :  { %4050 = vmatpush3.bf16.xpose.msra.mxu0 %v737_v55  ;;  %v582_v56 = vpack.c.bf16 %v577_v54, %v575_v53 }
 0x5ad   :  { %4061 = vmatprep.subr.bf16.mxu0 %v4637_v8 }
 0x5ae   :  { %4034 = vmatmul.mubr.msk.bf16.vlgmr.msra.gmra.mrb[12].mxu1 %vm287_vm4, %v582_v56 }
 0x5af   :  { %4044 = vmatpush3.bf16.xpose.msra.mxu1 %v686_v57  ;;  %4045 = vmatprep.mubr.msk.bf16.mxu1 %vm4638_vm1, %v4637_v8 }
 0x5b0   :  { %4055 = vmatprep.subr.bf16.mxu1 %v4637_v8 }
 0x5b3   :  { %4052 = vmatmul.mubr.msk.bf16.vlgmr.msra.gmra.mrb[20].mxu0 %vm171_vm2, %v730_v58 }
 0x5b4   :  { %4063 = vmatprep.mubr.msk.bf16.mxu0 %vm4638_vm1, %v4637_v8 }
 0x5b6   :  { %4046 = vmatmul.mubr.msk.bf16.vlgmr.msra.gmra.mrb[16].mxu1 %vm171_vm2, %v679_v59 }
 0x5b7   :  { %4057 = vmatprep.mubr.msk.bf16.mxu1 %vm4638_vm1, %v4637_v8 }
 0x67d   :  { %v4893_v60 = vpop.f32.mrb[16].mxu0 }
 0x67e   :  { %v4041_v61 = vpop.f32.mrb[17].mxu0 }
 0x67f   :  { %v4895_v62 = vpop.f32.mrb[18].mxu0 }
 0x680   :  { %v4318_v63 = vpack.i.bf16 %v4895_v62, %v4893_v60  ;;  %v4042_v0 = vpop.f32.mrb[19].mxu0 }
 0x681   :  { %v4899_v1 = vpop.f32.mrb[12].mxu1 }
 0x682   :  { %v4035_v2 = vpop.f32.mrb[13].mxu1 }
 0x683   :  { %v4901_v3 = vpop.f32.mrb[14].mxu1 }
 0x684   :  { %v4313_v4 = vpack.i.bf16 %v4901_v3, %v4899_v1  ;;  %v4036_v5 = vpop.f32.mrb[15].mxu1 }
 0x686   :  { %v773_v6 = vpop.f32.mrb[20].mxu0 }
 0x687   :  { %v4053_v7 = vpop.f32.mrb[21].mxu0  ;;  %v782_v12 = vmul.f32 0.35355338, %v773_v6 }
 0x688   :  { %v776_v9 = vpop.f32.mrb[22].mxu0 }
 0x689   :  { %v722_v10 = vpop.f32.mrb[16].mxu1  ;;  %v4054_v11 = vpop.f32.mrb[23].mxu0  ;;  %v783_v21 = vmul.f32 0.35355338, %v776_v9  ;;  %v786_v24 = vadd.f32 %v782_v12, %v4800_v46 }
 0x68a   :  { %v780_v13 = vmul.f32 0.35355338, %v722_v10  ;;  %v4047_v14 = vpop.f32.mrb[17].mxu1 }
 0x68b   :  { %v725_v15 = vpop.f32.mrb[18].mxu1  ;;  %v794_v27 = vsel %vm287_vm4, %v786_v24, -inf  ;;  %v787_v28 = vadd.f32 %v783_v21, %v4800_v46 }
 0x68c   :  { %v781_v16 = vmul.f32 0.35355338, %v725_v15  ;;  %v4048_v17 = vpop.f32.mrb[19].mxu1  ;;  %v784_v20 = vadd.f32 %v780_v13, %v4797_v37 }
 0x68d   :  { %v797_v29 = vsel %vm287_vm4, %v787_v28, -inf }
 0x68e   :  { %v788_v22 = vsel %vm287_vm4, %v784_v20, -inf  ;;  %v785_v23 = vadd.f32 %v781_v16, %v4797_v37 }
 0x68f   :  { %789 = vmax.xlane.f32.xlu0 %v788_v22 }
 0x690   :  { %v791_v25 = vsel %vm287_vm4, %v785_v23, -inf }
 0x691   :  { %792 = vmax.xlane.f32.xlu1 %v791_v25 }
 0x693   :  { %795 = vmax.xlane.f32.xlu0 %v794_v27 }
 0x697   :  { %798 = vmax.xlane.f32.xlu0 %v797_v29 }
 0x6a2   :  { %834 = vrot.lane.b32.xlu1 %v4775_v19, %s4648_s30 }
 0x71c   :  { %v790_v30 = vpop.xlane.xlu0 %789 }
 0x71d   :  { %v800_v32 = vsub.f32 %v784_v20, %v790_v30 }
 0x71e   :  { %v793_v31 = vpop.xlane.xlu1 %792 }
 0x71f   :  { %v804_v36 = vmul.f32 1.442695, %v800_v32  ;;  %v801_v38 = vsub.f32 %v785_v23, %v793_v31 }
 0x720   :  { %v796_v33 = vpop.xlane.xlu0 %795 }
 0x721   :  { %v802_v34 = vsub.f32 %v786_v24, %v796_v33  ;;  %v806_v42 = vmul.f32 1.442695, %v801_v38 }
 0x722   :  { %v835_v35 = vpop.permute.xlu1 %834 }
 0x723   :  { %v808_v39 = vmul.f32 1.442695, %v802_v34  ;;  %4056 = vmatpush3.bf16.msra.mxu1 %v835_v35 }
 0x724   :  { %v799_v40 = vpop.xlane.xlu0 %798  ;;  %4067 = vmatprep.subr.bf16.mxu1 %v4637_v8 }
 0x725   :  { %4441 = vpow2.f32 %v808_v39  ;;  %v803_v41 = vsub.f32 %v787_v28, %v799_v40 }
 0x726   :  { %4443 = vpow2.f32 %v804_v36 }
 0x727   :  { %v810_v44 = vmul.f32 1.442695, %v803_v41 }
 0x729   :  { %4445 = vpow2.f32 %v810_v44 }
 0x72a   :  { %4447 = vpow2.f32 %v806_v42 }
 0x72f   :  { %v4442_v47 = vpop.eup %4441 }
 0x730   :  { %v818_v49 = vsel %vm287_vm4, %v4442_v47, 0.0  ;;  %v4444_v51 = vpop.eup %4443 }
 0x731   :  { %819 = vadd.xlane.f32.xlu1 %v818_v49  ;;  %v812_v53 = vsel %vm287_vm4, %v4444_v51, 0.0 }
 0x733   :  { %v4446_v52 = vpop.eup %4445 }
 0x734   :  { %v821_v54 = vsel %vm287_vm4, %v4446_v52, 0.0  ;;  %v4448_v55 = vpop.eup %4447 }
 0x735   :  { %813 = vadd.xlane.f32.xlu1 %v812_v53  ;;  %822 = vadd.xlane.f32.xlu0 %v821_v54  ;;  %v815_v56 = vsel %vm287_vm4, %v4448_v55, 0.0 }
 0x739   :  { %816 = vadd.xlane.f32.xlu0 %v815_v56 }
 0x746   :  { %930 = vrot.lane.b32.xlu1 %v4775_v19, %s5723_s0 }
 0x74a   :  { %981 = vrot.lane.b32.xlu1 %v4773_v18, %s5723_s0 }
 0x74e   :  { %979 = vrot.lane.b32.xlu1 %v4773_v18, %s5721_s17 }
 0x74f   :  { %881 = vrot.lane.b32.xlu0 %v4773_v18, %s4648_s30 }
 0x753   :  { %928 = vrot.lane.b32.xlu0 %v4775_v19, %s5721_s17 }
 0x7be   :  { %v820_v57 = vpop.xlane.xlu1 %819 }
 0x7bf   :  { %4449 = vrcp.f32 %v820_v57 }
 0x7c2   :  { %v814_v58 = vpop.xlane.xlu1 %813  ;;  %v823_v59 = vpop.xlane.xlu0 %822 }
 0x7c3   :  { %4451 = vrcp.f32 %v823_v59 }
 0x7c4   :  { %4453 = vrcp.f32 %v814_v58 }
 0x7c6   :  { %v817_v61 = vpop.xlane.xlu0 %816  ;;  %v931_v0 = vpop.permute.xlu1 %930 }
 0x7c7   :  { %4455 = vrcp.f32 %v817_v61  ;;  %v936_v20 = vsel %vm171_vm2, %v931_v0, 0 }
 0x7c9   :  { %v4450_v5 = vpop.eup %4449 }
 0x7ca   :  { %v882_v2 = vpop.permute.xlu0 %881  ;;  %v829_v9 = vmul.f32 %v4450_v5, %v4442_v47  ;;  %v982_v11 = vpop.permute.xlu1 %981 }
 0x7cb   :  { %4062 = vmatpush3.bf16.msra.mxu0 %v882_v2  ;;  %v987_v16 = vsel %vm171_vm2, %v982_v11, 0 }
 0x7cc   :  { %4073 = vmatprep.subr.bf16.mxu0 %v4637_v8 }
 0x7cd   :  { %v4452_v6 = vpop.eup %4451 }
 0x7ce   :  { %v4454_v7 = vpop.eup %4453  ;;  %v831_v10 = vmul.f32 %v4452_v6, %v4446_v52  ;;  %v980_v21 = vpop.permute.xlu1 %979 }
 0x7cf   :  { %v825_v14 = vmul.f32 %v4454_v7, %v4444_v51  ;;  %v929_v22 = vpop.permute.xlu0 %928 }
 0x7d0   :  { %v833_v13 = vpack.c.bf16 %v831_v10, %v829_v9 }
 0x7d1   :  { %v4456_v12 = vpop.eup %4455 }
 0x7d2   :  { %v827_v15 = vmul.f32 %v4456_v12, %v4448_v55  ;;  %4064 = vmatmul.mubr.msk.bf16.vlgmr.msra.gmra.mrb[24].mxu0 %vm287_vm4, %v833_v13 }
 0x7d3   :  { %4075 = vmatprep.mubr.msk.bf16.mxu0 %vm4638_vm1, %v4637_v8 }
 0x7d4   :  { %4074 = vmatpush3.bf16.xpose.msra.mxu0 %v987_v16  ;;  %v832_v17 = vpack.c.bf16 %v827_v15, %v825_v14 }
 0x7d5   :  { %4085 = vmatprep.subr.bf16.mxu0 %v4637_v8 }
 0x7d6   :  { %4058 = vmatmul.mubr.msk.bf16.vlgmr.msra.gmra.mrb[20].mxu1 %vm287_vm4, %v832_v17 }
 0x7d7   :  { %4068 = vmatpush3.bf16.xpose.msra.mxu1 %v936_v20  ;;  %4069 = vmatprep.mubr.msk.bf16.mxu1 %vm4638_vm1, %v4637_v8 }
 0x7d8   :  { %4079 = vmatprep.subr.bf16.mxu1 %v4637_v8 }
 0x7db   :  { %4076 = vmatmul.mubr.msk.bf16.vlgmr.msra.gmra.mrb[28].mxu0 %vm171_vm2, %v980_v21 }
 0x7dc   :  { %4087 = vmatprep.mubr.msk.bf16.mxu0 %vm4638_vm1, %v4637_v8 }
 0x7de   :  { %4070 = vmatmul.mubr.msk.bf16.vlgmr.msra.gmra.mrb[24].mxu1 %vm171_vm2, %v929_v22 }
 0x7df   :  { %4081 = vmatprep.mubr.msk.bf16.mxu1 %vm4638_vm1, %v4637_v8 }
 0x8a5   :  { %v4947_v23 = vpop.f32.mrb[24].mxu0 }
 0x8a6   :  { %v4065_v24 = vpop.f32.mrb[25].mxu0 }
 0x8a7   :  { %v4949_v25 = vpop.f32.mrb[26].mxu0 }
 0x8a8   :  { %v4328_v27 = vpack.i.bf16 %v4949_v25, %v4947_v23  ;;  %v4066_v28 = vpop.f32.mrb[27].mxu0 }
 0x8a9   :  { %v4953_v29 = vpop.f32.mrb[20].mxu1 }
 0x8aa   :  { %v4059_v30 = vpop.f32.mrb[21].mxu1 }
 0x8ab   :  { %v4955_v31 = vpop.f32.mrb[22].mxu1 }
 0x8ac   :  { %v4323_v32 = vpack.i.bf16 %v4955_v31, %v4953_v29  ;;  %v4060_v33 = vpop.f32.mrb[23].mxu1 }
 0x8ae   :  { %v1023_v34 = vpop.f32.mrb[28].mxu0 }
 0x8af   :  { %v4077_v35 = vpop.f32.mrb[29].mxu0  ;;  %v1032_v40 = vmul.f32 0.35355338, %v1023_v34  ;;  %v4377_v34 = vld [vmem:[%s5699_s4] sm:$0xff]  }
 0x8b0   :  { %v1026_v36 = vpop.f32.mrb[30].mxu0  ;;  %v4378_v35 = vld [vmem:[%s5699_s4 + $0x8] sm:$0xff]  }
 0x8b1   :  { %v972_v38 = vpop.f32.mrb[24].mxu1  ;;  %v4078_v39 = vpop.f32.mrb[31].mxu0  ;;  %v1033_v52 = vmul.f32 0.35355338, %v1026_v36  ;;  %v1036_v55 = vadd.f32 %v1032_v40, %v4800_v46 }
 0x8b2   :  { %v1030_v41 = vmul.f32 0.35355338, %v972_v38  ;;  %v4071_v42 = vpop.f32.mrb[25].mxu1 }
 0x8b3   :  { %v975_v44 = vpop.f32.mrb[26].mxu1  ;;  %v1044_v57 = vsel %vm287_vm4, %v1036_v55, -inf  ;;  %v1037_v58 = vadd.f32 %v1033_v52, %v4800_v46 }
 0x8b4   :  { %v1031_v47 = vmul.f32 0.35355338, %v975_v44  ;;  %v4072_v49 = vpop.f32.mrb[27].mxu1  ;;  %v1034_v51 = vadd.f32 %v1030_v41, %v4797_v37 }
 0x8b5   :  { %v1047_v59 = vsel %vm287_vm4, %v1037_v58, -inf }
 0x8b6   :  { %v1038_v53 = vsel %vm287_vm4, %v1034_v51, -inf  ;;  %v1035_v54 = vadd.f32 %v1031_v47, %v4797_v37 }
 0x8b7   :  { %1039 = vmax.xlane.f32.xlu0 %v1038_v53 }
 0x8b8   :  { %v1041_v56 = vsel %vm287_vm4, %v1035_v54, -inf }
 0x8b9   :  { %1042 = vmax.xlane.f32.xlu1 %v1041_v56 }
 0x8bb   :  { %1045 = vmax.xlane.f32.xlu0 %v1044_v57 }
 0x8bf   :  { %1048 = vmax.xlane.f32.xlu0 %v1047_v59 }
 0x944   :  { %v1040_v61 = vpop.xlane.xlu0 %1039 }
 0x945   :  { %v1050_v0 = vsub.f32 %v1034_v51, %v1040_v61 }
 0x946   :  { %v1043_v2 = vpop.xlane.xlu1 %1042 }
 0x947   :  { %v1054_v7 = vmul.f32 1.442695, %v1050_v0  ;;  %v1051_v9 = vsub.f32 %v1035_v54, %v1043_v2 }
 0x948   :  { %v1046_v5 = vpop.xlane.xlu0 %1045 }
 0x949   :  { %v1052_v6 = vsub.f32 %v1036_v55, %v1046_v5  ;;  %v1056_v13 = vmul.f32 1.442695, %v1051_v9 }
 0x94b   :  { %v1058_v10 = vmul.f32 1.442695, %v1052_v6 }
 0x94c   :  { %v1049_v11 = vpop.xlane.xlu0 %1048 }
 0x94d   :  { %4457 = vpow2.f32 %v1058_v10  ;;  %v1053_v12 = vsub.f32 %v1037_v58, %v1049_v11 }
 0x94e   :  { %4459 = vpow2.f32 %v1054_v7 }
 0x94f   :  { %v1060_v14 = vmul.f32 1.442695, %v1053_v12 }
 0x951   :  { %4461 = vpow2.f32 %v1060_v14 }
 0x952   :  { %4463 = vpow2.f32 %v1056_v13 }
 0x957   :  { %v4458_v15 = vpop.eup %4457 }
 0x958   :  { %v1068_v16 = vsel %vm287_vm4, %v4458_v15, 0.0  ;;  %v4460_v17 = vpop.eup %4459 }
 0x959   :  { %1069 = vadd.xlane.f32.xlu1 %v1068_v16  ;;  %v1062_v21 = vsel %vm287_vm4, %v4460_v17, 0.0 }
 0x95b   :  { %v4462_v20 = vpop.eup %4461 }
 0x95c   :  { %v1071_v22 = vsel %vm287_vm4, %v4462_v20, 0.0  ;;  %v4464_v24 = vpop.eup %4463 }
 0x95d   :  { %1063 = vadd.xlane.f32.xlu1 %v1062_v21  ;;  %1072 = vadd.xlane.f32.xlu0 %v1071_v22  ;;  %v1065_v28 = vsel %vm287_vm4, %v4464_v24, 0.0 }
 0x961   :  { %1066 = vadd.xlane.f32.xlu0 %v1065_v28 }
 0x96e   :  { %1084 = vrot.lane.b32.xlu1 %v4775_v19, %s5717_s18 }
 0x972   :  { %4314 = vrot.lane.b32.xlu1 %v4313_v4, %s5715_s19 }
 0x976   :  { %4319 = vrot.lane.b32.xlu1 %v4318_v63, %s5715_s19 }
 0x977   :  { %1131 = vrot.lane.b32.xlu0 %v4773_v18, %s5717_s18  ;;  %s5719_s18 = smov 24  }
 0x97a   :  { %4329 = vrot.lane.b32.xlu1 %v4328_v27, %s5713_s20 }
 0x97b   :  { %4324 = vrot.lane.b32.xlu0 %v4323_v32, %s5713_s20 }
 0x9e6   :  { %v1070_v19 = vpop.xlane.xlu1 %1069 }
 0x9e7   :  { %4465 = vrcp.f32 %v1070_v19 }
 0x9ea   :  { %v1064_v1 = vpop.xlane.xlu1 %1063  ;;  %v1073_v3 = vpop.xlane.xlu0 %1072 }
 0x9eb   :  { %4467 = vrcp.f32 %v1073_v3 }
 0x9ec   :  { %4469 = vrcp.f32 %v1064_v1 }
 0x9ee   :  { %v1085_v4 = vpop.permute.xlu1 %1084  ;;  %v1067_v60 = vpop.xlane.xlu0 %1066 }
 0x9ef   :  { %4471 = vrcp.f32 %v1067_v60  ;;  %4080 = vmatpush3.bf16.msra.mxu1 %v1085_v4 }
 0x9f0   :  { %4091 = vmatprep.subr.bf16.mxu1 %v4377_v34 }
 0x9f1   :  { %v4466_v18 = vpop.eup %4465 }
 0x9f2   :  { %v1132_v62 = vpop.permute.xlu0 %1131  ;;  %v1079_v30 = vmul.f32 %v4466_v18, %v4458_v15  ;;  %v4315_v52 = vpop.permute.xlu1 %4314  ;;  %v4609_v18 = vld [vmem:[%s5726_s27 + $0x10] sm:$0xff] }
 0x9f3   :  { %4086 = vmatpush3.bf16.msra.mxu0 %v1132_v62  ;;  %v4317_v61 = vunpack.i.h.bf16 %v4315_v52  ;;  %v4316_v0 = vunpack.i.l.bf16 %v4315_v52 }
 0x9f5   :  { %v4468_v63 = vpop.eup %4467  ;;  %v1227_v14 = vsel %vm171_vm2, %v4849_v50, %v4317_v61 }
 0x9f6   :  { %v4470_v29 = vpop.eup %4469  ;;  %v1081_v23 = vmul.f32 %v4468_v63, %v4462_v20  ;;  %v4320_v53 = vpop.permute.xlu1 %4319 }
 0x9f7   :  { %v1075_v31 = vmul.f32 %v4470_v29, %v4460_v17  ;;  %v4322_v55 = vunpack.i.h.bf16 %v4320_v53  ;;  %v4321_v56 = vunpack.i.l.bf16 %v4320_v53  ;;  %v4325_v57 = vpop.permute.xlu0 %4324  ;;  %v4379_v53 = vld [vmem:[%s5702_s7] sm:$0xff]  }
 0x9f8   :  { %v1083_v27 = vpack.c.bf16 %v1081_v23, %v1079_v30  ;;  %v4327_v2 = vunpack.i.h.bf16 %v4325_v57  ;;  %v4326_v5 = vunpack.i.l.bf16 %v4325_v57  ;;  %v4610_v30 = vld [vmem:[%s5726_s27] sm:$0xff]  ;;  %4099 = vmatprep.subr.bf16.mxu0 %v4379_v53 }
 0x9f9   :  { %v4472_v25 = vpop.eup %4471  ;;  %v1229_v7 = vsel %vm171_vm2, %v4845_v45, %v4322_v55  ;;  %v1228_v9 = vsel %vm171_vm2, %v4843_v43, %v4321_v56  ;;  %v1226_v45 = vsel %vm171_vm2, %v4847_v48, %v4316_v0  ;;  %v3754_v48 = vld [vmem:[%s5700_s5] ss:$0 sm:$0xff] }
 0x9fa   :  { %v1077_v32 = vmul.f32 %v4472_v25, %v4464_v24  ;;  %4088 = vmatmul.mubr.msk.bf16.vlgmr.msra.gmra.mrb[32].mxu0 %vm287_vm4, %v1083_v27  ;;  %v4330_v54 = vpop.permute.xlu1 %4329  ;;  %v1231_v22 = vsel %vm287_vm4, %v1227_v14, %v4327_v2  ;;  %v1230_v24 = vsel %vm287_vm4, %v1226_v45, %v4326_v5 }
 0x9fb   :  { %v4332_v58 = vunpack.i.h.bf16 %v4330_v54  ;;  %v4331_v59 = vunpack.i.l.bf16 %v4330_v54  ;;  %v4380_v54 = vld [vmem:[%s5702_s7 + $0x8] sm:$0xff]   ;;  %4100 = vmatpush3.bf16.msra.mxu0 %v4379_v53  ;;  %v4387_v53 = vld [vmem:[%s5704_s9 + $0x30] sm:$0xff]  }
 0x9fc   :  { %v1082_v33 = vpack.c.bf16 %v1077_v32, %v1075_v31  ;;  %v4611_v32 = vld [vmem:[%s5726_s27 + $0x8] sm:$0xff]  ;;  %4101 = vmatprep.subr.bf16.mxu0 %v4380_v54 }
 0x9fd   :  { %v1232_v12 = vsel %vm287_vm4, %v1228_v9, %v4331_v59  ;;  %v1233_v13 = vsel %vm287_vm4, %v1229_v7, %v4332_v58 }
 0x9fe   :  { %4082 = vmatmul.mubr.msk.bf16.vlgmr.msra.gmra.mrb[28].mxu1 %vm287_vm4, %v1082_v33 }
 0x9ff   :  { %4092 = vmatpush3.bf16.msra.mxu1 %v4377_v34  ;;  %4102 = vmatpush3.bf16.msra.mxu0 %v4380_v54  ;;  %v4388_v54 = vld [vmem:[%s5704_s9 + $0x38] sm:$0xff]  }
 0xa00   :  { %4093 = vmatprep.subr.bf16.mxu1 %v4378_v35 }
 0xa03   :  { %4094 = vmatpush3.bf16.msra.mxu1 %v4378_v35 }
 0xacd   :  { %v1171_v36 = vpop.f32.mrb[32].mxu0 }
 0xace   :  { %v4089_v38 = vpop.f32.mrb[33].mxu0 }
 0xacf   :  { %v1174_v39 = vpop.f32.mrb[34].mxu0 }
 0xad0   :  { %v4338_v40 = vpack.i.bf16 %v1174_v39, %v1171_v36  ;;  %v4090_v41 = vpop.f32.mrb[35].mxu0  ;;  %v4612_v36 = vld [vmem:[%s5726_s27 + $0x18] sm:$0xff] }
 0xad1   :  { %v1124_v42 = vpop.f32.mrb[28].mxu1 }
 0xad2   :  { %v4083_v44 = vpop.f32.mrb[29].mxu1  ;;  %4339 = vrot.lane.b32.xlu1 %v4338_v40, %s5719_s18 }
 0xad3   :  { %v1127_v47 = vpop.f32.mrb[30].mxu1 }
 0xad4   :  { %v4333_v49 = vpack.i.bf16 %v1127_v47, %v1124_v42  ;;  %v4084_v51 = vpop.f32.mrb[31].mxu1 }
 0xad6   :  { %4334 = vrot.lane.b32.xlu0 %v4333_v49, %s5719_s18  ;;  %s5732_s18 = smov 24  }
 0xb44   :  { %v4340_v6 = vpop.permute.xlu1 %4339 }
 0xb45   :  { %v4342_v10 = vunpack.i.h.bf16 %v4340_v6  ;;  %v4341_v11 = vunpack.i.l.bf16 %v4340_v6 }
 0xb47   :  { %v1238_v15 = vsel %vm1234_vm5, %v1233_v13, %v4342_v10  ;;  %v1237_v16 = vsel %vm1234_vm5, %v1232_v12, %v4341_v11 }
 0xb48   :  { %v4335_v17 = vpop.permute.xlu0 %4334  ;;  %v1240_v20 = vpack.c.bf16 %v1238_v15, %v1237_v16 }
 0xb49   :  { %v4337_v21 = vunpack.i.h.bf16 %v4335_v17  ;;  %v4336_v43 = vunpack.i.l.bf16 %v4335_v17 }
 0xb4b   :  { %v1235_v28 = vsel %vm1234_vm5, %v1230_v24, %v4336_v43  ;;  %v1236_v19 = vsel %vm1234_vm5, %v1231_v22, %v4337_v21 }
 0xb4c   :  { %v1239_v50 = vpack.c.bf16 %v1236_v19, %v1235_v28 }
 0xb4e   :  { %4095 = vmatprep.mubr.msk.bf16.mxu1 %vm110_vm0, %v1239_v50 }
 0xb4f   :  { %4096 = vmatmul.mubr.msk.bf16.vlgmr.msra.gmra.mrb[32].mxu1 %vm110_vm0, %v1240_v20 }
 0xc22   :  { %v4097_v1 = vpop.f32.mrb[32].mxu1 }
 0xc23   :  { %v1313_v3 = vadd.f32 %v4097_v1, %v3754_v48  ;;  %v1304_v4 = vpop.f32.mrb[33].mxu1 }
 0xc24   :  { %v1305_v60 = vadd.f32 %v3754_v48, %v1304_v4  ;;  %v4098_v62 = vpop.f32.mrb[34].mxu1 }
 0xc25   :  { %v5022_v63 = vadd.f32 %v4609_v18, %v1313_v3  ;;  %v1307_v29 = vpop.f32.mrb[35].mxu1  ;;  %v1316_v27 = vadd.f32 %v4098_v62, %v3754_v48  ;;  %v3760_v3 = vld [vmem:[%s5701_s6] ss:$0 sm:$0xff] }
 0xc26   :  { %v5027_v23 = vadd.f32 %v4610_v30, %v1305_v60  ;;  %v1308_v25 = vadd.f32 %v3754_v48, %v1307_v29 }
 0xc27   :  { %v1332_v31 = vsel %vm110_vm0, %v5022_v63, 0.0  ;;  %v5043_v38 = vadd.f32 %v4612_v36, %v1316_v27  ;;  %v1345_v41 = vmul.f32 %v5022_v63, %v5022_v63  ;;  %v3761_v27 = vld [vmem:[%s5701_s6 + $0x1] ss:$0 sm:$0xff] }
 0xc28   :  { %v5034_v33 = vadd.f32 %v4611_v32, %v1308_v25  ;;  %1333 = vadd.xlane.f32.xlu0 %v1332_v31  ;;  %v1343_v35 = vmul.f32 %v5027_v23, %v5027_v23  ;;  %v1326_v39 = vsel %vm110_vm0, %v5027_v23, 0.0 }
 0xc29   :  { %v1335_v42 = vsel %vm110_vm0, %v5043_v38, 0.0  ;;  %v1353_v47 = vsel %vm110_vm0, %v1345_v41, 0.0  ;;  %v1346_v51 = vmul.f32 %v5043_v38, %v5043_v38 }
 0xc2a   :  { %v1329_v34 = vsel %vm110_vm0, %v5034_v33, 0.0  ;;  %v1347_v40 = vsel %vm110_vm0, %v1343_v35, 0.0  ;;  %v1344_v44 = vmul.f32 %v5034_v33, %v5034_v33 }
 0xc2b   :  { %1330 = vadd.xlane.f32.xlu1 %v1329_v34  ;;  %v1356_v52 = vsel %vm110_vm0, %v1346_v51, 0.0  ;;  %v4385_v51 = vld [vmem:[%s5704_s9 + $0x20] sm:$0xff]  }
 0xc2c   :  { %1327 = vadd.xlane.f32.xlu0 %v1326_v39  ;;  %v1350_v49 = vsel %vm110_vm0, %v1344_v44, 0.0  ;;  %v4382_v44 = vld [vmem:[%s5704_s9 + $0x8] sm:$0xff]  }
 0xc2f   :  { %1348 = vadd.xlane.f32.xlu1 %v1347_v40 }
 0xc30   :  { %1336 = vadd.xlane.f32.xlu0 %v1335_v42  ;;  %v4381_v42 = vld [vmem:[%s5704_s9] sm:$0xff]  }
 0xc31   :  { %4107 = vmatprep.subr.bf16.mxu1 %v4381_v42 }
 0xc32   :  { %4108 = vmatpush3.bf16.msra.mxu1 %v4381_v42 }
 0xc33   :  { %1354 = vadd.xlane.f32.xlu1 %v1353_v47  ;;  %4109 = vmatprep.subr.bf16.mxu1 %v4382_v44  ;;  %v4383_v47 = vld [vmem:[%s5704_s9 + $0x10] sm:$0xff]  }
 0xc34   :  { %1351 = vadd.xlane.f32.xlu0 %v1350_v49  ;;  %v4384_v49 = vld [vmem:[%s5704_s9 + $0x18] sm:$0xff]  }
 0xc36   :  { %4110 = vmatpush3.bf16.msra.mxu1 %v4382_v44 }
 0xc37   :  { %4111 = vmatprep.subr.bf16.mxu1 %v4383_v47 }
 0xc38   :  { %1357 = vadd.xlane.f32.xlu0 %v1356_v52  ;;  %v4386_v52 = vld [vmem:[%s5704_s9 + $0x28] sm:$0xff]  }
 0xc3a   :  { %4112 = vmatpush3.bf16.msra.mxu1 %v4383_v47 }
 0xc3b   :  { %4113 = vmatprep.subr.bf16.mxu1 %v4384_v49 }
 0xc3e   :  { %4114 = vmatpush3.bf16.msra.mxu1 %v4384_v49 }
 0xc3f   :  { %4115 = vmatprep.subr.bf16.mxu1 %v4385_v51 }
 0xc42   :  { %4116 = vmatpush3.bf16.msra.mxu1 %v4385_v51 }
 0xc43   :  { %4117 = vmatprep.subr.bf16.mxu1 %v4386_v52 }
 0xc46   :  { %4118 = vmatpush3.bf16.msra.mxu1 %v4386_v52 }
 0xc47   :  { %4119 = vmatprep.subr.bf16.mxu1 %v4387_v53 }
 0xc4a   :  { %4120 = vmatpush3.bf16.msra.mxu1 %v4387_v53 }
 0xc4b   :  { %4121 = vmatprep.subr.bf16.mxu1 %v4388_v54 }
 0xc4e   :  { %4122 = vmatpush3.bf16.msra.mxu1 %v4388_v54 }
 0xc4f   :  { %4153 = vmatprep.subr.bf16.mxu1 %v4637_v8 }
 0xcb5   :  { %v1334_v55 = vpop.xlane.xlu0 %1333 }
 0xcb6   :  { %v1341_v0 = vmul.f32 0.03125, %v1334_v55  ;;  %v3762_v55 = vld [vmem:[%s5703_s8] ss:$0 sm:$0xff] }
 0xcb8   :  { %v1331_v56 = vpop.xlane.xlu1 %1330  ;;  %v1365_v10 = vmul.f32 %v1341_v0, %v1341_v0  ;;  %v1373_v60 = vsub.f32 %v5022_v63, %v1341_v0 }
 0xcb9   :  { %v1328_v57 = vpop.xlane.xlu0 %1327  ;;  %v1340_v6 = vmul.f32 0.03125, %v1331_v56 }
 0xcba   :  { %v1339_v58 = vmul.f32 0.03125, %v1328_v57 }
 0xcbb   :  { %v1364_v14 = vmul.f32 %v1340_v6, %v1340_v6  ;;  %v1372_v62 = vsub.f32 %v5034_v33, %v1340_v6 }
 0xcbc   :  { %v1363_v59 = vmul.f32 %v1339_v58, %v1339_v58  ;;  %v1349_v61 = vpop.xlane.xlu1 %1348  ;;  %v1371_v48 = vsub.f32 %v5027_v23, %v1339_v58 }
 0xcbd   :  { %v1359_v2 = vmul.f32 0.03125, %v1349_v61  ;;  %v1337_v5 = vpop.xlane.xlu0 %1336 }
 0xcbe   :  { %v1342_v15 = vmul.f32 0.03125, %v1337_v5 }
 0xcbf   :  { %v1367_v7 = vsub.f32 %v1359_v2, %v1363_v59 }
 0xcc0   :  { %v1355_v9 = vpop.xlane.xlu1 %1354  ;;  %v1366_v43 = vmul.f32 %v1342_v15, %v1342_v15  ;;  %v1374_v23 = vsub.f32 %v5043_v38, %v1342_v15 }
 0xcc1   :  { %v1375_v11 = vadd.f32 1e-05, %v1367_v7  ;;  %v1361_v12 = vmul.f32 0.03125, %v1355_v9  ;;  %v1352_v13 = vpop.xlane.xlu0 %1351 }
 0xcc2   :  { %v1360_v16 = vmul.f32 0.03125, %v1352_v13 }
 0xcc3   :  { %4473 = vrsqrt.f32 %v1375_v11  ;;  %v1369_v17 = vsub.f32 %v1361_v12, %v1365_v10 }
 0xcc4   :  { %v1368_v45 = vsub.f32 %v1360_v16, %v1364_v14 }
 0xcc5   :  { %v1377_v20 = vadd.f32 1e-05, %v1369_v17  ;;  %v1358_v21 = vpop.xlane.xlu0 %1357 }
 0xcc6   :  { %v1376_v22 = vadd.f32 1e-05, %v1368_v45  ;;  %v1362_v24 = vmul.f32 0.03125, %v1358_v21 }
 0xcc7   :  { %4475 = vrsqrt.f32 %v1377_v20 }
 0xcc8   :  { %4477 = vrsqrt.f32 %v1376_v22  ;;  %v1370_v28 = vsub.f32 %v1362_v24, %v1366_v43 }
 0xcca   :  { %v1378_v19 = vadd.f32 1e-05, %v1370_v28 }
 0xccc   :  { %4479 = vrsqrt.f32 %v1378_v19 }
 0xccd   :  { %v4474_v50 = vpop.eup %4473 }
 0xcce   :  { %v1383_v1 = vmul.f32 %v4474_v50, %v1371_v48 }
 0xcd0   :  { %v1393_v25 = vmul.f32 %v3760_v3, %v1383_v1 }
 0xcd1   :  { %v4476_v4 = vpop.eup %4475 }
 0xcd2   :  { %v4478_v18 = vpop.eup %4477  ;;  %v1385_v29 = vmul.f32 %v4476_v4, %v1373_v60  ;;  %v5075_v35 = vadd.f32 %v3761_v27, %v1393_v25 }
 0xcd3   :  { %v1384_v30 = vmul.f32 %v4478_v18, %v1372_v62 }
 0xcd4   :  { %v1395_v63 = vmul.f32 %v3760_v3, %v1385_v29 }
 0xcd5   :  { %v1394_v31 = vmul.f32 %v3760_v3, %v1384_v30 }
 0xcd6   :  { %v4480_v32 = vpop.eup %4479  ;;  %v5082_v40 = vadd.f32 %v3761_v27, %v1395_v63 }
 0xcd7   :  { %v1386_v34 = vmul.f32 %v4480_v32, %v1374_v23  ;;  %v5077_v36 = vadd.f32 %v3761_v27, %v1394_v31 }
 0xcd9   :  { %v1407_v33 = vpack.c.bf16 %v5077_v36, %v5075_v35  ;;  %v1396_v39 = vmul.f32 %v3760_v3, %v1386_v34 }
 0xcdb   :  { %4103 = vmatprep.mubr.msk.bf16.mxu0 %vm110_vm0, %v1407_v33  ;;  %v5084_v41 = vadd.f32 %v3761_v27, %v1396_v39 }
 0xcdd   :  { %v1408_v38 = vpack.c.bf16 %v5084_v41, %v5082_v40 }
 0xcdf   :  { %4104 = vmatmul.mubr.msk.bf16.vlgmr.msra.gmra.mrb[36].mxu0 %vm110_vm0, %v1408_v38  ;;  %v3767_v38 = vld [vmem:[%s5705_s10] ss:$0 sm:$0xff] }
 0xdb2   :  { %v4105_v56 = vpop.f32.mrb[36].mxu0 }
 0xdb3   :  { %v1481_v57 = vadd.f32 %v4105_v56, %v3762_v55  ;;  %v1472_v58 = vpop.f32.mrb[37].mxu0 }
 0xdb4   :  { %v1473_v59 = vadd.f32 %v3762_v55, %v1472_v58  ;;  %v4106_v61 = vpop.f32.mrb[38].mxu0 }
 0xdb5   :  { %v1489_v0 = vmul.f32 %v1481_v57, %v1481_v57  ;;  %v1484_v2 = vadd.f32 %v4106_v61, %v3762_v55  ;;  %v1475_v5 = vpop.f32.mrb[39].mxu0 }
 0xdb6   :  { %v1487_v6 = vmul.f32 %v1473_v59, %v1473_v59  ;;  %v1476_v7 = vadd.f32 %v3762_v55, %v1475_v5 }
 0xdb7   :  { %v1493_v9 = vmul.f32 %v1489_v0, %v1481_v57  ;;  %v1490_v10 = vmul.f32 %v1484_v2, %v1484_v2 }
 0xdb8   :  { %v1491_v11 = vmul.f32 %v1487_v6, %v1473_v59  ;;  %v1488_v12 = vmul.f32 %v1476_v7, %v1476_v7 }
 0xdb9   :  { %v1497_v13 = vmul.f32 0.044715, %v1493_v9  ;;  %v1494_v14 = vmul.f32 %v1490_v10, %v1484_v2  ;;  %v4389_v10 = vld [vmem:[%s5697_s2 + $0x10] sm:$0xff]  }
 0xdba   :  { %v1495_v15 = vmul.f32 0.044715, %v1491_v11  ;;  %v1492_v16 = vmul.f32 %v1488_v12, %v1476_v7  ;;  %v4390_v11 = vld [vmem:[%s5697_s2 + $0x18] sm:$0xff]   ;;  %4127 = vmatprep.subr.bf16.mxu0 %v4389_v10 }
 0xdbb   :  { %v1501_v17 = vadd.f32 %v1497_v13, %v1481_v57  ;;  %v1498_v45 = vmul.f32 0.044715, %v1494_v14  ;;  %4128 = vmatpush3.bf16.msra.mxu0 %v4389_v10 }
 0xdbc   :  { %v1499_v20 = vadd.f32 %v1495_v15, %v1473_v59  ;;  %v1496_v21 = vmul.f32 0.044715, %v1492_v16  ;;  %4129 = vmatprep.subr.bf16.mxu0 %v4390_v11 }
 0xdbd   :  { %v1505_v43 = vmul.f32 0.7978846, %v1501_v17  ;;  %v1502_v22 = vadd.f32 %v1498_v45, %v1484_v2 }
 0xdbe   :  { %v1503_v24 = vmul.f32 0.7978846, %v1499_v20  ;;  %v1500_v28 = vadd.f32 %v1496_v21, %v1476_v7 }
 0xdbf   :  { %4481 = vtanh.f32 %v1505_v43  ;;  %v1506_v19 = vmul.f32 0.7978846, %v1502_v22  ;;  %4130 = vmatpush3.bf16.msra.mxu0 %v4390_v11 }
 0xdc0   :  { %4483 = vtanh.f32 %v1503_v24  ;;  %v1504_v50 = vmul.f32 0.7978846, %v1500_v28  ;;  %4135 = vmatprep.subr.bf16.mxu0 %v4637_v8 }
 0xdc1   :  { %4485 = vtanh.f32 %v1506_v19 }
 0xdc2   :  { %4487 = vtanh.f32 %v1504_v50 }
 0xdc9   :  { %v4482_v48 = vpop.eup %4481 }
 0xdca   :  { %v4484_v1 = vpop.eup %4483  ;;  %v1513_v3 = vadd.f32 1.0, %v4482_v48 }
 0xdcb   :  { %v4486_v4 = vpop.eup %4485  ;;  %v1511_v60 = vadd.f32 1.0, %v4484_v1 }
 0xdcc   :  { %v4488_v62 = vpop.eup %4487  ;;  %v1517_v18 = vmul.f32 0.5, %v1513_v3  ;;  %v1514_v29 = vadd.f32 1.0, %v4486_v4 }
 0xdcd   :  { %v1512_v30 = vadd.f32 1.0, %v4488_v62  ;;  %v1515_v25 = vmul.f32 0.5, %v1511_v60 }
 0xdce   :  { %v1518_v27 = vmul.f32 0.5, %v1514_v29  ;;  %v1521_v31 = vmul.f32 %v1517_v18, %v1481_v57 }
 0xdcf   :  { %v1516_v23 = vmul.f32 0.5, %v1512_v30  ;;  %v1519_v34 = vmul.f32 %v1515_v25, %v1473_v59 }
 0xdd0   :  { %v1522_v32 = vmul.f32 %v1518_v27, %v1484_v2 }
 0xdd1   :  { %v1520_v63 = vmul.f32 %v1516_v23, %v1476_v7 }
 0xdd2   :  { %v1524_v33 = vpack.c.bf16 %v1522_v32, %v1521_v31 }
 0xdd3   :  { %v1523_v39 = vpack.c.bf16 %v1520_v63, %v1519_v34  ;;  %v3778_v63 = vld [vmem:[%s5701_s6 + $0x2] ss:$0 sm:$0xff] }
 0xdd5   :  { %4123 = vmatprep.mubr.bf16.mxu1 %v1523_v39 }
 0xdd6   :  { %4124 = vmatmul.mubr.bf16.vlgmr.msra.gmra.mrb[36].mxu1 %v1524_v33 }
 0xdd7   :  { %4155 = vmatprep.mubr.msk.bf16.mxu1 %vm4638_vm1, %v4637_v8 }
 0xea9   :  { %v4125_v42 = vpop.f32.mrb[36].mxu1 }
 0xeaa   :  { %v1639_v44 = vadd.f32 %v4125_v42, %v3767_v38  ;;  %v1630_v47 = vpop.f32.mrb[37].mxu1 }
 0xeab   :  { %v1631_v49 = vadd.f32 %v3767_v38, %v1630_v47  ;;  %v4126_v51 = vpop.f32.mrb[38].mxu1 }
 0xeac   :  { %v5123_v52 = vadd.f32 %v1639_v44, %v5082_v40  ;;  %v1642_v53 = vadd.f32 %v4126_v51, %v3767_v38  ;;  %v1633_v54 = vpop.f32.mrb[39].mxu1  ;;  %v3779_v51 = vld [vmem:[%s5701_s6 + $0x3] ss:$0 sm:$0xff] }
 0xead   :  { %v1634_v55 = vadd.f32 %v3767_v38, %v1633_v54  ;;  %v5126_v56 = vadd.f32 %v1631_v49, %v5075_v35 }
 0xeae   :  { %v5129_v57 = vadd.f32 %v1642_v53, %v5084_v41  ;;  %v1659_v58 = vsel %vm110_vm0, %v5123_v52, 0.0  ;;  %v1671_v2 = vmul.f32 %v5123_v52, %v5123_v52 }
 0xeaf   :  { %1660 = vadd.xlane.f32.xlu1 %v1659_v58  ;;  %v5134_v59 = vadd.f32 %v1634_v55, %v5077_v36  ;;  %v1653_v61 = vsel %vm110_vm0, %v5126_v56, 0.0  ;;  %v1669_v35 = vmul.f32 %v5126_v56, %v5126_v56 }
 0xeb0   :  { %v1662_v40 = vsel %vm110_vm0, %v5129_v57, 0.0  ;;  %v1672_v6 = vmul.f32 %v5129_v57, %v5129_v57  ;;  %v1679_v7 = vsel %vm110_vm0, %v1671_v2, 0.0  ;;  %v3785_v2 = vld [vmem:[%s5698_s3 + $0x1] ss:$0 sm:$0xff]  ;;  %s5727_s3 = smov 72  }
 0xeb1   :  { %1663 = vadd.xlane.f32.xlu0 %v1662_v40  ;;  %v1656_v41 = vsel %vm110_vm0, %v5134_v59, 0.0  ;;  %v1670_v0 = vmul.f32 %v5134_v59, %v5134_v59  ;;  %v1673_v36 = vsel %vm110_vm0, %v1669_v35, 0.0 }
 0xeb2   :  { %v1682_v9 = vsel %vm110_vm0, %v1672_v6, 0.0 }
 0xeb3   :  { %1654 = vadd.xlane.f32.xlu1 %v1653_v61  ;;  %v1676_v5 = vsel %vm110_vm0, %v1670_v0, 0.0 }
 0xeb5   :  { %1657 = vadd.xlane.f32.xlu0 %v1656_v41 }
 0xeb7   :  { %1674 = vadd.xlane.f32.xlu1 %v1673_v36 }
 0xeb9   :  { %1677 = vadd.xlane.f32.xlu0 %v1676_v5 }
 0xebb   :  { %1680 = vadd.xlane.f32.xlu1 %v1679_v7 }
 0xebd   :  { %1683 = vadd.xlane.f32.xlu0 %v1682_v9 }
 0xf3c   :  { %v1661_v12 = vpop.xlane.xlu1 %1660 }
 0xf3d   :  { %v1667_v20 = vmul.f32 0.03125, %v1661_v12 }
 0xf3e   :  { %v1664_v13 = vpop.xlane.xlu0 %1663 }
 0xf3f   :  { %v1668_v22 = vmul.f32 0.03125, %v1664_v13  ;;  %v1691_v1 = vmul.f32 %v1667_v20, %v1667_v20  ;;  %v1699_v42 = vsub.f32 %v5123_v52, %v1667_v20 }
 0xf40   :  { %v1655_v14 = vpop.xlane.xlu1 %1654 }
 0xf41   :  { %v1665_v15 = vmul.f32 0.03125, %v1655_v14  ;;  %v1692_v62 = vmul.f32 %v1668_v22, %v1668_v22  ;;  %v1700_v53 = vsub.f32 %v5129_v57, %v1668_v22 }
 0xf42   :  { %v1658_v16 = vpop.xlane.xlu0 %1657 }
 0xf43   :  { %v1666_v17 = vmul.f32 0.03125, %v1658_v16  ;;  %v1689_v21 = vmul.f32 %v1665_v15, %v1665_v15  ;;  %v1697_v32 = vsub.f32 %v5126_v56, %v1665_v15 }
 0xf44   :  { %v1675_v45 = vpop.xlane.xlu1 %1674 }
 0xf45   :  { %v1685_v43 = vmul.f32 0.03125, %v1675_v45  ;;  %v1690_v28 = vmul.f32 %v1666_v17, %v1666_v17  ;;  %v1698_v33 = vsub.f32 %v5134_v59, %v1666_v17 }
 0xf46   :  { %v1678_v24 = vpop.xlane.xlu0 %1677 }
 0xf47   :  { %v1693_v19 = vsub.f32 %v1685_v43, %v1689_v21  ;;  %v1686_v50 = vmul.f32 0.03125, %v1678_v24 }
 0xf48   :  { %v1681_v48 = vpop.xlane.xlu1 %1680 }
 0xf49   :  { %v1701_v3 = vadd.f32 1e-05, %v1693_v19  ;;  %v1694_v4 = vsub.f32 %v1686_v50, %v1690_v28  ;;  %v1687_v60 = vmul.f32 0.03125, %v1681_v48 }
 0xf4a   :  { %v1684_v18 = vpop.xlane.xlu0 %1683 }
 0xf4b   :  { %4489 = vrsqrt.f32 %v1701_v3  ;;  %v1702_v29 = vadd.f32 1e-05, %v1694_v4  ;;  %v1695_v30 = vsub.f32 %v1687_v60, %v1691_v1  ;;  %v1688_v25 = vmul.f32 0.03125, %v1684_v18 }
 0xf4d   :  { %4491 = vrsqrt.f32 %v1702_v29  ;;  %v1703_v27 = vadd.f32 1e-05, %v1695_v30  ;;  %v1696_v23 = vsub.f32 %v1688_v25, %v1692_v62 }
 0xf4f   :  { %4493 = vrsqrt.f32 %v1703_v27  ;;  %v1704_v31 = vadd.f32 1e-05, %v1696_v23 }
 0xf51   :  { %4495 = vrsqrt.f32 %v1704_v31 }
 0xf55   :  { %v4490_v34 = vpop.eup %4489 }
 0xf56   :  { %v1709_v39 = vmul.f32 %v4490_v34, %v1697_v32 }
 0xf57   :  { %v4492_v38 = vpop.eup %4491 }
 0xf58   :  { %v1710_v44 = vmul.f32 %v4492_v38, %v1698_v33  ;;  %v1719_v47 = vmul.f32 %v3778_v63, %v1709_v39 }
 0xf59   :  { %v4494_v49 = vpop.eup %4493 }
 0xf5a   :  { %v1711_v54 = vmul.f32 %v4494_v49, %v1699_v42  ;;  %v1720_v55 = vmul.f32 %v3778_v63, %v1710_v44  ;;  %v5171_v40 = vadd.f32 %v3779_v51, %v1719_v47 }
 0xf5b   :  { %v4496_v56 = vpop.eup %4495 }
 0xf5c   :  { %v1712_v58 = vmul.f32 %v4496_v56, %v1700_v53  ;;  %v5173_v59 = vadd.f32 %v3779_v51, %v1720_v55  ;;  %v1721_v61 = vmul.f32 %v3778_v63, %v1711_v54 }
 0xf5e   :  { %v1733_v52 = vpack.c.bf16 %v5173_v59, %v5171_v40  ;;  %v1722_v35 = vmul.f32 %v3778_v63, %v1712_v58  ;;  %v5178_v41 = vadd.f32 %v3779_v51, %v1721_v61 }
 0xf60   :  { %4131 = vmatprep.mubr.msk.bf16.mxu0 %vm110_vm0, %v1733_v52  ;;  %v5180_v0 = vadd.f32 %v3779_v51, %v1722_v35 }
 0xf62   :  { %v1734_v57 = vpack.c.bf16 %v5180_v0, %v5178_v41 }
 0xf64   :  { %4132 = vmatmul.mubr.msk.bf16.vlgmr.msra.gmra.mrb[40].mxu0 %vm110_vm0, %v1734_v57 }
 0xf65   :  { %4137 = vmatprep.mubr.msk.bf16.mxu0 %vm4638_vm1, %v4637_v8 }
0x1037   :  { %v4133_v36 = vpop.f32.mrb[40].mxu0 }
0x1038   :  { %v1800_v5 = vpop.f32.mrb[41].mxu0  ;;  %v1809_v7 = vadd.f32 %v4133_v36, %v3785_v2 }
0x1039   :  { %v4134_v6 = vpop.f32.mrb[42].mxu0  ;;  %v1801_v11 = vadd.f32 %v3785_v2, %v1800_v5 }
0x103a   :  { %v1812_v9 = vadd.f32 %v4134_v6, %v3785_v2  ;;  %v1803_v10 = vpop.f32.mrb[43].mxu0 }
0x103b   :  { %v1804_v12 = vadd.f32 %v3785_v2, %v1803_v10 }
0x103c   :  { %v5190_v13 = vpack.c.bf16 %v1812_v9, %v1809_v7 }
0x103d   :  { %v5192_v14 = vpack.c.bf16 %v1804_v12, %v1801_v11 }
0x103e   :  { %1868 = vrot.lane.b32.xlu0 %v5190_v13, %s4639_s21 }
0x103f   :  { %1818 = vrot.lane.b32.xlu1 %v5192_v14, %s4639_s21  ;;  %s5728_s21 = smov 104  }
0x10b0   :  { %v1869_v17 = vpop.permute.xlu0 %1868 }
0x10b1   :  { %v1819_v15 = vpop.permute.xlu1 %1818  ;;  %v1874_v45 = vsel %vm171_vm2, %v1869_v17, 0 }
0x10b2   :  { %v1824_v16 = vsel %vm171_vm2, %v1819_v15, 0 }
0x10b3   :  { %4136 = vmatpush3.bf16.xpose.msra.mxu0 %v1824_v16 }
0x10b4   :  { %4141 = vmatprep.subr.bf16.mxu0 %v4637_v8 }
0x10ba   :  { %4138 = vmatmul.mubr.msk.bf16.vlgmr.msra.gmra.mrb[44].mxu0 %vm171_vm2, %v5192_v14 }
0x10bb   :  { %4142 = vmatpush3.bf16.xpose.msra.mxu0 %v1874_v45  ;;  %4143 = vmatprep.mubr.msk.bf16.mxu0 %vm4638_vm1, %v4637_v8 }
0x10bc   :  { %4147 = vmatprep.subr.bf16.mxu0 %v4637_v8 }
0x10c2   :  { %4144 = vmatmul.mubr.msk.bf16.vlgmr.msra.gmra.mrb[48].mxu0 %vm171_vm2, %v5190_v13 }
0x10c3   :  { %4149 = vmatprep.mubr.msk.bf16.mxu0 %vm4638_vm1, %v4637_v8 }
0x118d   :  { %v1860_v20 = vpop.f32.mrb[44].mxu0 }
0x118e   :  { %v1917_v21 = vmul.f32 0.35355338, %v1860_v20  ;;  %v4139_v43 = vpop.f32.mrb[45].mxu0 }
0x118f   :  { %v1863_v22 = vpop.f32.mrb[46].mxu0 }
0x1190   :  { %v1918_v24 = vmul.f32 0.35355338, %v1863_v22  ;;  %v4140_v28 = vpop.f32.mrb[47].mxu0  ;;  %v1921_v19 = vadd.f32 %v1917_v21, %v4797_v37 }
0x1192   :  { %v1925_v50 = vsel %vm287_vm4, %v1921_v19, -inf  ;;  %v1922_v48 = vadd.f32 %v1918_v24, %v4797_v37 }
0x1193   :  { %1926 = vmax.xlane.f32.xlu1 %v1925_v50 }
0x1194   :  { %v1928_v1 = vsel %vm287_vm4, %v1922_v48, -inf }
0x1195   :  { %1929 = vmax.xlane.f32.xlu0 %v1928_v1  ;;  %v1910_v3 = vpop.f32.mrb[48].mxu0 }
0x1196   :  { %v1919_v4 = vmul.f32 0.35355338, %v1910_v3  ;;  %v4145_v60 = vpop.f32.mrb[49].mxu0 }
0x1197   :  { %v1913_v62 = vpop.f32.mrb[50].mxu0 }
0x1198   :  { %v1920_v18 = vmul.f32 0.35355338, %v1913_v62  ;;  %v4146_v29 = vpop.f32.mrb[51].mxu0  ;;  %v1923_v30 = vadd.f32 %v1919_v4, %v4800_v46 }
0x119a   :  { %v1931_v25 = vsel %vm287_vm4, %v1923_v30, -inf  ;;  %v1924_v27 = vadd.f32 %v1920_v18, %v4800_v46 }
0x119b   :  { %1932 = vmax.xlane.f32.xlu1 %v1931_v25 }
0x119c   :  { %v1934_v23 = vsel %vm287_vm4, %v1924_v27, -inf }
0x119d   :  { %1935 = vmax.xlane.f32.xlu0 %v1934_v23 }
0x11ac   :  { %1971 = vrot.lane.b32.xlu1 %v5192_v14, %s4642_s1 }
0x1220   :  { %v1927_v31 = vpop.xlane.xlu1 %1926 }
0x1221   :  { %v1937_v32 = vsub.f32 %v1921_v19, %v1927_v31 }
0x1222   :  { %v1930_v34 = vpop.xlane.xlu0 %1929 }
0x1223   :  { %v1941_v63 = vmul.f32 1.442695, %v1937_v32  ;;  %v1938_v33 = vsub.f32 %v1922_v48, %v1930_v34 }
0x1225   :  { %4497 = vpow2.f32 %v1941_v63  ;;  %v1943_v39 = vmul.f32 1.442695, %v1938_v33 }
0x1227   :  { %4499 = vpow2.f32 %v1943_v39 }
0x1228   :  { %v1933_v38 = vpop.xlane.xlu1 %1932 }
0x1229   :  { %v1939_v42 = vsub.f32 %v1923_v30, %v1933_v38 }
0x122a   :  { %v1936_v44 = vpop.xlane.xlu0 %1935 }
0x122b   :  { %v1945_v47 = vmul.f32 1.442695, %v1939_v42  ;;  %v1940_v49 = vsub.f32 %v1924_v27, %v1936_v44 }
0x122c   :  { %v1972_v51 = vpop.permute.xlu1 %1971 }
0x122d   :  { %4501 = vpow2.f32 %v1945_v47  ;;  %v1947_v53 = vmul.f32 1.442695, %v1940_v49  ;;  %4148 = vmatpush3.bf16.msra.mxu0 %v1972_v51 }
0x122e   :  { %4159 = vmatprep.subr.bf16.mxu0 %v4637_v8 }
0x122f   :  { %v4498_v54 = vpop.eup %4497  ;;  %4503 = vpow2.f32 %v1947_v53 }
0x1230   :  { %v1949_v55 = vsel %vm287_vm4, %v4498_v54, 0.0 }
0x1231   :  { %v4500_v56 = vpop.eup %4499  ;;  %1950 = vadd.xlane.f32.xlu1 %v1949_v55 }
0x1232   :  { %v1952_v58 = vsel %vm287_vm4, %v4500_v56, 0.0 }
0x1233   :  { %1953 = vadd.xlane.f32.xlu0 %v1952_v58 }
0x1237   :  { %v4502_v61 = vpop.eup %4501 }
0x1238   :  { %v1955_v52 = vsel %vm287_vm4, %v4502_v61, 0.0 }
0x1239   :  { %v4504_v35 = vpop.eup %4503  ;;  %1956 = vadd.xlane.f32.xlu1 %v1955_v52 }
0x123a   :  { %v1958_v57 = vsel %vm287_vm4, %v4504_v35, 0.0 }
0x123b   :  { %1959 = vadd.xlane.f32.xlu0 %v1958_v57 }
0x124a   :  { %2067 = vrot.lane.b32.xlu1 %v5192_v14, %s4643_s24 }
0x124e   :  { %2118 = vrot.lane.b32.xlu1 %v5190_v13, %s4643_s24  ;;  %s5730_s24 = smov 8  }
0x1251   :  { %2018 = vrot.lane.b32.xlu0 %v5190_v13, %s4642_s1  ;;  %s5729_s1 = smov 40  }
0x1252   :  { %2116 = vrot.lane.b32.xlu1 %v5190_v13, %s4644_s25 }
0x1255   :  { %2065 = vrot.lane.b32.xlu0 %v5192_v14, %s4644_s25  ;;  %s5731_s25 = smov 16  }
0x12be   :  { %v1951_v36 = vpop.xlane.xlu1 %1950 }
0x12bf   :  { %4505 = vrcp.f32 %v1951_v36 }
0x12c0   :  { %v1954_v2 = vpop.xlane.xlu0 %1953 }
0x12c1   :  { %4507 = vrcp.f32 %v1954_v2 }
0x12c6   :  { %v1957_v5 = vpop.xlane.xlu1 %1956 }
0x12c7   :  { %4509 = vrcp.f32 %v1957_v5 }
0x12c8   :  { %v1960_v6 = vpop.xlane.xlu0 %1959 }
0x12c9   :  { %v4506_v7 = vpop.eup %4505  ;;  %4511 = vrcp.f32 %v1960_v6 }
0x12ca   :  { %v1962_v10 = vmul.f32 %v4506_v7, %v4498_v54  ;;  %v2068_v15 = vpop.permute.xlu1 %2067 }
0x12cb   :  { %v4508_v9 = vpop.eup %4507  ;;  %v2073_v17 = vsel %vm171_vm2, %v2068_v15, 0 }
0x12cc   :  { %v1964_v11 = vmul.f32 %v4508_v9, %v4500_v56  ;;  %v2019_v12 = vpop.permute.xlu0 %2018 }
0x12cd   :  { %4154 = vmatpush3.bf16.msra.mxu1 %v2019_v12 }
0x12ce   :  { %v1969_v16 = vpack.c.bf16 %v1964_v11, %v1962_v10  ;;  %4165 = vmatprep.subr.bf16.mxu1 %v4637_v8  ;;  %v2119_v22 = vpop.permute.xlu1 %2118 }
0x12cf   :  { %v2124_v19 = vsel %vm171_vm2, %v2119_v22, 0 }
0x12d0   :  { %4150 = vmatmul.mubr.msk.bf16.vlgmr.msra.gmra.mrb[52].mxu0 %vm287_vm4, %v1969_v16  ;;  %v2066_v28 = vpop.permute.xlu0 %2065 }
0x12d1   :  { %v4510_v45 = vpop.eup %4509  ;;  %4160 = vmatpush3.bf16.xpose.msra.mxu0 %v2073_v17  ;;  %4161 = vmatprep.mubr.msk.bf16.mxu0 %vm4638_vm1, %v4637_v8 }
0x12d2   :  { %4171 = vmatprep.subr.bf16.mxu0 %v4637_v8  ;;  %v1966_v21 = vmul.f32 %v4510_v45, %v4502_v61  ;;  %v2117_v50 = vpop.permute.xlu1 %2116 }
0x12d3   :  { %v4512_v20 = vpop.eup %4511 }
0x12d4   :  { %v1968_v43 = vmul.f32 %v4512_v20, %v4504_v35 }
0x12d6   :  { %v1970_v24 = vpack.c.bf16 %v1968_v43, %v1966_v21 }
0x12d8   :  { %4156 = vmatmul.mubr.msk.bf16.vlgmr.msra.gmra.mrb[40].mxu1 %vm287_vm4, %v1970_v24  ;;  %4162 = vmatmul.mubr.msk.bf16.vlgmr.msra.gmra.mrb[56].mxu0 %vm171_vm2, %v2066_v28 }
0x12d9   :  { %4166 = vmatpush3.bf16.xpose.msra.mxu1 %v2124_v19  ;;  %4167 = vmatprep.mubr.msk.bf16.mxu1 %vm4638_vm1, %v4637_v8 }
0x12da   :  { %4177 = vmatprep.subr.bf16.mxu1 %v4637_v8  ;;  %4173 = vmatprep.mubr.msk.bf16.mxu0 %vm4638_vm1, %v4637_v8 }
0x12e0   :  { %4168 = vmatmul.mubr.msk.bf16.vlgmr.msra.gmra.mrb[44].mxu1 %vm171_vm2, %v2117_v50 }
0x12e1   :  { %4179 = vmatprep.mubr.msk.bf16.mxu1 %vm4638_vm1, %v4637_v8 }
0x13a3   :  { %v5252_v48 = vpop.f32.mrb[52].mxu0 }
0x13a4   :  { %v4151_v1 = vpop.f32.mrb[53].mxu0 }
0x13a5   :  { %v5254_v3 = vpop.f32.mrb[54].mxu0 }
0x13a6   :  { %v4152_v4 = vpop.f32.mrb[55].mxu0 }
0x13ab   :  { %v5256_v60 = vpop.f32.mrb[40].mxu1  ;;  %v2109_v62 = vpop.f32.mrb[56].mxu0 }
0x13ac   :  { %v2167_v18 = vmul.f32 0.35355338, %v2109_v62  ;;  %v4157_v29 = vpop.f32.mrb[41].mxu1  ;;  %v4163_v30 = vpop.f32.mrb[57].mxu0 }
0x13ad   :  { %v5258_v25 = vpop.f32.mrb[42].mxu1  ;;  %v2112_v27 = vpop.f32.mrb[58].mxu0 }
0x13ae   :  { %v2168_v23 = vmul.f32 0.35355338, %v2112_v27  ;;  %v4158_v31 = vpop.f32.mrb[43].mxu1  ;;  %v4164_v32 = vpop.f32.mrb[59].mxu0  ;;  %v2171_v34 = vadd.f32 %v2167_v18, %v4797_v37 }
0x13b0   :  { %v2172_v63 = vadd.f32 %v2168_v23, %v4797_v37  ;;  %v2175_v33 = vsel %vm287_vm4, %v2171_v34, -inf }
0x13b1   :  { %2176 = vmax.xlane.f32.xlu0 %v2175_v33 }
0x13b2   :  { %v2178_v39 = vsel %vm287_vm4, %v2172_v63, -inf }
0x13b3   :  { %v2160_v38 = vpop.f32.mrb[44].mxu1  ;;  %2179 = vmax.xlane.f32.xlu1 %v2178_v39 }
0x13b4   :  { %v2169_v42 = vmul.f32 0.35355338, %v2160_v38  ;;  %v4169_v44 = vpop.f32.mrb[45].mxu1 }
0x13b5   :  { %v2163_v47 = vpop.f32.mrb[46].mxu1 }
0x13b6   :  { %v2170_v49 = vmul.f32 0.35355338, %v2163_v47  ;;  %v4170_v51 = vpop.f32.mrb[47].mxu1  ;;  %v2173_v53 = vadd.f32 %v2169_v42, %v4800_v46 }
0x13b8   :  { %v2181_v54 = vsel %vm287_vm4, %v2173_v53, -inf  ;;  %v2174_v55 = vadd.f32 %v2170_v49, %v4800_v46 }
0x13b9   :  { %2182 = vmax.xlane.f32.xlu0 %v2181_v54 }
0x13ba   :  { %v2184_v56 = vsel %vm287_vm4, %v2174_v55, -inf }
0x13bd   :  { %2185 = vmax.xlane.f32.xlu0 %v2184_v56 }
0x13c4   :  { %2221 = vrot.lane.b32.xlu1 %v5192_v14, %s4645_s26 }
0x143e   :  { %v2177_v58 = vpop.xlane.xlu0 %2176 }
0x143f   :  { %v2187_v61 = vsub.f32 %v2171_v34, %v2177_v58 }
0x1440   :  { %v2180_v52 = vpop.xlane.xlu1 %2179 }
0x1441   :  { %v2191_v35 = vmul.f32 1.442695, %v2187_v61  ;;  %v2188_v57 = vsub.f32 %v2172_v63, %v2180_v52 }
0x1443   :  { %4513 = vpow2.f32 %v2191_v35  ;;  %v2193_v36 = vmul.f32 1.442695, %v2188_v57 }
0x1444   :  { %v2222_v2 = vpop.permute.xlu1 %2221 }
0x1445   :  { %4515 = vpow2.f32 %v2193_v36  ;;  %4172 = vmatpush3.bf16.msra.mxu0 %v2222_v2 }
0x1446   :  { %v2183_v5 = vpop.xlane.xlu0 %2182  ;;  %4183 = vmatprep.subr.bf16.mxu0 %v4637_v8 }
0x1447   :  { %v2189_v6 = vsub.f32 %v2173_v53, %v2183_v5 }
0x1449   :  { %v2195_v7 = vmul.f32 1.442695, %v2189_v6 }
0x144a   :  { %v2186_v9 = vpop.xlane.xlu0 %2185 }
0x144b   :  { %4517 = vpow2.f32 %v2195_v7  ;;  %v2190_v10 = vsub.f32 %v2174_v55, %v2186_v9 }
0x144d   :  { %v4514_v11 = vpop.eup %4513  ;;  %v2197_v12 = vmul.f32 1.442695, %v2190_v10 }
0x144e   :  { %v2199_v15 = vsel %vm287_vm4, %v4514_v11, 0.0 }
0x144f   :  { %v4516_v16 = vpop.eup %4515  ;;  %4519 = vpow2.f32 %v2197_v12  ;;  %2200 = vadd.xlane.f32.xlu1 %v2199_v15 }
0x1450   :  { %v2202_v17 = vsel %vm287_vm4, %v4516_v16, 0.0 }
0x1451   :  { %2203 = vadd.xlane.f32.xlu0 %v2202_v17 }
0x1455   :  { %v4518_v45 = vpop.eup %4517 }
0x1456   :  { %v2205_v20 = vsel %vm287_vm4, %v4518_v45, 0.0 }
0x1457   :  { %2206 = vadd.xlane.f32.xlu1 %v2205_v20 }
0x1459   :  { %v4520_v21 = vpop.eup %4519 }
0x145a   :  { %v2208_v43 = vsel %vm287_vm4, %v4520_v21, 0.0 }
0x145b   :  { %2209 = vadd.xlane.f32.xlu0 %v2208_v43 }
0x1468   :  { %2317 = vrot.lane.b32.xlu1 %v5192_v14, %s4646_s28 }
0x146c   :  { %2368 = vrot.lane.b32.xlu1 %v5190_v13, %s4646_s28 }
0x1470   :  { %2366 = vrot.lane.b32.xlu1 %v5190_v13, %s4647_s29 }
0x1471   :  { %2268 = vrot.lane.b32.xlu0 %v5190_v13, %s4645_s26 }
0x1475   :  { %2315 = vrot.lane.b32.xlu0 %v5192_v14, %s4647_s29 }
0x14dc   :  { %v2201_v22 = vpop.xlane.xlu1 %2200 }
0x14dd   :  { %4521 = vrcp.f32 %v2201_v22 }
0x14de   :  { %v2204_v24 = vpop.xlane.xlu0 %2203 }
0x14df   :  { %4523 = vrcp.f32 %v2204_v24 }
0x14e4   :  { %v2207_v28 = vpop.xlane.xlu1 %2206 }
0x14e5   :  { %4525 = vrcp.f32 %v2207_v28 }
0x14e7   :  { %v4522_v19 = vpop.eup %4521 }
0x14e8   :  { %v2210_v50 = vpop.xlane.xlu0 %2209  ;;  %v2212_v4 = vmul.f32 %v4522_v19, %v4514_v11  ;;  %v2318_v18 = vpop.permute.xlu1 %2317 }
0x14e9   :  { %v4524_v1 = vpop.eup %4523  ;;  %4527 = vrcp.f32 %v2210_v50  ;;  %v2323_v27 = vsel %vm171_vm2, %v2318_v18, 0 }
0x14ea   :  { %v2214_v62 = vmul.f32 %v4524_v1, %v4516_v16 }
0x14ec   :  { %v2269_v29 = vpop.permute.xlu0 %2268  ;;  %v2219_v30 = vpack.c.bf16 %v2214_v62, %v2212_v4  ;;  %v2369_v63 = vpop.permute.xlu1 %2368 }
0x14ed   :  { %4178 = vmatpush3.bf16.msra.mxu1 %v2269_v29  ;;  %v2374_v38 = vsel %vm171_vm2, %v2369_v63, 0 }
0x14ee   :  { %4174 = vmatmul.mubr.msk.bf16.vlgmr.msra.gmra.mrb[60].mxu0 %vm287_vm4, %v2219_v30  ;;  %4189 = vmatprep.subr.bf16.mxu1 %v4637_v8 }
0x14ef   :  { %4184 = vmatpush3.bf16.xpose.msra.mxu0 %v2323_v27  ;;  %4185 = vmatprep.mubr.msk.bf16.mxu0 %vm4638_vm1, %v4637_v8  ;;  %v4526_v23 = vpop.eup %4525 }
0x14f0   :  { %4195 = vmatprep.subr.bf16.mxu0 %v4637_v8  ;;  %v2216_v32 = vmul.f32 %v4526_v23, %v4518_v45  ;;  %v2316_v33 = vpop.permute.xlu0 %2315  ;;  %v2367_v42 = vpop.permute.xlu1 %2366 }
0x14f3   :  { %v4528_v31 = vpop.eup %4527 }
0x14f4   :  { %v2218_v34 = vmul.f32 %v4528_v31, %v4520_v21 }
0x14f6   :  { %4186 = vmatmul.mubr.msk.bf16.vlgmr.msra.gmra.mrb[64].mxu0 %vm171_vm2, %v2316_v33  ;;  %v2220_v39 = vpack.c.bf16 %v2218_v34, %v2216_v32 }
0x14f7   :  { %4197 = vmatprep.mubr.msk.bf16.mxu0 %vm4638_vm1, %v4637_v8 }
0x14f8   :  { %4180 = vmatmul.mubr.msk.bf16.vlgmr.msra.gmra.mrb[48].mxu1 %vm287_vm4, %v2220_v39 }
0x14f9   :  { %4190 = vmatpush3.bf16.xpose.msra.mxu1 %v2374_v38  ;;  %4191 = vmatprep.mubr.msk.bf16.mxu1 %vm4638_vm1, %v4637_v8 }
0x14fa   :  { %4201 = vmatprep.subr.bf16.mxu1 %v4637_v8 }
0x1500   :  { %4192 = vmatmul.mubr.msk.bf16.vlgmr.msra.gmra.mrb[52].mxu1 %vm171_vm2, %v2367_v42 }
0x1501   :  { %4203 = vmatprep.mubr.msk.bf16.mxu1 %vm4638_vm1, %v4637_v8 }
0x15c1   :  { %v5302_v44 = vpop.f32.mrb[60].mxu0 }
0x15c2   :  { %v4175_v47 = vpop.f32.mrb[61].mxu0 }
0x15c3   :  { %v5304_v49 = vpop.f32.mrb[62].mxu0 }
0x15c4   :  { %v4343_v51 = vpack.i.bf16 %v5304_v49, %v5302_v44  ;;  %v4176_v53 = vpop.f32.mrb[63].mxu0 }
0x15c9   :  { %v2359_v54 = vpop.f32.mrb[64].mxu0 }
0x15ca   :  { %v2417_v55 = vmul.f32 0.35355338, %v2359_v54  ;;  %v4187_v56 = vpop.f32.mrb[65].mxu0 }
0x15cb   :  { %v5308_v58 = vpop.f32.mrb[48].mxu1  ;;  %v2362_v61 = vpop.f32.mrb[66].mxu0 }
0x15cc   :  { %v2421_v52 = vadd.f32 %v2417_v55, %v4797_v37  ;;  %v2418_v35 = vmul.f32 0.35355338, %v2362_v61  ;;  %v4181_v57 = vpop.f32.mrb[49].mxu1  ;;  %v4188_v36 = vpop.f32.mrb[67].mxu0 }
0x15cd   :  { %v5311_v2 = vpop.f32.mrb[50].mxu1 }
0x15ce   :  { %v2422_v5 = vadd.f32 %v2418_v35, %v4797_v37  ;;  %v4348_v6 = vpack.i.bf16 %v5311_v2, %v5308_v58  ;;  %v4182_v7 = vpop.f32.mrb[51].mxu1  ;;  %v2425_v9 = vsel %vm287_vm4, %v2421_v52, -inf }
0x15cf   :  { %2426 = vmax.xlane.f32.xlu0 %v2425_v9 }
0x15d0   :  { %v2428_v10 = vsel %vm287_vm4, %v2422_v5, -inf }
0x15d1   :  { %2429 = vmax.xlane.f32.xlu1 %v2428_v10 }
0x15d3   :  { %v2410_v11 = vpop.f32.mrb[52].mxu1 }
0x15d4   :  { %v2419_v12 = vmul.f32 0.35355338, %v2410_v11  ;;  %v4193_v15 = vpop.f32.mrb[53].mxu1 }
0x15d5   :  { %v2413_v16 = vpop.f32.mrb[54].mxu1 }
0x15d6   :  { %v2423_v17 = vadd.f32 %v2419_v12, %v4800_v46  ;;  %v2420_v45 = vmul.f32 0.35355338, %v2413_v16  ;;  %v4194_v20 = vpop.f32.mrb[55].mxu1 }
0x15d8   :  { %v2424_v21 = vadd.f32 %v2420_v45, %v4800_v46  ;;  %v2431_v43 = vsel %vm287_vm4, %v2423_v17, -inf }
0x15d9   :  { %2432 = vmax.xlane.f32.xlu0 %v2431_v43 }
0x15da   :  { %v2434_v22 = vsel %vm287_vm4, %v2424_v21, -inf }
0x15dd   :  { %2435 = vmax.xlane.f32.xlu0 %v2434_v22 }
0x15e2   :  { %2471 = vrot.lane.b32.xlu1 %v5192_v14, %s4648_s30 }
0x165c   :  { %v2427_v24 = vpop.xlane.xlu0 %2426 }
0x165d   :  { %v2437_v28 = vsub.f32 %v2421_v52, %v2427_v24 }
0x165e   :  { %v2430_v19 = vpop.xlane.xlu1 %2429 }
0x165f   :  { %v2441_v50 = vmul.f32 1.442695, %v2437_v28  ;;  %v2438_v1 = vsub.f32 %v2422_v5, %v2430_v19 }
0x1661   :  { %4529 = vpow2.f32 %v2441_v50  ;;  %v2443_v4 = vmul.f32 1.442695, %v2438_v1 }
0x1662   :  { %v2472_v62 = vpop.permute.xlu1 %2471 }
0x1663   :  { %4531 = vpow2.f32 %v2443_v4  ;;  %4196 = vmatpush3.bf16.msra.mxu0 %v2472_v62 }
0x1664   :  { %4207 = vmatprep.subr.bf16.mxu0 %v4637_v8 }
0x1666   :  { %v2433_v18 = vpop.xlane.xlu0 %2432 }
0x1667   :  { %v2439_v29 = vsub.f32 %v2423_v17, %v2433_v18 }
0x1669   :  { %v2445_v30 = vmul.f32 1.442695, %v2439_v29 }
0x166a   :  { %v2436_v27 = vpop.xlane.xlu0 %2435 }
0x166b   :  { %v4530_v23 = vpop.eup %4529  ;;  %4533 = vpow2.f32 %v2445_v30  ;;  %v2440_v31 = vsub.f32 %v2424_v21, %v2436_v27 }
0x166c   :  { %v2449_v32 = vsel %vm287_vm4, %v4530_v23, 0.0 }
0x166d   :  { %v4532_v34 = vpop.eup %4531  ;;  %v2447_v63 = vmul.f32 1.442695, %v2440_v31  ;;  %2450 = vadd.xlane.f32.xlu1 %v2449_v32 }
0x166e   :  { %v2452_v33 = vsel %vm287_vm4, %v4532_v34, 0.0 }
0x166f   :  { %4535 = vpow2.f32 %v2447_v63  ;;  %2453 = vadd.xlane.f32.xlu0 %v2452_v33 }
0x1675   :  { %v4534_v39 = vpop.eup %4533 }
0x1676   :  { %v2455_v38 = vsel %vm287_vm4, %v4534_v39, 0.0 }
0x1677   :  { %2456 = vadd.xlane.f32.xlu1 %v2455_v38 }
0x1679   :  { %v4536_v42 = vpop.eup %4535 }
0x167a   :  { %v2458_v47 = vsel %vm287_vm4, %v4536_v42, 0.0 }
0x167b   :  { %2459 = vadd.xlane.f32.xlu0 %v2458_v47 }
0x1688   :  { %2567 = vrot.lane.b32.xlu1 %v5192_v14, %s5727_s3 }
0x168c   :  { %2618 = vrot.lane.b32.xlu1 %v5190_v13, %s5727_s3 }
0x1690   :  { %2616 = vrot.lane.b32.xlu1 %v5190_v13, %s5728_s21 }
0x1691   :  { %2518 = vrot.lane.b32.xlu0 %v5190_v13, %s4648_s30 }
0x1695   :  { %2565 = vrot.lane.b32.xlu0 %v5192_v14, %s5728_s21 }
0x16fa   :  { %v2451_v53 = vpop.xlane.xlu1 %2450 }
0x16fb   :  { %4537 = vrcp.f32 %v2451_v53 }
0x16fc   :  { %v2454_v54 = vpop.xlane.xlu0 %2453 }
0x16fd   :  { %4539 = vrcp.f32 %v2454_v54 }
0x1704   :  { %v2457_v55 = vpop.xlane.xlu1 %2456 }
0x1705   :  { %v4538_v56 = vpop.eup %4537  ;;  %4541 = vrcp.f32 %v2457_v55 }
0x1706   :  { %v2462_v52 = vmul.f32 %v4538_v56, %v4530_v23 }
0x1707   :  { %v4540_v61 = vpop.eup %4539 }
0x1708   :  { %v2464_v35 = vmul.f32 %v4540_v61, %v4532_v34  ;;  %v2460_v57 = vpop.xlane.xlu0 %2459  ;;  %v2568_v36 = vpop.permute.xlu1 %2567 }
0x1709   :  { %4543 = vrcp.f32 %v2460_v57  ;;  %v2573_v7 = vsel %vm171_vm2, %v2568_v36, 0 }
0x170a   :  { %v2469_v5 = vpack.c.bf16 %v2464_v35, %v2462_v52 }
0x170c   :  { %v2519_v9 = vpop.permute.xlu0 %2518  ;;  %4198 = vmatmul.mubr.msk.bf16.vlgmr.msra.gmra.mrb[68].mxu0 %vm287_vm4, %v2469_v5  ;;  %v2619_v17 = vpop.permute.xlu1 %2618 }
0x170d   :  { %4208 = vmatpush3.bf16.xpose.msra.mxu0 %v2573_v7  ;;  %4202 = vmatpush3.bf16.msra.mxu1 %v2519_v9  ;;  %v2624_v20 = vsel %vm171_vm2, %v2619_v17, 0 }
0x170e   :  { %4209 = vmatprep.mubr.msk.bf16.mxu0 %vm4638_vm1, %v4637_v8  ;;  %4213 = vmatprep.subr.bf16.mxu1 %v4637_v8 }
0x170f   :  { %4219 = vmatprep.subr.bf16.mxu0 %v4637_v8  ;;  %v4542_v10 = vpop.eup %4541 }
0x1710   :  { %v2566_v12 = vpop.permute.xlu0 %2565  ;;  %v2466_v15 = vmul.f32 %v4542_v10, %v4534_v39  ;;  %v2617_v21 = vpop.permute.xlu1 %2616 }
0x1713   :  { %v4544_v11 = vpop.eup %4543 }
0x1714   :  { %v2468_v16 = vmul.f32 %v4544_v11, %v4536_v42  ;;  %4210 = vmatmul.mubr.msk.bf16.vlgmr.msra.gmra.mrb[72].mxu0 %vm171_vm2, %v2566_v12 }
0x1715   :  { %4221 = vmatprep.mubr.msk.bf16.mxu0 %vm4638_vm1, %v4637_v8 }
0x1716   :  { %v2470_v45 = vpack.c.bf16 %v2468_v16, %v2466_v15 }
0x1718   :  { %4204 = vmatmul.mubr.msk.bf16.vlgmr.msra.gmra.mrb[56].mxu1 %vm287_vm4, %v2470_v45 }
0x1719   :  { %4214 = vmatpush3.bf16.xpose.msra.mxu1 %v2624_v20  ;;  %4215 = vmatprep.mubr.msk.bf16.mxu1 %vm4638_vm1, %v4637_v8 }
0x171a   :  { %4225 = vmatprep.subr.bf16.mxu1 %v4637_v8 }
0x1720   :  { %4216 = vmatmul.mubr.msk.bf16.vlgmr.msra.gmra.mrb[60].mxu1 %vm171_vm2, %v2617_v21 }
0x1721   :  { %4227 = vmatprep.mubr.msk.bf16.mxu1 %vm4638_vm1, %v4637_v8 }
0x17df   :  { %v5356_v43 = vpop.f32.mrb[68].mxu0 }
0x17e0   :  { %v4199_v22 = vpop.f32.mrb[69].mxu0 }
0x17e1   :  { %v5358_v24 = vpop.f32.mrb[70].mxu0 }
0x17e2   :  { %v4353_v28 = vpack.i.bf16 %v5358_v24, %v5356_v43  ;;  %v4200_v19 = vpop.f32.mrb[71].mxu0 }
0x17e7   :  { %v2609_v50 = vpop.f32.mrb[72].mxu0 }
0x17e8   :  { %v2667_v1 = vmul.f32 0.35355338, %v2609_v50  ;;  %v4211_v4 = vpop.f32.mrb[73].mxu0 }
0x17e9   :  { %v2612_v62 = vpop.f32.mrb[74].mxu0 }
0x17ea   :  { %v2671_v18 = vadd.f32 %v2667_v1, %v4797_v37  ;;  %v2668_v29 = vmul.f32 0.35355338, %v2612_v62  ;;  %v4212_v30 = vpop.f32.mrb[75].mxu0 }
0x17eb   :  { %v2558_v27 = vpop.f32.mrb[56].mxu1 }
0x17ec   :  { %v2672_v23 = vadd.f32 %v2668_v29, %v4797_v37  ;;  %v4205_v31 = vpop.f32.mrb[57].mxu1  ;;  %v2675_v32 = vsel %vm287_vm4, %v2671_v18, -inf }
0x17ed   :  { %v2561_v34 = vpop.f32.mrb[58].mxu1  ;;  %2676 = vmax.xlane.f32.xlu0 %v2675_v32 }
0x17ee   :  { %v4358_v63 = vpack.i.bf16 %v2561_v34, %v2558_v27  ;;  %v4206_v33 = vpop.f32.mrb[59].mxu1  ;;  %v2678_v39 = vsel %vm287_vm4, %v2672_v23, -inf  ;;  %v4391_v27 = vld [vmem:[%s5699_s4 + $0x10] sm:$0xff]  }
0x17ef   :  { %2679 = vmax.xlane.f32.xlu1 %v2678_v39  ;;  %v4392_v33 = vld [vmem:[%s5699_s4 + $0x18] sm:$0xff]  }
0x17f3   :  { %v2660_v38 = vpop.f32.mrb[60].mxu1 }
0x17f4   :  { %v2669_v42 = vmul.f32 0.35355338, %v2660_v38  ;;  %v4217_v47 = vpop.f32.mrb[61].mxu1 }
0x17f5   :  { %v2663_v53 = vpop.f32.mrb[62].mxu1 }
0x17f6   :  { %v2673_v54 = vadd.f32 %v2669_v42, %v4800_v46  ;;  %v2670_v55 = vmul.f32 0.35355338, %v2663_v53  ;;  %v4218_v56 = vpop.f32.mrb[63].mxu1 }
0x17f8   :  { %v2674_v37 = vadd.f32 %v2670_v55, %v4800_v46  ;;  %v2681_v61 = vsel %vm287_vm4, %v2673_v54, -inf }
0x17f9   :  { %2682 = vmax.xlane.f32.xlu0 %v2681_v61 }
0x17fa   :  { %v2684_v52 = vsel %vm287_vm4, %v2674_v37, -inf }
0x17fd   :  { %2685 = vmax.xlane.f32.xlu0 %v2684_v52 }
0x187a   :  { %v2677_v35 = vpop.xlane.xlu0 %2676 }
0x187b   :  { %v2687_v57 = vsub.f32 %v2671_v18, %v2677_v35 }
0x187c   :  { %v2680_v36 = vpop.xlane.xlu1 %2679 }
0x187d   :  { %v2691_v5 = vmul.f32 1.442695, %v2687_v57  ;;  %v2688_v7 = vsub.f32 %v2672_v23, %v2680_v36 }
0x187f   :  { %4545 = vpow2.f32 %v2691_v5  ;;  %v2693_v9 = vmul.f32 1.442695, %v2688_v7 }
0x1881   :  { %4547 = vpow2.f32 %v2693_v9 }
0x1886   :  { %v2683_v10 = vpop.xlane.xlu0 %2682 }
0x1887   :  { %v2689_v11 = vsub.f32 %v2673_v54, %v2683_v10 }
0x1889   :  { %v4546_v12 = vpop.eup %4545  ;;  %v2695_v15 = vmul.f32 1.442695, %v2689_v11 }
0x188a   :  { %v2686_v16 = vpop.xlane.xlu0 %2685  ;;  %v2699_v46 = vsel %vm287_vm4, %v4546_v12, 0.0 }
0x188b   :  { %v4548_v17 = vpop.eup %4547  ;;  %4549 = vpow2.f32 %v2695_v15  ;;  %v2690_v45 = vsub.f32 %v2674_v37, %v2686_v16  ;;  %2700 = vadd.xlane.f32.xlu1 %v2699_v46 }
0x188c   :  { %v2702_v20 = vsel %vm287_vm4, %v4548_v17, 0.0 }
0x188d   :  { %v2697_v21 = vmul.f32 1.442695, %v2690_v45  ;;  %2703 = vadd.xlane.f32.xlu0 %v2702_v20 }
0x188f   :  { %4551 = vpow2.f32 %v2697_v21 }
0x1895   :  { %v4550_v22 = vpop.eup %4549 }
0x1896   :  { %v2705_v19 = vsel %vm287_vm4, %v4550_v22, 0.0 }
0x1897   :  { %2706 = vadd.xlane.f32.xlu1 %v2705_v19 }
0x1899   :  { %v4552_v50 = vpop.eup %4551 }
0x189a   :  { %v2708_v1 = vsel %vm287_vm4, %v4552_v50, 0.0 }
0x189b   :  { %2709 = vadd.xlane.f32.xlu0 %v2708_v1 }
0x18a8   :  { %2721 = vrot.lane.b32.xlu1 %v5192_v14, %s5729_s1 }
0x18ac   :  { %4344 = vrot.lane.b32.xlu1 %v4343_v51, %s5730_s24 }
0x18b0   :  { %4349 = vrot.lane.b32.xlu1 %v4348_v6, %s5730_s24  ;;  %s4657_s24 = smov 36  }
0x18b1   :  { %2768 = vrot.lane.b32.xlu0 %v5190_v13, %s5729_s1 }
0x18b4   :  { %4359 = vrot.lane.b32.xlu1 %v4358_v63, %s5731_s25 }
0x18b5   :  { %4354 = vrot.lane.b32.xlu0 %v4353_v28, %s5731_s25  ;;  %s4658_s25 = smov [#allocation2]  }
0x18b6   :  { %s3725_s26 = sshll.u32 %s4658_s25, 4  ;;  %s3726_s26 = int_to_ptr.vmem [resolvable:$true] %s3725_s26 }
0x18b7   :  { %s4613_s28 = scalar_lea.vmem %s3726_s26, 128  ;;  %p4618_p1 = scmp.lt.s32.totalorder %s3726_s26, %s3726_s26 }
0x18b8   :  { %p4614_p0 = scmp.ne.s32.totalorder %s3726_s26, %s4613_s28  ;;  %p4619_p2 = scmp.lt.s32.totalorder %s4613_s28, %s4613_s28 }
0x18ba   :  { %p4620_p3 = por %p4619_p2, %p4618_p1 }
0x18bc   :  { %p4621_p4 = pnand %p4620_p3, %p4614_p0 }
0x1918   :  { %v2701_v14 = vpop.xlane.xlu1 %2700 }
0x1919   :  { %4553 = vrcp.f32 %v2701_v14 }
0x191a   :  { %v2704_v4 = vpop.xlane.xlu0 %2703 }
0x191b   :  { %4555 = vrcp.f32 %v2704_v4 }
0x1923   :  { %v4554_v44 = vpop.eup %4553 }
0x1924   :  { %v2707_v49 = vpop.xlane.xlu1 %2706  ;;  %v2712_v58 = vmul.f32 %v4554_v44, %v4546_v12 }
0x1925   :  { %v4556_v51 = vpop.eup %4555  ;;  %4557 = vrcp.f32 %v2707_v49 }
0x1926   :  { %v2714_v62 = vmul.f32 %v4556_v51, %v4548_v17 }
0x1928   :  { %v2710_v2 = vpop.xlane.xlu0 %2709  ;;  %v2722_v6 = vpop.permute.xlu1 %2721  ;;  %v2719_v13 = vpack.c.bf16 %v2714_v62, %v2712_v58 }
0x1929   :  { %4559 = vrcp.f32 %v2710_v2  ;;  %4220 = vmatpush3.bf16.msra.mxu0 %v2722_v6 }
0x192a   :  { %4231 = vmatprep.subr.bf16.mxu0 %v4391_v27 }
0x192c   :  { %v2769_v18 = vpop.permute.xlu0 %2768  ;;  %4222 = vmatmul.mubr.msk.bf16.vlgmr.msra.gmra.mrb[76].mxu0 %vm287_vm4, %v2719_v13  ;;  %v4345_v54 = vpop.permute.xlu1 %4344 }
0x192d   :  { %4226 = vmatpush3.bf16.msra.mxu1 %v2769_v18  ;;  %4232 = vmatpush3.bf16.msra.mxu0 %v4391_v27  ;;  %v4347_v56 = vunpack.i.h.bf16 %v4345_v54  ;;  %v4346_v37 = vunpack.i.l.bf16 %v4345_v54 }
0x192e   :  { %4233 = vmatprep.subr.bf16.mxu0 %v4392_v33 }
0x192f   :  { %v4558_v43 = vpop.eup %4557  ;;  %v2864_v57 = vsel %vm171_vm2, %v5254_v3, %v4347_v56  ;;  %v2863_v36 = vsel %vm171_vm2, %v5252_v48, %v4346_v37 }
0x1930   :  { %v2716_v28 = vmul.f32 %v4558_v43, %v4550_v22  ;;  %v4355_v55 = vpop.permute.xlu0 %4354  ;;  %v4350_v5 = vpop.permute.xlu1 %4349 }
0x1931   :  { %4234 = vmatpush3.bf16.msra.mxu0 %v4392_v33  ;;  %v4357_v61 = vunpack.i.h.bf16 %v4355_v55  ;;  %v4356_v52 = vunpack.i.l.bf16 %v4355_v55  ;;  %v4352_v17 = vunpack.i.h.bf16 %v4350_v5  ;;  %v4351_v3 = vunpack.i.l.bf16 %v4350_v5 }
0x1933   :  { %v4560_v24 = vpop.eup %4559  ;;  %v2867_v10 = vsel %vm287_vm4, %v2863_v36, %v4356_v52  ;;  %v2868_v11 = vsel %vm287_vm4, %v2864_v57, %v4357_v61  ;;  %v2866_v21 = vsel %vm171_vm2, %v5258_v25, %v4352_v17  ;;  %v2865_v22 = vsel %vm171_vm2, %v5256_v60, %v4351_v3  ;;  %v3811_v25 = vld [vmem:[%s5700_s5 + $0x1] ss:$0 sm:$0xff] }
0x1934   :  { %v2718_v29 = vmul.f32 %v4560_v24, %v4552_v50  ;;  %v4360_v46 = vpop.permute.xlu1 %4359  ;;  %vm3716_vm2 = vcmask 1041408  }
0x1935   :  { %v4362_v45 = vunpack.i.h.bf16 %v4360_v46  ;;  %v4361_v20 = vunpack.i.l.bf16 %v4360_v46 }
0x1936   :  { %v2720_v30 = vpack.c.bf16 %v2718_v29, %v2716_v28 }
0x1937   :  { %v2869_v1 = vsel %vm287_vm4, %v2865_v22, %v4361_v20  ;;  %v2870_v14 = vsel %vm287_vm4, %v2866_v21, %v4362_v45 }
0x1938   :  { %4228 = vmatmul.mubr.msk.bf16.vlgmr.msra.gmra.mrb[64].mxu1 %vm287_vm4, %v2720_v30 }
0x19ff   :  { %v2761_v23 = vpop.f32.mrb[76].mxu0 }
0x1a00   :  { %v4223_v31 = vpop.f32.mrb[77].mxu0 }
0x1a01   :  { %v2764_v32 = vpop.f32.mrb[78].mxu0 }
0x1a02   :  { %v4363_v34 = vpack.i.bf16 %v2764_v32, %v2761_v23  ;;  %v4224_v63 = vpop.f32.mrb[79].mxu0 }
0x1a04   :  { %4364 = vrot.lane.b32.xlu0 %v4363_v34, %s5732_s18 }
0x1a0b   :  { %v2808_v39 = vpop.f32.mrb[64].mxu1 }
0x1a0c   :  { %v4229_v38 = vpop.f32.mrb[65].mxu1 }
0x1a0d   :  { %v2811_v42 = vpop.f32.mrb[66].mxu1  ;;  %v4394_v38 = vld [vmem:[%s5702_s7 + $0x18] sm:$0xff]  }
0x1a0e   :  { %v4368_v47 = vpack.i.bf16 %v2811_v42, %v2808_v39  ;;  %v4230_v53 = vpop.f32.mrb[67].mxu1  ;;  %v4393_v39 = vld [vmem:[%s5702_s7 + $0x10] sm:$0xff]  }
0x1a0f   :  { %4239 = vmatprep.subr.bf16.mxu1 %v4393_v39 }
0x1a10   :  { %4369 = vrot.lane.b32.xlu1 %v4368_v47, %s5732_s18  ;;  %4240 = vmatpush3.bf16.msra.mxu1 %v4393_v39  ;;  %v3825_v39 = vld [vmem:[%s5703_s8 + $0x1] ss:$0 sm:$0xff] }
0x1a11   :  { %4241 = vmatprep.subr.bf16.mxu1 %v4394_v38 }
0x1a14   :  { %4242 = vmatpush3.bf16.msra.mxu1 %v4394_v38 }
0x1a76   :  { %v4365_v35 = vpop.permute.xlu0 %4364 }
0x1a77   :  { %v4367_v7 = vunpack.i.h.bf16 %v4365_v35  ;;  %v4366_v9 = vunpack.i.l.bf16 %v4365_v35 }
0x1a79   :  { %v2872_v12 = vsel %vm1234_vm5, %v2868_v11, %v4367_v7  ;;  %v2871_v15 = vsel %vm1234_vm5, %v2867_v10, %v4366_v9 }
0x1a7a   :  { %v2875_v16 = vpack.c.bf16 %v2872_v12, %v2871_v15 }
0x1a7c   :  { %4235 = vmatprep.mubr.msk.bf16.mxu0 %vm110_vm0, %v2875_v16 }
0x1a82   :  { %v4370_v48 = vpop.permute.xlu1 %4369 }
0x1a83   :  { %v4372_v19 = vunpack.i.h.bf16 %v4370_v48  ;;  %v4371_v50 = vunpack.i.l.bf16 %v4370_v48 }
0x1a85   :  { %v2873_v4 = vsel %vm1234_vm5, %v2869_v1, %v4371_v50  ;;  %v2874_v44 = vsel %vm1234_vm5, %v2870_v14, %v4372_v19  ;;  %v3818_v14 = vld [vmem:[%s5701_s6 + $0x4] ss:$0 sm:$0xff] }
0x1a86   :  { %v2876_v49 = vpack.c.bf16 %v2874_v44, %v2873_v4 }
0x1a88   :  { %4236 = vmatmul.mubr.msk.bf16.vlgmr.msra.gmra.mrb[80].mxu0 %vm110_vm0, %v2876_v49 }
0x1b5b   :  { %v4237_v51 = vpop.f32.mrb[80].mxu0 }
0x1b5c   :  { %v2951_v62 = vadd.f32 %v4237_v51, %v3811_v25  ;;  %v2942_v60 = vpop.f32.mrb[81].mxu0 }
0x1b5d   :  { %v2943_v58 = vadd.f32 %v3811_v25, %v2942_v60  ;;  %v4238_v2 = vpop.f32.mrb[82].mxu0 }
0x1b5e   :  { %v5423_v6 = vadd.f32 %v2951_v62, %v5178_v41  ;;  %v2945_v13 = vpop.f32.mrb[83].mxu0  ;;  %v2954_v24 = vadd.f32 %v4238_v2, %v3811_v25 }
0x1b5f   :  { %v5426_v18 = vadd.f32 %v2943_v58, %v5171_v40  ;;  %v2946_v43 = vadd.f32 %v3811_v25, %v2945_v13  ;;  %v3819_v58 = vld [vmem:[%s5701_s6 + $0x5] ss:$0 sm:$0xff] }
0x1b60   :  { %v2971_v28 = vsel %vm110_vm0, %v5423_v6, 0.0  ;;  %v5438_v27 = vadd.f32 %v2954_v24, %v5180_v0 }
0x1b61   :  { %v5431_v29 = vadd.f32 %v2946_v43, %v5173_v59  ;;  %2972 = vadd.xlane.f32.xlu0 %v2971_v28  ;;  %v2981_v41 = vmul.f32 %v5426_v18, %v5426_v18  ;;  %v2965_v40 = vsel %vm110_vm0, %v5426_v18, 0.0  ;;  %v2983_v59 = vmul.f32 %v5423_v6, %v5423_v6 }
0x1b62   :  { %v2974_v31 = vsel %vm110_vm0, %v5438_v27, 0.0  ;;  %v2984_v63 = vmul.f32 %v5438_v27, %v5438_v27 }
0x1b63   :  { %v2968_v30 = vsel %vm110_vm0, %v5431_v29, 0.0  ;;  %v2985_v23 = vsel %vm110_vm0, %v2981_v41, 0.0  ;;  %v2982_v32 = vmul.f32 %v5431_v29, %v5431_v29  ;;  %v2991_v0 = vsel %vm110_vm0, %v2983_v59, 0.0  ;;  %v4396_v59 = vld [vmem:[%s5704_s9 + $0x48] sm:$0xff]  }
0x1b64   :  { %2969 = vadd.xlane.f32.xlu1 %v2968_v30  ;;  %v2994_v33 = vsel %vm110_vm0, %v2984_v63, 0.0  ;;  %v4401_v63 = vld [vmem:[%s5704_s9 + $0x70] sm:$0xff]  }
0x1b65   :  { %2966 = vadd.xlane.f32.xlu0 %v2965_v40  ;;  %v2988_v34 = vsel %vm110_vm0, %v2982_v32, 0.0  ;;  %v4398_v32 = vld [vmem:[%s5704_s9 + $0x58] sm:$0xff]  }
0x1b68   :  { %2986 = vadd.xlane.f32.xlu1 %v2985_v23  ;;  %v4395_v23 = vld [vmem:[%s5704_s9 + $0x40] sm:$0xff]  }
0x1b69   :  { %2975 = vadd.xlane.f32.xlu0 %v2974_v31  ;;  %4247 = vmatprep.subr.bf16.mxu0 %v4395_v23  ;;  %v4397_v31 = vld [vmem:[%s5704_s9 + $0x50] sm:$0xff]  }
0x1b6a   :  { %4248 = vmatpush3.bf16.msra.mxu0 %v4395_v23 }
0x1b6b   :  { %4249 = vmatprep.subr.bf16.mxu0 %v4396_v59 }
0x1b6c   :  { %2992 = vadd.xlane.f32.xlu1 %v2991_v0  ;;  %v4399_v0 = vld [vmem:[%s5704_s9 + $0x60] sm:$0xff]  }
0x1b6d   :  { %2989 = vadd.xlane.f32.xlu0 %v2988_v34  ;;  %v4400_v34 = vld [vmem:[%s5704_s9 + $0x68] sm:$0xff]  }
0x1b6e   :  { %4250 = vmatpush3.bf16.msra.mxu0 %v4396_v59 }
0x1b6f   :  { %4251 = vmatprep.subr.bf16.mxu0 %v4397_v31 }
0x1b71   :  { %2995 = vadd.xlane.f32.xlu0 %v2994_v33  ;;  %v4402_v33 = vld [vmem:[%s5704_s9 + $0x78] sm:$0xff]  }
0x1b72   :  { %4252 = vmatpush3.bf16.msra.mxu0 %v4397_v31 }
0x1b73   :  { %4253 = vmatprep.subr.bf16.mxu0 %v4398_v32 }
0x1b76   :  { %4254 = vmatpush3.bf16.msra.mxu0 %v4398_v32 }
0x1b77   :  { %4255 = vmatprep.subr.bf16.mxu0 %v4399_v0 }
0x1b7a   :  { %4256 = vmatpush3.bf16.msra.mxu0 %v4399_v0 }
0x1b7b   :  { %4257 = vmatprep.subr.bf16.mxu0 %v4400_v34 }
0x1b7e   :  { %4258 = vmatpush3.bf16.msra.mxu0 %v4400_v34 }
0x1b7f   :  { %4259 = vmatprep.subr.bf16.mxu0 %v4401_v63 }
0x1b82   :  { %4260 = vmatpush3.bf16.msra.mxu0 %v4401_v63 }
0x1b83   :  { %4261 = vmatprep.subr.bf16.mxu0 %v4402_v33 }
0x1b86   :  { %4262 = vmatpush3.bf16.msra.mxu0 %v4402_v33 }
0x1b87   :  { %4279 = vmatprep.subr.bf16.mxu0 %v4637_v8 }
0x1bee   :  { %v2973_v42 = vpop.xlane.xlu0 %2972 }
0x1bef   :  { %v2979_v37 = vmul.f32 0.03125, %v2973_v42 }
0x1bf1   :  { %v2970_v47 = vpop.xlane.xlu1 %2969  ;;  %v3003_v5 = vmul.f32 %v2979_v37, %v2979_v37  ;;  %v3011_v44 = vsub.f32 %v5423_v6, %v2979_v37 }
0x1bf2   :  { %v2967_v53 = vpop.xlane.xlu0 %2966  ;;  %v2978_v35 = vmul.f32 0.03125, %v2970_v47 }
0x1bf3   :  { %v2977_v54 = vmul.f32 0.03125, %v2967_v53 }
0x1bf4   :  { %v3002_v11 = vmul.f32 %v2978_v35, %v2978_v35  ;;  %v3010_v49 = vsub.f32 %v5431_v29, %v2978_v35 }
0x1bf5   :  { %v3001_v55 = vmul.f32 %v2977_v54, %v2977_v54  ;;  %v2987_v56 = vpop.xlane.xlu1 %2986  ;;  %v3009_v50 = vsub.f32 %v5426_v18, %v2977_v54 }
0x1bf6   :  { %v2997_v61 = vmul.f32 0.03125, %v2987_v56  ;;  %v2976_v52 = vpop.xlane.xlu0 %2975 }
0x1bf7   :  { %v2980_v12 = vmul.f32 0.03125, %v2976_v52 }
0x1bf8   :  { %v3005_v57 = vsub.f32 %v2997_v61, %v3001_v55 }
0x1bf9   :  { %v2993_v36 = vpop.xlane.xlu1 %2992  ;;  %v3004_v45 = vmul.f32 %v2980_v12, %v2980_v12  ;;  %v3012_v2 = vsub.f32 %v5438_v27, %v2980_v12 }
0x1bfa   :  { %v3013_v7 = vadd.f32 1e-05, %v3005_v57  ;;  %v2999_v9 = vmul.f32 0.03125, %v2993_v36  ;;  %v2990_v10 = vpop.xlane.xlu0 %2989 }
0x1bfb   :  { %v2998_v15 = vmul.f32 0.03125, %v2990_v10 }
0x1bfc   :  { %4561 = vrsqrt.f32 %v3013_v7  ;;  %v3007_v16 = vsub.f32 %v2999_v9, %v3003_v5 }
0x1bfd   :  { %v3006_v46 = vsub.f32 %v2998_v15, %v3002_v11 }
0x1bfe   :  { %v3015_v17 = vadd.f32 1e-05, %v3007_v16  ;;  %v2996_v3 = vpop.xlane.xlu0 %2995 }
0x1bff   :  { %v3014_v20 = vadd.f32 1e-05, %v3006_v46  ;;  %v3000_v48 = vmul.f32 0.03125, %v2996_v3 }
0x1c00   :  { %4563 = vrsqrt.f32 %v3015_v17 }
0x1c01   :  { %4565 = vrsqrt.f32 %v3014_v20  ;;  %v3008_v21 = vsub.f32 %v3000_v48, %v3004_v45 }
0x1c03   :  { %v3016_v22 = vadd.f32 1e-05, %v3008_v21 }
0x1c05   :  { %4567 = vrsqrt.f32 %v3016_v22 }
0x1c06   :  { %v4562_v19 = vpop.eup %4561 }
0x1c07   :  { %v3021_v1 = vmul.f32 %v4562_v19, %v3009_v50 }
0x1c09   :  { %v3031_v60 = vmul.f32 %v3818_v14, %v3021_v1 }
0x1c0a   :  { %v4564_v4 = vpop.eup %4563 }
0x1c0b   :  { %v4566_v25 = vpop.eup %4565  ;;  %v3023_v51 = vmul.f32 %v4564_v4, %v3011_v44  ;;  %v5470_v24 = vadd.f32 %v3819_v58, %v3031_v60 }
0x1c0c   :  { %v3022_v62 = vmul.f32 %v4566_v25, %v3010_v49 }
0x1c0d   :  { %v3033_v6 = vmul.f32 %v3818_v14, %v3023_v51 }
0x1c0e   :  { %v3032_v13 = vmul.f32 %v3818_v14, %v3022_v62 }
0x1c0f   :  { %v4568_v18 = vpop.eup %4567  ;;  %v5477_v41 = vadd.f32 %v3819_v58, %v3033_v6 }
0x1c10   :  { %v3024_v43 = vmul.f32 %v4568_v18, %v3012_v2  ;;  %v5472_v28 = vadd.f32 %v3819_v58, %v3032_v13 }
0x1c12   :  { %v3045_v29 = vpack.c.bf16 %v5472_v28, %v5470_v24  ;;  %v3034_v30 = vmul.f32 %v3818_v14, %v3024_v43 }
0x1c14   :  { %4243 = vmatprep.mubr.msk.bf16.mxu1 %vm110_vm0, %v3045_v29  ;;  %v5479_v40 = vadd.f32 %v3819_v58, %v3034_v30  ;;  %v3847_v29 = vld [vmem:[%s5705_s10 + $0x1] ss:$0 sm:$0xff] }
0x1c16   :  { %v3046_v27 = vpack.c.bf16 %v5479_v40, %v5477_v41 }
0x1c18   :  { %4244 = vmatmul.mubr.msk.bf16.vlgmr.msra.gmra.mrb[68].mxu1 %vm110_vm0, %v3046_v27 }
0x1ceb   :  { %v4245_v38 = vpop.f32.mrb[68].mxu1 }
0x1cec   :  { %v3121_v42 = vadd.f32 %v4245_v38, %v3825_v39  ;;  %v3112_v47 = vpop.f32.mrb[69].mxu1 }
0x1ced   :  { %v3113_v53 = vadd.f32 %v3825_v39, %v3112_v47  ;;  %v4246_v54 = vpop.f32.mrb[70].mxu1 }
0x1cee   :  { %v3129_v55 = vmul.f32 %v3121_v42, %v3121_v42  ;;  %v3124_v56 = vadd.f32 %v4246_v54, %v3825_v39  ;;  %v3115_v37 = vpop.f32.mrb[71].mxu1 }
0x1cef   :  { %v3127_v61 = vmul.f32 %v3113_v53, %v3113_v53  ;;  %v3116_v52 = vadd.f32 %v3825_v39, %v3115_v37 }
0x1cf0   :  { %v3133_v35 = vmul.f32 %v3129_v55, %v3121_v42  ;;  %v3130_v57 = vmul.f32 %v3124_v56, %v3124_v56 }
0x1cf1   :  { %v3131_v36 = vmul.f32 %v3127_v61, %v3113_v53  ;;  %v3128_v5 = vmul.f32 %v3116_v52, %v3116_v52 }
0x1cf2   :  { %v3137_v7 = vmul.f32 0.044715, %v3133_v35  ;;  %v3134_v9 = vmul.f32 %v3130_v57, %v3124_v56  ;;  %v4404_v57 = vld [vmem:[%s5706_s11 + $0x8] sm:$0xff]  }
0x1cf3   :  { %v3135_v10 = vmul.f32 0.044715, %v3131_v36  ;;  %v3132_v11 = vmul.f32 %v3128_v5, %v3116_v52  ;;  %v3415_v36 = vsel %vm110_vm0, %v4404_v57, 0  ;;  %v4405_v5 = vld [vmem:[%s5706_s11 + $0x10] sm:$0xff]  }
0x1cf4   :  { %v3141_v12 = vadd.f32 %v3137_v7, %v3121_v42  ;;  %v3138_v15 = vmul.f32 0.044715, %v3134_v9  ;;  %v3418_v7 = vsel %vm110_vm0, %v4405_v5, 0  ;;  %v4406_v9 = vld [vmem:[%s5706_s11 + $0x18] sm:$0xff]  }
0x1cf5   :  { %v3139_v16 = vadd.f32 %v3135_v10, %v3113_v53  ;;  %v3136_v46 = vmul.f32 0.044715, %v3132_v11  ;;  %v3421_v10 = vsel %vm110_vm0, %v4406_v9, 0  ;;  %v4407_v11 = vld [vmem:[%s5709_s14] sm:$0xff]  }
0x1cf6   :  { %v3145_v17 = vmul.f32 0.7978846, %v3141_v12  ;;  %v3142_v3 = vadd.f32 %v3138_v15, %v3124_v56  ;;  %v4408_v12 = vld [vmem:[%s5709_s14 + $0x8] sm:$0xff]  }
0x1cf7   :  { %v3143_v45 = vmul.f32 0.7978846, %v3139_v16  ;;  %v3140_v20 = vadd.f32 %v3136_v46, %v3116_v52 }
0x1cf8   :  { %4569 = vtanh.f32 %v3145_v17  ;;  %v3146_v48 = vmul.f32 0.7978846, %v3142_v3 }
0x1cf9   :  { %4571 = vtanh.f32 %v3143_v45  ;;  %v3144_v21 = vmul.f32 0.7978846, %v3140_v20 }
0x1cfa   :  { %4573 = vtanh.f32 %v3146_v48 }
0x1cfb   :  { %4575 = vtanh.f32 %v3144_v21 }
0x1d02   :  { %v4570_v22 = vpop.eup %4569 }
0x1d03   :  { %v4572_v19 = vpop.eup %4571  ;;  %v3153_v50 = vadd.f32 1.0, %v4570_v22 }
0x1d04   :  { %v4574_v1 = vpop.eup %4573  ;;  %v3151_v14 = vadd.f32 1.0, %v4572_v19 }
0x1d05   :  { %v4576_v4 = vpop.eup %4575  ;;  %v3157_v44 = vmul.f32 0.5, %v3153_v50  ;;  %v3154_v49 = vadd.f32 1.0, %v4574_v1 }
0x1d06   :  { %v3152_v25 = vadd.f32 1.0, %v4576_v4  ;;  %v3155_v51 = vmul.f32 0.5, %v3151_v14 }
0x1d07   :  { %v3158_v62 = vmul.f32 0.5, %v3154_v49  ;;  %v3161_v58 = vmul.f32 %v3157_v44, %v3121_v42 }
0x1d08   :  { %v3156_v60 = vmul.f32 0.5, %v3152_v25  ;;  %v3159_v13 = vmul.f32 %v3155_v51, %v3113_v53 }
0x1d09   :  { %v3162_v2 = vmul.f32 %v3158_v62, %v3124_v56 }
0x1d0a   :  { %v3160_v18 = vmul.f32 %v3156_v60, %v3116_v52  ;;  %v4403_v52 = vld [vmem:[%s5706_s11] sm:$0xff]  }
0x1d0b   :  { %v3164_v43 = vpack.c.bf16 %v3162_v2, %v3161_v58  ;;  %4287 = vmatprep.subr.msk.bf16.mxu1 %vm110_vm0, %v4403_v52  ;;  %v3412_v35 = vsel %vm110_vm0, %v4403_v52, 0 }
0x1d0c   :  { %v3163_v6 = vpack.c.bf16 %v3160_v18, %v3159_v13  ;;  %4268 = vmatpush3.bf16.xpose.msra.mxu1 %v3412_v35 }
0x1d0d   :  { %4288 = vmatprep.subr.msk.bf16.mxu1 %vm110_vm0, %v4404_v57 }
0x1d0e   :  { %4263 = vmatprep.mubr.bf16.mxu0 %v3163_v6 }
0x1d0f   :  { %4264 = vmatmul.mubr.bf16.vlgmr.msra.gmra.mrb[84].mxu0 %v3164_v43 }
0x1d10   :  { %4283 = vmatprep.mubr.msk.bf16.mxu0 %vm4638_vm1, %v4637_v8  ;;  %4280 = vmatpush3.bf16.msra.mxu0 %v4407_v11  ;;  %v4655_v11 = vmov 0   ;;  %vm3714_vm1 = vcmask 334848  }
0x1d11   :  { %4281 = vmatprep.subr.bf16.mxu0 %v4637_v8  ;;  %4374 = vset.pattern.permute.xlu1 %v4655_v11 }
0x1d12   :  { %4373 = vset.pattern.permute.xlu0 %v4655_v11 }
0x1d14   :  { %4270 = vmatpush3.bf16.xpose.msra.mxu1 %v3415_v36  ;;  %4282 = vmatpush3.bf16.msra.mxu0 %v4408_v12 }
0x1d15   :  { %4289 = vmatprep.subr.msk.bf16.mxu1 %vm110_vm0, %v4405_v5 }
0x1d1c   :  { %4272 = vmatpush3.bf16.xpose.msra.mxu1 %v3418_v7 }
0x1d1d   :  { %4290 = vmatprep.subr.msk.bf16.mxu1 %vm110_vm0, %v4406_v9 }
0x1d24   :  { %4274 = vmatpush3.bf16.xpose.msra.mxu1 %v3421_v10 }
0x1de2   :  { %v4265_v30 = vpop.f32.mrb[84].mxu0 }
0x1de3   :  { %v3281_v27 = vadd.f32 %v4265_v30, %v3847_v29  ;;  %v3272_v23 = vpop.f32.mrb[85].mxu0 }
0x1de4   :  { %v3273_v59 = vadd.f32 %v3847_v29, %v3272_v23  ;;  %v4266_v31 = vpop.f32.mrb[86].mxu0 }
0x1de5   :  { %v5518_v32 = vadd.f32 %v3281_v27, %v5477_v41  ;;  %v3284_v0 = vadd.f32 %v4266_v31, %v3847_v29  ;;  %v3275_v34 = vpop.f32.mrb[87].mxu0  ;;  %v3858_v27 = vld [vmem:[%s5701_s6 + $0x6] ss:$0 sm:$0xff] }
0x1de6   :  { %v3276_v63 = vadd.f32 %v3847_v29, %v3275_v34  ;;  %v5521_v33 = vadd.f32 %v3273_v59, %v5470_v24 }
0x1de7   :  { %v5524_v39 = vadd.f32 %v3284_v0, %v5479_v40  ;;  %v3301_v38 = vsel %vm110_vm0, %v5518_v32, 0.0  ;;  %v3313_v54 = vmul.f32 %v5518_v32, %v5518_v32 }
0x1de8   :  { %3302 = vadd.xlane.f32.xlu1 %v3301_v38  ;;  %v5529_v42 = vadd.f32 %v3276_v63, %v5472_v28  ;;  %v3295_v47 = vsel %vm110_vm0, %v5521_v33, 0.0  ;;  %v3311_v24 = vmul.f32 %v5521_v33, %v5521_v33 }
0x1de9   :  { %v3304_v41 = vsel %vm110_vm0, %v5524_v39, 0.0  ;;  %v3314_v56 = vmul.f32 %v5524_v39, %v5524_v39  ;;  %v3321_v37 = vsel %vm110_vm0, %v3313_v54, 0.0 }
0x1dea   :  { %3305 = vadd.xlane.f32.xlu0 %v3304_v41  ;;  %v3298_v40 = vsel %vm110_vm0, %v5529_v42, 0.0  ;;  %v3312_v53 = vmul.f32 %v5529_v42, %v5529_v42  ;;  %v3315_v28 = vsel %vm110_vm0, %v3311_v24, 0.0  ;;  %v3859_v41 = vld [vmem:[%s5701_s6 + $0x7] ss:$0 sm:$0xff] }
0x1deb   :  { %v3324_v61 = vsel %vm110_vm0, %v3314_v56, 0.0 }
0x1dec   :  { %3296 = vadd.xlane.f32.xlu1 %v3295_v47  ;;  %v3318_v55 = vsel %vm110_vm0, %v3312_v53, 0.0 }
0x1dee   :  { %3299 = vadd.xlane.f32.xlu0 %v3298_v40 }
0x1df0   :  { %3316 = vadd.xlane.f32.xlu1 %v3315_v28 }
0x1df2   :  { %3319 = vadd.xlane.f32.xlu0 %v3318_v55 }
0x1df4   :  { %3322 = vadd.xlane.f32.xlu1 %v3321_v37 }
0x1df6   :  { %3325 = vadd.xlane.f32.xlu0 %v3324_v61 }
0x1e75   :  { %v3303_v15 = vpop.xlane.xlu1 %3302 }
0x1e76   :  { %v3309_v48 = vmul.f32 0.03125, %v3303_v15 }
0x1e77   :  { %v3306_v16 = vpop.xlane.xlu0 %3305 }
0x1e78   :  { %v3310_v19 = vmul.f32 0.03125, %v3306_v16  ;;  %v3333_v44 = vmul.f32 %v3309_v48, %v3309_v48  ;;  %v3341_v0 = vsub.f32 %v5518_v32, %v3309_v48 }
0x1e79   :  { %v3297_v46 = vpop.xlane.xlu1 %3296 }
0x1e7a   :  { %v3307_v17 = vmul.f32 0.03125, %v3297_v46  ;;  %v3334_v62 = vmul.f32 %v3310_v19, %v3310_v19 }
0x1e7b   :  { %v3300_v3 = vpop.xlane.xlu0 %3299 }
0x1e7c   :  { %v3308_v45 = vmul.f32 0.03125, %v3300_v3  ;;  %v3331_v21 = vmul.f32 %v3307_v17, %v3307_v17  ;;  %v3339_v29 = vsub.f32 %v5521_v33, %v3307_v17  ;;  %v3342_v33 = vsub.f32 %v5524_v39, %v3310_v19 }
0x1e7d   :  { %v3317_v20 = vpop.xlane.xlu1 %3316 }
0x1e7e   :  { %v3327_v22 = vmul.f32 0.03125, %v3317_v20  ;;  %v3332_v1 = vmul.f32 %v3308_v45, %v3308_v45  ;;  %v3340_v23 = vsub.f32 %v5529_v42, %v3308_v45 }
0x1e7f   :  { %v3320_v50 = vpop.xlane.xlu0 %3319 }
0x1e80   :  { %v3335_v14 = vsub.f32 %v3327_v22, %v3331_v21  ;;  %v3328_v8 = vmul.f32 0.03125, %v3320_v50  ;;  %v3524_v50 = vld [vmem:[%s5707_s12 + $0x8] sm:$0xff] }
0x1e81   :  { %v3323_v4 = vpop.xlane.xlu1 %3322 }
0x1e82   :  { %v3343_v49 = vadd.f32 1e-05, %v3335_v14  ;;  %v3336_v25 = vsub.f32 %v3328_v8, %v3332_v1  ;;  %v3329_v51 = vmul.f32 0.03125, %v3323_v4  ;;  %v3525_v1 = vld [vmem:[%s5707_s12 + $0x10] sm:$0xff]  ;;  %v3523_v14 = vld [vmem:[%s5707_s12] sm:$0xff] }
0x1e83   :  { %v3326_v60 = vpop.xlane.xlu0 %3325  ;;  %v3866_v8 = vld [vmem:[%s5710_s15] ss:$0 sm:$0xff] }
0x1e84   :  { %4577 = vrsqrt.f32 %v3343_v49  ;;  %v3344_v58 = vadd.f32 1e-05, %v3336_v25  ;;  %v3337_v2 = vsub.f32 %v3329_v51, %v3333_v44  ;;  %v3330_v13 = vmul.f32 0.03125, %v3326_v60  ;;  %v3526_v49 = vld [vmem:[%s5707_s12 + $0x18] sm:$0xff] }
0x1e86   :  { %4579 = vrsqrt.f32 %v3344_v58  ;;  %v3345_v18 = vadd.f32 1e-05, %v3337_v2  ;;  %v3338_v43 = vsub.f32 %v3330_v13, %v3334_v62 }
0x1e88   :  { %4581 = vrsqrt.f32 %v3345_v18  ;;  %v3346_v6 = vadd.f32 1e-05, %v3338_v43 }
0x1e8a   :  { %4583 = vrsqrt.f32 %v3346_v6 }
0x1e8e   :  { %v4578_v30 = vpop.eup %4577 }
0x1e8f   :  { %v3351_v59 = vmul.f32 %v4578_v30, %v3339_v29 }
0x1e90   :  { %v4580_v31 = vpop.eup %4579 }
0x1e91   :  { %v3352_v34 = vmul.f32 %v4580_v31, %v3340_v23  ;;  %v3361_v63 = vmul.f32 %v3858_v27, %v3351_v59  ;;  %v3522_v59 = vand.u32 127, %v66_v26 }
0x1e92   :  { %v4582_v38 = vpop.eup %4581 }
0x1e93   :  { %v3353_v47 = vmul.f32 %v4582_v38, %v3341_v0  ;;  %v3362_v24 = vmul.f32 %v3858_v27, %v3352_v34  ;;  %v3371_v28 = vadd.f32 %v3859_v41, %v3361_v63 }
0x1e94   :  { %v4584_v40 = vpop.eup %4583 }
0x1e95   :  { %v3354_v53 = vmul.f32 %v4584_v40, %v3342_v33  ;;  %v3372_v54 = vadd.f32 %v3859_v41, %v3362_v24  ;;  %v3363_v42 = vmul.f32 %v3858_v27, %v3353_v47  ;;  %v3601_v32 = vpack.c.bf16 %v3371_v28, %v3371_v28 }
0x1e97   :  { %v3375_v55 = vpack.c.bf16 %v3372_v54, %v3371_v28  ;;  %v3364_v56 = vmul.f32 %v3858_v27, %v3354_v53  ;;  %v3373_v37 = vadd.f32 %v3859_v41, %v3363_v42  ;;  %v3616_v5 = vunpack.c.l.b16 %v3601_v32 }
0x1e99   :  { %4275 = vmatprep.mubr.msk.bf16.mxu1 %vm110_vm0, %v3375_v55  ;;  %v3374_v61 = vadd.f32 %v3859_v41, %v3364_v56  ;;  %v3602_v52 = vpack.c.bf16 %v3373_v37, %v3373_v37  ;;  %v3694_v35 = vrot.slane %v3373_v37, 7 }
0x1e9b   :  { %v3376_v57 = vpack.c.bf16 %v3374_v61, %v3373_v37  ;;  %v3617_v36 = vunpack.c.l.b16 %v3602_v52  ;;  %v5587_v39 = vsel %vm3619_vm6, %v3694_v35, %v3371_v28 }
0x1e9d   :  { %4276 = vmatmul.mubr.msk.bf16.vlgmr.msra.gmra.mrb[72].mxu1 %vm110_vm0, %v3376_v57  ;;  %v3618_v7 = vrot.slane %v3617_v36, 7 }
0x1e9f   :  { %v3620_v9 = vsel %vm3619_vm6, %v3618_v7, %v3616_v5 }
0x1ea0   :  { %v3621_v10 = vpack.c.b16 %v3620_v9, %v3620_v9  ;;  %v3563_v9 = vld [vmem:[%s5708_s13] sm:$0xff] }
0x1ea1   :  { %v3585_v11 = vsel %vm3571_vm13, %v3563_v9, 0.0 }
0x1ea2   :  { %4284 = vmatmul.mubr.msk.bf16.vlgmr.msra.gmra.mrb[88].mxu0 %vm110_vm0, %v3621_v10  ;;  %v3564_v10 = vld [vmem:[%s5708_s13 + $0x8] sm:$0xff] }
0x1f70   :  { %v4277_v12 = vpop.f32.mrb[72].mxu1 }
0x1f71   :  { %v5591_v15 = vpop.f32.mrb[73].mxu1  ;;  %v3479_v16 = vsel %vm3472_vm7, %v4277_v12, -inf }
0x1f72   :  { %3480 = vmax.xlane.f32.xlu1 %v3479_v16  ;;  %v5594_v46 = vpop.f32.mrb[74].mxu1  ;;  %v3473_v20 = vsel %vm3472_vm7, %v5591_v15, -inf }
0x1f73   :  { %v5596_v17 = vpop.f32.mrb[75].mxu1  ;;  %v3482_v19 = vsel %vm3472_vm7, %v5594_v46, -inf }
0x1f74   :  { %v3476_v3 = vsel %vm3472_vm7, %v5596_v17, -inf }
0x1f75   :  { %v3671_v45 = vpop.f32.mrb[88].mxu0  ;;  %3477 = vmax.xlane.f32.xlu0 %v3476_v3  ;;  %v3566_v3 = vld [vmem:[%s5708_s13 + $0x18] sm:$0xff] }
0x1f76   :  { %v4285_v48 = vpop.f32.mrb[89].mxu0  ;;  %3474 = vmax.xlane.f32.xlu1 %v3473_v20  ;;  %v3672_v4 = vadd.f32 %v3866_v8, %v3671_v45  ;;  %v3590_v20 = vsel %vm3571_vm13, %v3566_v3, 0.0 }
0x1f77   :  { %v3674_v21 = vpop.f32.mrb[90].mxu0 }
0x1f78   :  { %v4286_v22 = vpop.f32.mrb[91].mxu0  ;;  %v3678_v44 = vsel %vm3677_vm8, %v3672_v4, -inf }
0x1f79   :  { %3483 = vmax.xlane.f32.xlu0 %v3482_v19 }
0x1f87   :  { %3531 = vperm.xlu1 %4374, %v3524_v50  }
0x1f8b   :  { %3534 = vperm.xlu1 %4374, %v3525_v1  }
0x1f8f   :  { %3528 = vperm.xlu0 %4373, %v3523_v14  }
0x1faf   :  { %3679 = vmax.xlane.f32.xlu1 %v3678_v44 }
0x1fc0   :  { %3537 = vperm.xlu1 %4374, %v3526_v49  }
0x1fff   :  { %v5620_v25 = vpop.xlane.xlu1 %3480 }
0x2000   :  { %v3487_v51 = vsub.f32 %v4277_v12, %v5620_v25 }
0x2002   :  { %v5623_v62 = vpop.xlane.xlu0 %3477  ;;  %v3493_v18 = vmul.f32 1.442695, %v3487_v51 }
0x2003   :  { %v3486_v60 = vsub.f32 %v5596_v17, %v5623_v62  ;;  %v5627_v58 = vpop.xlane.xlu1 %3474 }
0x2004   :  { %v3485_v2 = vsub.f32 %v5591_v15, %v5627_v58 }
0x2005   :  { %v3491_v13 = vmul.f32 1.442695, %v3486_v60 }
0x2006   :  { %v3489_v43 = vmul.f32 1.442695, %v3485_v2  ;;  %v5631_v6 = vpop.xlane.xlu0 %3483 }
0x2007   :  { %4585 = vpow2.f32 %v3491_v13  ;;  %v3488_v29 = vsub.f32 %v5594_v46, %v5631_v6  ;;  %v3532_v30 = vpop.permute.xlu1 %3531 }
0x2008   :  { %4587 = vpow2.f32 %v3489_v43  ;;  %vm3540_vm11 = vcmp.eq.s32.totalorder %v3522_v59, %v3532_v30 }
0x2009   :  { %4589 = vpow2.f32 %v3493_v18  ;;  %v3495_v27 = vmul.f32 1.442695, %v3488_v29  ;;  %v3544_v54 = vsel %vm3540_vm11, %v5596_v17, 0.0 }
0x200a   :  { %v3550_v42 = vsel %vm3472_vm7, %v3544_v54, 0.0 }
0x200b   :  { %v3535_v23 = vpop.permute.xlu1 %3534  ;;  %4591 = vpow2.f32 %v3495_v27 }
0x200c   :  { %vm3541_vm9 = vcmp.eq.s32.totalorder %v3522_v59, %v3535_v23 }
0x200d   :  { %v3545_v63 = vsel %vm3541_vm9, %v4277_v12, 0.0  ;;  %v3586_v12 = vsel %vm3571_vm13, %v3564_v10, 0.0 }
0x200e   :  { %v3529_v33 = vpop.permute.xlu0 %3528  ;;  %v3553_v47 = vsel %vm3472_vm7, %v3545_v63, 0.0  ;;  %v3587_v16 = vadd.f32 %v3586_v12, %v3585_v11 }
0x200f   :  { %vm3539_vm10 = vcmp.eq.s32.totalorder %v3522_v59, %v3529_v33 }
0x2010   :  { %v3543_v53 = vsel %vm3539_vm10, %v5591_v15, 0.0  ;;  %v3565_v15 = vld [vmem:[%s5708_s13 + $0x10] sm:$0xff]  ;;  %s4656_s13 = smov 32  }
0x2011   :  { %v4586_v31 = vpop.eup %4585  ;;  %v3547_v28 = vsel %vm3472_vm7, %v3543_v53, 0.0 }
0x2012   :  { %v4588_v0 = vpop.eup %4587  ;;  %v3500_v34 = vsel %vm3472_vm7, %v4586_v31, 0.0 }
0x2013   :  { %3501 = vadd.xlane.f32.xlu0 %v3500_v34  ;;  %v3497_v38 = vsel %vm3472_vm7, %v4588_v0, 0.0  ;;  %v4590_v41 = vpop.eup %4589 }
0x2014   :  { %3498 = vadd.xlane.f32.xlu1 %v3497_v38  ;;  %v3503_v24 = vsel %vm3472_vm7, %v4590_v41, 0.0 }
0x2015   :  { %v4592_v40 = vpop.eup %4591 }
0x2016   :  { %v3506_v26 = vsel %vm3472_vm7, %v4592_v40, 0.0 }
0x2017   :  { %3554 = vadd.xlane.f32.xlu0 %v3553_v47 }
0x2018   :  { %3504 = vadd.xlane.f32.xlu1 %v3503_v24 }
0x201c   :  { %3507 = vadd.xlane.f32.xlu1 %v3506_v26 }
0x2020   :  { %3548 = vadd.xlane.f32.xlu1 %v3547_v28 }
0x2024   :  { %3551 = vadd.xlane.f32.xlu1 %v3550_v42 }
0x203c   :  { %v3680_v55 = vpop.xlane.xlu1 %3679 }
0x203d   :  { %v5645_v56 = vsub.f32 %v3672_v4, %v3680_v55 }
0x203f   :  { %v3682_v37 = vmul.f32 1.442695, %v5645_v56 }
0x2040   :  { %v3538_v32 = vpop.permute.xlu1 %3537 }
0x2041   :  { %4593 = vpow2.f32 %v3682_v37  ;;  %vm3542_vm12 = vcmp.eq.s32.totalorder %v3522_v59, %v3538_v32 }
0x2042   :  { %v3546_v61 = vsel %vm3542_vm12, %v5594_v46, 0.0  ;;  %v3588_v46 = vsel %vm3571_vm13, %v3565_v15, 0.0 }
0x2043   :  { %v3556_v52 = vsel %vm3472_vm7, %v3546_v61, 0.0  ;;  %v3589_v45 = vadd.f32 %v3588_v46, %v3587_v16 }
0x2044   :  { %3557 = vadd.xlane.f32.xlu1 %v3556_v52 }
0x2045   :  { %v3591_v19 = vadd.f32 %v3590_v20, %v3589_v45 }
0x2047   :  { %v3592_v8 = vrot.slane %v3591_v19, 4 }
0x2049   :  { %v3593_v60 = vadd.f32 %v3592_v8, %v3591_v19 }
0x204b   :  { %v5650_v35 = vpop.eup %4593  ;;  %v3594_v30 = vrot.slane %v3593_v60, 2 }
0x204c   :  { %v3684_v57 = vsel %vm3677_vm8, %v5650_v35, 0.0 }
0x204d   :  { %3685 = vadd.xlane.f32.xlu0 %v3684_v57  ;;  %v3595_v0 = vadd.f32 %v3594_v30, %v3593_v60 }
0x204f   :  { %v3596_v41 = vrot.slane %v3595_v0, 1 }
0x2051   :  { %v3597_v40 = vadd.f32 %v3596_v41, %v3595_v0 }
0x2053   :  { %v3598_v54 = vmax.f32 %v3597_v40, 1.0 }
0x20a0   :  { %v3502_v5 = vpop.xlane.xlu0 %3501 }
0x20a1   :  { %v3499_v36 = vpop.xlane.xlu1 %3498 }
0x20a2   :  { %4595 = vlog2.f32 %v3499_v36 }
0x20a3   :  { %4597 = vlog2.f32 %v3502_v5 }
0x20a4   :  { %v3555_v29 = vpop.xlane.xlu0 %3554 }
0x20a5   :  { %v3505_v7 = vpop.xlane.xlu1 %3504 }
0x20a6   :  { %4599 = vlog2.f32 %v3505_v7 }
0x20a9   :  { %v3508_v17 = vpop.xlane.xlu1 %3507 }
0x20aa   :  { %4601 = vlog2.f32 %v3508_v17 }
0x20ac   :  { %v4596_v48 = vpop.eup %4595 }
0x20ad   :  { %v4598_v21 = vpop.eup %4597  ;;  %v3549_v22 = vpop.xlane.xlu1 %3548  ;;  %v3510_v50 = vmul.f32 0.6931472, %v4596_v48 }
0x20ae   :  { %v3512_v14 = vmul.f32 0.6931472, %v4598_v21 }
0x20af   :  { %v3517_v44 = vadd.f32 %v3510_v50, %v5627_v58 }
0x20b0   :  { %v4600_v1 = vpop.eup %4599  ;;  %v3518_v51 = vadd.f32 %v3512_v14, %v5623_v62 }
0x20b1   :  { %v3514_v4 = vmul.f32 0.6931472, %v4600_v1  ;;  %v3552_v49 = vpop.xlane.xlu1 %3551  ;;  %v3559_v13 = vsub.f32 %v3517_v44, %v3549_v22 }
0x20b2   :  { %v3560_v18 = vsub.f32 %v3518_v51, %v3552_v49 }
0x20b3   :  { %v3519_v2 = vadd.f32 %v3514_v4, %v5620_v25  ;;  %v3567_v23 = vmul.f32 %v3563_v9, %v3559_v13 }
0x20b4   :  { %v4602_v43 = vpop.eup %4601  ;;  %v3568_v59 = vmul.f32 %v3564_v10, %v3560_v18 }
0x20b5   :  { %v3561_v27 = vsub.f32 %v3519_v2, %v3555_v29  ;;  %v3516_v31 = vmul.f32 0.6931472, %v4602_v43  ;;  %v3572_v63 = vsel %vm3571_vm13, %v3567_v23, 0.0 }
0x20b6   :  { %v3573_v58 = vsel %vm3571_vm13, %v3568_v59, 0.0 }
0x20b7   :  { %v3569_v34 = vmul.f32 %v3565_v15, %v3561_v27  ;;  %v3520_v62 = vadd.f32 %v3516_v31, %v5631_v6  ;;  %v3574_v38 = vadd.f32 %v3573_v58, %v3572_v63 }
0x20b9   :  { %v3575_v47 = vsel %vm3571_vm13, %v3569_v34, 0.0 }
0x20ba   :  { %v3576_v26 = vadd.f32 %v3575_v47, %v3574_v38 }
0x20d1   :  { %v3558_v25 = vpop.xlane.xlu1 %3557 }
0x20d2   :  { %v3562_v33 = vsub.f32 %v3520_v62, %v3558_v25 }
0x20d4   :  { %v3570_v24 = vmul.f32 %v3566_v3, %v3562_v33 }
0x20d6   :  { %v3577_v53 = vsel %vm3571_vm13, %v3570_v24, 0.0 }
0x20d7   :  { %v3578_v28 = vadd.f32 %v3577_v53, %v3576_v26 }
0x20d9   :  { %v3579_v42 = vrot.slane %v3578_v28, 4 }
0x20da   :  { %v3686_v55 = vpop.xlane.xlu0 %3685 }
0x20db   :  { %v3580_v37 = vadd.f32 %v3579_v42, %v3578_v28  ;;  %4603 = vrcp.f32 %v3686_v55 }
0x20dc   :  { %4605 = vlog2.f32 %v3686_v55 }
0x20dd   :  { %4607 = vrcp.f32 %v3598_v54  ;;  %v3581_v6 = vrot.slane %v3580_v37, 2 }
0x20df   :  { %v3582_v32 = vadd.f32 %v3581_v6, %v3580_v37 }
0x20e1   :  { %v3583_v61 = vrot.slane %v3582_v32, 1 }
0x20e3   :  { %v3584_v5 = vadd.f32 %v3583_v61, %v3582_v32 }
0x20e5   :  { %v4604_v52 = vpop.eup %4603 }
0x20e6   :  { %v4606_v57 = vpop.eup %4605  ;;  %v3688_v36 = vmul.f32 %v4604_v52, %v5650_v35 }
0x20e7   :  { %v4608_v7 = vpop.eup %4607  ;;  %v3690_v9 = vmul.f32 0.6931472, %v4606_v57 }
0x20e8   :  { %3698 = vrot.lane.b32.xlu1 %v3688_v36, %s4656_s13  ;;  %v3600_v11 = vmul.f32 %v4608_v7, %v3584_v5 }
0x20e9   :  { %v3691_v10 = vsub.f32 %v5645_v56, %v3690_v9 }
0x20eb   :  { %3702 = vrot.lane.b32.xlu0 %v3691_v10, %s4657_s24 }
0x20ec   :  { %3706 = vrot.lane.b32.xlu1 %v3600_v11, %s5729_s1 }
0x215a   :  { %v3699_v12 = vpop.permute.xlu1 %3698 }
0x215b   :  { %v3709_v15 = vsel %vm110_vm0, %v5587_v39, %v3699_v12 }
0x215d   :  { %v3703_v16 = vpop.permute.xlu0 %3702 }
0x215e   :  { %v3711_v35 = vsel %vm3710_vm14, %v3709_v15, %v3703_v16  ;;  %v3707_v46 = vpop.permute.xlu1 %3706 }
0x215f   :  { %v3713_v17 = vsel %vm3712_vm15, %v3711_v35, %v3707_v46 }
0x2160   :  { %v3715_v56 = vsel %vm3714_vm1, %v3713_v17, 0.0 }
0x2161   :  { %v3717_v3 = vsel %vm3716_vm2, %v3715_v56, 0.0 }
0x2162   :  { %3718 = vst [vmem:[#allocation2] sm:$0xff] %v3717_v3 }
0x2163   :  { %4624 = shalt.err (!%p4621_p4)
}
0x2164   :  { %s4625_s30 = scalar_lea.hbm %s5711_s16, 128 }
0x2165   :  { %p4626_p5 = scmp.ne.s32.totalorder %s5711_s16, %s4625_s30  ;;  %p4629_p6 = scmp.lt.u32.totalorder %s4625_s30, %s5711_s16 }
0x2167   :  { %p4631_p7 = pnand %p4629_p6, %p4626_p5 }
0x2169   :  { %4634 = shalt.err (!%p4631_p7)
}
0x216a   :  { %3728 = dma.vmem_to_hbm [thread:$0]  %s3726_s26, 128, %s5711_s16, [#allocation3]  }
0x216b   :  { %4635 = dma.done.wait [#allocation3], 128  }
0x216c   :  { %4636 = vsyncadd [#allocation3], 4294967168 }
0x216d   :  { %3732 = vsyncpa [#allocation3], 1 }

</bundles_post_ra>
